<compile_context>
chip_gen: v7x
topology: tpu7x:2x2x1
jax: 0.10.0
libtpu: 0.0.40
codegen_flags: <defaults>
</compile_context>

<pallas_src>
import functools

import jax
import jax.numpy as jnp
import numpy as np
from jax.experimental import pallas as pl
from jax.experimental.pallas import tpu as pltpu


def _silu(v):
    return v * jax.nn.sigmoid(v)


# --------------------------------------------------------------------------
# Fused kernel: cv1 -> cv2 -> MatchNeck_Inner (+ residual), per batch element
# --------------------------------------------------------------------------
def _matchneck_fused_kernel(x_ref, w1_ref, s1_ref, b1_ref,
                            w2_ref, s2_ref, b2_ref,
                            wg_ref, sg_ref, bg_ref,
                            mh_ref, mw_ref, eh_ref, ew_ref,
                            o_ref, *, H, W, add):
    HW = H * W
    f32 = jnp.float32
    HIGHEST = jax.lax.Precision.HIGHEST

    def shifted_plane(plane, dh, dw):
        """shifted[c, h*W + w] = plane[c, (h+dh)*W + (w+dw)], 0 outside."""
        cin = plane.shape[0]
        s = dh * W + dw
        if s > 0:
            sh = jnp.concatenate(
                [plane[:, s:], jnp.zeros((cin, s), plane.dtype)], axis=1)
        elif s < 0:
            sh = jnp.concatenate(
                [jnp.zeros((cin, -s), plane.dtype), plane[:, :HW + s]], axis=1)
        else:
            sh = plane
        lane = jax.lax.broadcasted_iota(jnp.int32, (cin, HW), 1)
        conds = []
        if dw == 1:
            conds.append(lane % W < W - 1)
        elif dw == -1:
            conds.append(lane % W >= 1)
        if dh == 1:
            conds.append(lane < (H - 1) * W)
        elif dh == -1:
            conds.append(lane >= W)
        if not conds:
            return sh
        mask = conds[0]
        for c in conds[1:]:
            mask = jnp.logical_and(mask, c)
        return jnp.where(mask, sh, jnp.zeros_like(sh))

    def conv3x3_bn_silu(inp, w9_ref, s_ref, b_ref):
        """3x3 'same' conv as 9 MXU matmuls + folded BatchNorm + SiLU."""
        cout = w9_ref.shape[1]
        acc = jnp.zeros((cout, HW), f32)
        tap = 0
        for dh in (-1, 0, 1):
            for dw in (-1, 0, 1):
                acc = acc + jnp.dot(w9_ref[tap], shifted_plane(inp, dh, dw),
                                    preferred_element_type=f32,
                                    precision=HIGHEST)
                tap += 1
        y = acc * s_ref[...] + b_ref[...]            # (Cout, 1) broadcast
        return _silu(y)

    x = x_ref[0]                                     # (C1, HW)
    y1 = conv3x3_bn_silu(x, w1_ref, s1_ref, b1_ref)  # cv1 -> (c_, HW)
    y2 = conv3x3_bn_silu(y1, w2_ref, s2_ref, b2_ref) # cv2 -> (C2, HW)

    # ---- MatchNeck_Inner, vectorized over channels --------------------
    pool_h = jnp.dot(y2, mh_ref[...], preferred_element_type=f32,
                     precision=HIGHEST)              # (C2, H)  mean over W
    pool_w = jnp.dot(y2, mw_ref[...], preferred_element_type=f32,
                     precision=HIGHEST)              # (C2, W)  mean over H
    gap = jnp.mean(y2, axis=1, keepdims=True)        # (C2, 1)  global avg pool

    sig_h = jax.nn.sigmoid(pool_h)                   # sigmoid(cat) split
    sig_w = jax.nn.sigmoid(pool_w)
    ph = pool_h * sig_h                              # x_pool_h * weight
    pw = pool_w * sig_w                              # x_pool_w * weight
    mean_weight = (jnp.sum(sig_h, axis=1, keepdims=True)
                   + jnp.sum(sig_w, axis=1, keepdims=True)) / float(H + W)

    # gap 1x1 conv + folded BN + SiLU (single small dot, no channel loop)
    g = jnp.dot(wg_ref[...], gap, preferred_element_type=f32,
                precision=HIGHEST)                   # (C2, 1)
    g = g * sg_ref[...] + bg_ref[...]
    g = _silu(g)
    pch = g * mean_weight                            # (C2, 1)

    # expand H / W gates back onto the lane-dense plane via one-hot matmuls
    gate_h = jnp.dot(jax.nn.sigmoid(ph), eh_ref[...],
                     preferred_element_type=f32, precision=HIGHEST)  # (C2, HW)
    gate_w = jnp.dot(jax.nn.sigmoid(pw), ew_ref[...],
                     preferred_element_type=f32, precision=HIGHEST)  # (C2, HW)

    out = y2 * gate_h * gate_w * jax.nn.sigmoid(pch)
    if add:
        out = out + x
    o_ref[0] = out.astype(o_ref.dtype)


def matchneck_forward(x, p, add):
    """x: (B, C1, H, W) f32; p: folded-BN params. Returns (B, C2, H, W)."""
    B, C1, H, W = x.shape
    HW = H * W
    c_ = p['w1'].shape[0]
    C2 = p['w2'].shape[0]

    x_flat = x.reshape(B, C1, HW)
    w1_9 = jnp.transpose(p['w1'], (2, 3, 0, 1)).reshape(9, c_, C1)
    w2_9 = jnp.transpose(p['w2'], (2, 3, 0, 1)).reshape(9, C2, c_)
    s1 = p['s1'].reshape(c_, 1)
    b1 = p['b1'].reshape(c_, 1)
    s2 = p['s2'].reshape(C2, 1)
    b2 = p['b2'].reshape(C2, 1)
    wg = p['wg']
    sg = p['sg'].reshape(C2, 1)
    bg = p['bg'].reshape(C2, 1)

    # constant pooling (mean) and expansion (one-hot) matrices
    pidx = np.arange(HW)
    eh_np = (pidx // W == np.arange(H)[:, None]).astype(np.float32)  # (H, HW)
    ew_np = (pidx % W == np.arange(W)[:, None]).astype(np.float32)   # (W, HW)
    mh = jnp.asarray(eh_np.T / W)                                    # (HW, H)
    mw = jnp.asarray(ew_np.T / H)                                    # (HW, W)
    eh = jnp.asarray(eh_np)
    ew = jnp.asarray(ew_np)

    kernel = functools.partial(_matchneck_fused_kernel, H=H, W=W, add=add)

    def const2(shape):
        return pl.BlockSpec(shape, lambda b: (0, 0))

    def const3(shape):
        return pl.BlockSpec(shape, lambda b: (0, 0, 0))

    out_flat = pl.pallas_call(
        kernel,
        out_shape=jax.ShapeDtypeStruct((B, C2, HW), jnp.float32),
        grid_spec=pltpu.PrefetchScalarGridSpec(
            num_scalar_prefetch=0,
            grid=(B,),
            in_specs=[
                pl.BlockSpec((1, C1, HW), lambda b: (b, 0, 0)),   # x
                const3((9, c_, C1)),                              # w1 taps
                const2((c_, 1)), const2((c_, 1)),                 # s1, b1
                const3((9, C2, c_)),                              # w2 taps
                const2((C2, 1)), const2((C2, 1)),                 # s2, b2
                const2((C2, C2)),                                 # wg (1x1)
                const2((C2, 1)), const2((C2, 1)),                 # sg, bg
                const2((HW, H)), const2((HW, W)),                 # mean mats
                const2((H, HW)), const2((W, HW)),                 # one-hot mats
            ],
            out_specs=pl.BlockSpec((1, C2, HW), lambda b: (b, 0, 0)),
        ),
        compiler_params=pltpu.CompilerParams(
            dimension_semantics=("parallel",),
            vmem_limit_bytes=32 * 1024 * 1024),
    )(x_flat, w1_9, s1, b1, w2_9, s2, b2, wg, sg, bg, mh, mw, eh, ew)

    return out_flat.reshape(B, C2, H, W)


# --------------------------------------------------------------------------
# Pure-JAX reference (for correctness check only)
# --------------------------------------------------------------------------
def _conv_bn_silu_ref(x, w, scale, bias):
    y = jax.lax.conv_general_dilated(
        x, w, window_strides=(1, 1), padding='SAME',
        dimension_numbers=('NCHW', 'OIHW', 'NCHW'),
        precision=jax.lax.Precision.HIGHEST)
    y = y * scale[None, :, None, None] + bias[None, :, None, None]
    return _silu(y)


def matchneck_ref(x, p, add):
    y = _conv_bn_silu_ref(x, p['w1'], p['s1'], p['b1'])
    y = _conv_bn_silu_ref(y, p['w2'], p['s2'], p['b2'])
    B, C, H, W = y.shape
    pool_h = jnp.mean(y, axis=3, keepdims=True)
    pool_w = jnp.mean(y, axis=2, keepdims=True)
    gap_in = jnp.mean(y, axis=(2, 3), keepdims=True)
    gap = _silu(jnp.einsum('bcij,oc->boij', gap_in, p['wg'],
                           precision=jax.lax.Precision.HIGHEST)
                * p['sg'][None, :, None, None] + p['bg'][None, :, None, None])
    sig_h = jax.nn.sigmoid(pool_h)
    sig_w = jax.nn.sigmoid(pool_w)
    ph = pool_h * sig_h
    pw = pool_w * sig_w
    mean_weight = (jnp.sum(sig_h, axis=2, keepdims=True)
                   + jnp.sum(sig_w, axis=3, keepdims=True)) / (H + W)
    pch = gap * mean_weight
    out = y * jax.nn.sigmoid(ph) * jax.nn.sigmoid(pw) * jax.nn.sigmoid(pch)
    return x + out if add else out


# --------------------------------------------------------------------------
if __name__ == "__main__":
    key = jax.random.PRNGKey(0)
    B, C1, C2, H, W = 2, 4, 4, 16, 16
    e = 0.5
    c_ = int(C2 * e)                    # hidden channels of MatchNeck
    add = True and (C1 == C2)           # shortcut=True and c1 == c2

    keys = jax.random.split(key, 16)
    x = jax.random.normal(keys[0], (B, C1, H, W), jnp.float32)

    def bn_fold(kg, kb, km, kv, c, eps=1e-5):
        gamma = 1.0 + 0.1 * jax.random.normal(kg, (c,), jnp.float32)
        beta = 0.1 * jax.random.normal(kb, (c,), jnp.float32)
        mean = 0.1 * jax.random.normal(km, (c,), jnp.float32)
        var = jax.random.uniform(kv, (c,), jnp.float32, 0.5, 1.5)
        scale = gamma / jnp.sqrt(var + eps)
        bias = beta - mean * scale
        return scale, bias

    w1 = 0.2 * jax.random.normal(keys[1], (c_, C1, 3, 3), jnp.float32)
    s1, b1 = bn_fold(keys[2], keys[3], keys[4], keys[5], c_)
    w2 = 0.2 * jax.random.normal(keys[6], (C2, c_, 3, 3), jnp.float32)
    s2, b2 = bn_fold(keys[7], keys[8], keys[9], keys[10], C2)
    wg = 0.2 * jax.random.normal(keys[11], (C2, C2), jnp.float32)  # 1x1 conv
    sg, bg = bn_fold(keys[12], keys[13], keys[14], keys[15], C2)

    params = dict(w1=w1, s1=s1, b1=b1, w2=w2, s2=s2, b2=b2,
                  wg=wg, sg=sg, bg=bg)

    out = matchneck_forward(x, params, add)
    out = jax.block_until_ready(out)

    ref = matchneck_ref(x, params, add)
    assert out.shape == (B, C2, H, W)
    np.testing.assert_allclose(np.asarray(out), np.asarray(ref),
                               atol=1e-3, rtol=1e-3)
    print("KERNEL_OK")
</pallas_src>

<mosaic_0001>
module attributes {stable_mosaic.version = 11 : i64} {
  func.func @_matchneck_fused_kernel(%arg0: i32, %arg1: memref<1x4x256xf32, #tpu.memory_space<vmem>>, %arg2: memref<9x2x4xf32, #tpu.memory_space<vmem>>, %arg3: memref<2x1xf32, #tpu.memory_space<vmem>>, %arg4: memref<2x1xf32, #tpu.memory_space<vmem>>, %arg5: memref<9x4x2xf32, #tpu.memory_space<vmem>>, %arg6: memref<4x1xf32, #tpu.memory_space<vmem>>, %arg7: memref<4x1xf32, #tpu.memory_space<vmem>>, %arg8: memref<4x4xf32, #tpu.memory_space<vmem>>, %arg9: memref<4x1xf32, #tpu.memory_space<vmem>>, %arg10: memref<4x1xf32, #tpu.memory_space<vmem>>, %arg11: memref<256x16xf32, #tpu.memory_space<vmem>>, %arg12: memref<256x16xf32, #tpu.memory_space<vmem>>, %arg13: memref<16x256xf32, #tpu.memory_space<vmem>>, %arg14: memref<16x256xf32, #tpu.memory_space<vmem>>, %arg15: memref<1x4x256xf32, #tpu.memory_space<vmem>>) attributes {dimension_semantics = [#tpu.dimension_semantics<parallel>], iteration_bounds = array<i64: 2>, scalar_prefetch = 0 : i64, scratch_operands = 0 : i64, tpu.core_type = #tpu.core_type<tc>, window_params = [{transform_indices = @transform_0, window_bounds = array<i64: 1, 4, 256>}, {pipeline_mode = #tpu.pipeline_mode<synchronous>, transform_indices = @transform_1, window_bounds = array<i64: 9, 2, 4>}, {pipeline_mode = #tpu.pipeline_mode<synchronous>, transform_indices = @transform_2, window_bounds = array<i64: 2, 1>}, {pipeline_mode = #tpu.pipeline_mode<synchronous>, transform_indices = @transform_3, window_bounds = array<i64: 2, 1>}, {pipeline_mode = #tpu.pipeline_mode<synchronous>, transform_indices = @transform_4, window_bounds = array<i64: 9, 4, 2>}, {pipeline_mode = #tpu.pipeline_mode<synchronous>, transform_indices = @transform_5, window_bounds = array<i64: 4, 1>}, {pipeline_mode = #tpu.pipeline_mode<synchronous>, transform_indices = @transform_6, window_bounds = array<i64: 4, 1>}, {pipeline_mode = #tpu.pipeline_mode<synchronous>, transform_indices = @transform_7, window_bounds = array<i64: 4, 4>}, {pipeline_mode = #tpu.pipeline_mode<synchronous>, transform_indices = @transform_8, window_bounds = array<i64: 4, 1>}, {pipeline_mode = #tpu.pipeline_mode<synchronous>, transform_indices = @transform_9, window_bounds = array<i64: 4, 1>}, {pipeline_mode = #tpu.pipeline_mode<synchronous>, transform_indices = @transform_10, window_bounds = array<i64: 256, 16>}, {pipeline_mode = #tpu.pipeline_mode<synchronous>, transform_indices = @transform_11, window_bounds = array<i64: 256, 16>}, {pipeline_mode = #tpu.pipeline_mode<synchronous>, transform_indices = @transform_12, window_bounds = array<i64: 16, 256>}, {pipeline_mode = #tpu.pipeline_mode<synchronous>, transform_indices = @transform_13, window_bounds = array<i64: 16, 256>}, {transform_indices = @transform_14, window_bounds = array<i64: 1, 4, 256>}]} {
    %c0 = arith.constant 0 : index
    %c0_0 = arith.constant 0 : index
    %c0_1 = arith.constant 0 : index
    %0 = vector.load %arg1[%c0, %c0_0, %c0_1] : memref<1x4x256xf32, #tpu.memory_space<vmem>>, vector<1x4x256xf32>
    %1 = vector.shape_cast %0 : vector<1x4x256xf32> to vector<4x256xf32>
    %cst = arith.constant 0.000000e+00 : f32
    %2 = vector.broadcast %cst : f32 to vector<2x256xf32>
    %c0_2 = arith.constant 0 : index
    %c0_3 = arith.constant 0 : index
    %c0_4 = arith.constant 0 : index
    %3 = vector.load %arg2[%c0_2, %c0_3, %c0_4] : memref<9x2x4xf32, #tpu.memory_space<vmem>>, vector<1x2x4xf32>
    %4 = vector.shape_cast %3 : vector<1x2x4xf32> to vector<2x4xf32>
    %cst_5 = arith.constant 0.000000e+00 : f32
    %5 = vector.broadcast %cst_5 : f32 to vector<4x17xf32>
    %6 = vector.extract_strided_slice %1 {offsets = [0, 0], sizes = [4, 239], strides = [1, 1]} : vector<4x256xf32> to vector<4x239xf32>
    %7 = tpu.concatenate %5, %6 in 1 : vector<4x17xf32>, vector<4x239xf32> -> vector<4x256xf32>
    %8 = tpu.iota {dimensions = array<i32: 1>} : vector<4x256xi32>
    %c16_i32 = arith.constant 16 : i32
    %c0_i32 = arith.constant 0 : i32
    %9 = arith.cmpi eq, %c16_i32, %c0_i32 : i32
    %c1_i32 = arith.constant 1 : i32
    %10 = arith.select %9, %c1_i32, %c16_i32 : i32
    %11 = vector.broadcast %10 : i32 to vector<4x256xi32>
    %12 = arith.remsi %8, %11 : vector<4x256xi32>
    %c0_i32_6 = arith.constant 0 : i32
    %13 = vector.broadcast %c0_i32_6 : i32 to vector<4x256xi32>
    %14 = arith.cmpi ne, %12, %13 : vector<4x256xi32>
    %c0_i32_7 = arith.constant 0 : i32
    %15 = vector.broadcast %c0_i32_7 : i32 to vector<4x256xi32>
    %16 = arith.cmpi slt, %12, %15 : vector<4x256xi32>
    %c0_i32_8 = arith.constant 0 : i32
    %17 = arith.cmpi slt, %10, %c0_i32_8 : i32
    %18 = vector.broadcast %17 : i1 to vector<4x256xi1>
    %19 = vector.broadcast %18 : vector<4x256xi1> to vector<4x256xi1>
    %20 = arith.xori %16, %19 : vector<4x256xi1>
    %21 = arith.andi %20, %14 : vector<4x256xi1>
    %22 = vector.broadcast %10 : i32 to vector<4x256xi32>
    %23 = arith.addi %12, %22 : vector<4x256xi32>
    %24 = arith.select %21, %23, %12 : vector<4x256xi1>, vector<4x256xi32>
    %c1_i32_9 = arith.constant 1 : i32
    %25 = vector.broadcast %c1_i32_9 : i32 to vector<4x256xi32>
    %26 = arith.cmpi sge, %24, %25 : vector<4x256xi32>
    %c16_i32_10 = arith.constant 16 : i32
    %27 = vector.broadcast %c16_i32_10 : i32 to vector<4x256xi32>
    %28 = arith.cmpi sge, %8, %27 : vector<4x256xi32>
    %29 = arith.andi %26, %28 : vector<4x256xi1>
    %cst_11 = arith.constant 0.000000e+00 : f32
    %30 = vector.broadcast %cst_11 : f32 to vector<4x256xf32>
    %31 = arith.select %29, %7, %30 : vector<4x256xi1>, vector<4x256xf32>
    %cst_12 = arith.constant dense<0.000000e+00> : vector<2x256xf32>
    %32 = tpu.matmul %4, %31, %cst_12 {dimension_numbers = #tpu.dot_dimension_numbers<[1], [0], [0], [1], [0, 0, 1, 1], [], []>, precision = #tpu.contract_precision<fp32>} : vector<2x4xf32>, vector<4x256xf32>, vector<2x256xf32> -> vector<2x256xf32>
    %33 = arith.addf %2, %32 : vector<2x256xf32>
    %c1 = arith.constant 1 : index
    %c0_13 = arith.constant 0 : index
    %c0_14 = arith.constant 0 : index
    %34 = vector.load %arg2[%c1, %c0_13, %c0_14] : memref<9x2x4xf32, #tpu.memory_space<vmem>>, vector<1x2x4xf32>
    %35 = vector.shape_cast %34 : vector<1x2x4xf32> to vector<2x4xf32>
    %cst_15 = arith.constant 0.000000e+00 : f32
    %36 = vector.broadcast %cst_15 : f32 to vector<4x16xf32>
    %37 = vector.extract_strided_slice %1 {offsets = [0, 0], sizes = [4, 240], strides = [1, 1]} : vector<4x256xf32> to vector<4x240xf32>
    %38 = tpu.concatenate %36, %37 in 1 : vector<4x16xf32>, vector<4x240xf32> -> vector<4x256xf32>
    %39 = tpu.iota {dimensions = array<i32: 1>} : vector<4x256xi32>
    %c16_i32_16 = arith.constant 16 : i32
    %40 = vector.broadcast %c16_i32_16 : i32 to vector<4x256xi32>
    %41 = arith.cmpi sge, %39, %40 : vector<4x256xi32>
    %cst_17 = arith.constant 0.000000e+00 : f32
    %42 = vector.broadcast %cst_17 : f32 to vector<4x256xf32>
    %43 = arith.select %41, %38, %42 : vector<4x256xi1>, vector<4x256xf32>
    %cst_18 = arith.constant dense<0.000000e+00> : vector<2x256xf32>
    %44 = tpu.matmul %35, %43, %cst_18 {dimension_numbers = #tpu.dot_dimension_numbers<[1], [0], [0], [1], [0, 0, 1, 1], [], []>, precision = #tpu.contract_precision<fp32>} : vector<2x4xf32>, vector<4x256xf32>, vector<2x256xf32> -> vector<2x256xf32>
    %45 = arith.addf %33, %44 : vector<2x256xf32>
    %c2 = arith.constant 2 : index
    %c0_19 = arith.constant 0 : index
    %c0_20 = arith.constant 0 : index
    %46 = vector.load %arg2[%c2, %c0_19, %c0_20] : memref<9x2x4xf32, #tpu.memory_space<vmem>>, vector<1x2x4xf32>
    %47 = vector.shape_cast %46 : vector<1x2x4xf32> to vector<2x4xf32>
    %cst_21 = arith.constant 0.000000e+00 : f32
    %48 = vector.broadcast %cst_21 : f32 to vector<4x15xf32>
    %49 = vector.extract_strided_slice %1 {offsets = [0, 0], sizes = [4, 241], strides = [1, 1]} : vector<4x256xf32> to vector<4x241xf32>
    %50 = tpu.concatenate %48, %49 in 1 : vector<4x15xf32>, vector<4x241xf32> -> vector<4x256xf32>
    %51 = tpu.iota {dimensions = array<i32: 1>} : vector<4x256xi32>
    %c16_i32_22 = arith.constant 16 : i32
    %c0_i32_23 = arith.constant 0 : i32
    %52 = arith.cmpi eq, %c16_i32_22, %c0_i32_23 : i32
    %c1_i32_24 = arith.constant 1 : i32
    %53 = arith.select %52, %c1_i32_24, %c16_i32_22 : i32
    %54 = vector.broadcast %53 : i32 to vector<4x256xi32>
    %55 = arith.remsi %51, %54 : vector<4x256xi32>
    %c0_i32_25 = arith.constant 0 : i32
    %56 = vector.broadcast %c0_i32_25 : i32 to vector<4x256xi32>
    %57 = arith.cmpi ne, %55, %56 : vector<4x256xi32>
    %c0_i32_26 = arith.constant 0 : i32
    %58 = vector.broadcast %c0_i32_26 : i32 to vector<4x256xi32>
    %59 = arith.cmpi slt, %55, %58 : vector<4x256xi32>
    %c0_i32_27 = arith.constant 0 : i32
    %60 = arith.cmpi slt, %53, %c0_i32_27 : i32
    %61 = vector.broadcast %60 : i1 to vector<4x256xi1>
    %62 = vector.broadcast %61 : vector<4x256xi1> to vector<4x256xi1>
    %63 = arith.xori %59, %62 : vector<4x256xi1>
    %64 = arith.andi %63, %57 : vector<4x256xi1>
    %65 = vector.broadcast %53 : i32 to vector<4x256xi32>
    %66 = arith.addi %55, %65 : vector<4x256xi32>
    %67 = arith.select %64, %66, %55 : vector<4x256xi1>, vector<4x256xi32>
    %c15_i32 = arith.constant 15 : i32
    %68 = vector.broadcast %c15_i32 : i32 to vector<4x256xi32>
    %69 = arith.cmpi slt, %67, %68 : vector<4x256xi32>
    %c16_i32_28 = arith.constant 16 : i32
    %70 = vector.broadcast %c16_i32_28 : i32 to vector<4x256xi32>
    %71 = arith.cmpi sge, %51, %70 : vector<4x256xi32>
    %72 = arith.andi %69, %71 : vector<4x256xi1>
    %cst_29 = arith.constant 0.000000e+00 : f32
    %73 = vector.broadcast %cst_29 : f32 to vector<4x256xf32>
    %74 = arith.select %72, %50, %73 : vector<4x256xi1>, vector<4x256xf32>
    %cst_30 = arith.constant dense<0.000000e+00> : vector<2x256xf32>
    %75 = tpu.matmul %47, %74, %cst_30 {dimension_numbers = #tpu.dot_dimension_numbers<[1], [0], [0], [1], [0, 0, 1, 1], [], []>, precision = #tpu.contract_precision<fp32>} : vector<2x4xf32>, vector<4x256xf32>, vector<2x256xf32> -> vector<2x256xf32>
    %76 = arith.addf %45, %75 : vector<2x256xf32>
    %c3 = arith.constant 3 : index
    %c0_31 = arith.constant 0 : index
    %c0_32 = arith.constant 0 : index
    %77 = vector.load %arg2[%c3, %c0_31, %c0_32] : memref<9x2x4xf32, #tpu.memory_space<vmem>>, vector<1x2x4xf32>
    %78 = vector.shape_cast %77 : vector<1x2x4xf32> to vector<2x4xf32>
    %cst_33 = arith.constant 0.000000e+00 : f32
    %79 = vector.broadcast %cst_33 : f32 to vector<4x1xf32>
    %80 = vector.extract_strided_slice %1 {offsets = [0, 0], sizes = [4, 255], strides = [1, 1]} : vector<4x256xf32> to vector<4x255xf32>
    %81 = tpu.concatenate %79, %80 in 1 : vector<4x1xf32>, vector<4x255xf32> -> vector<4x256xf32>
    %82 = tpu.iota {dimensions = array<i32: 1>} : vector<4x256xi32>
    %c16_i32_34 = arith.constant 16 : i32
    %c0_i32_35 = arith.constant 0 : i32
    %83 = arith.cmpi eq, %c16_i32_34, %c0_i32_35 : i32
    %c1_i32_36 = arith.constant 1 : i32
    %84 = arith.select %83, %c1_i32_36, %c16_i32_34 : i32
    %85 = vector.broadcast %84 : i32 to vector<4x256xi32>
    %86 = arith.remsi %82, %85 : vector<4x256xi32>
    %c0_i32_37 = arith.constant 0 : i32
    %87 = vector.broadcast %c0_i32_37 : i32 to vector<4x256xi32>
    %88 = arith.cmpi ne, %86, %87 : vector<4x256xi32>
    %c0_i32_38 = arith.constant 0 : i32
    %89 = vector.broadcast %c0_i32_38 : i32 to vector<4x256xi32>
    %90 = arith.cmpi slt, %86, %89 : vector<4x256xi32>
    %c0_i32_39 = arith.constant 0 : i32
    %91 = arith.cmpi slt, %84, %c0_i32_39 : i32
    %92 = vector.broadcast %91 : i1 to vector<4x256xi1>
    %93 = vector.broadcast %92 : vector<4x256xi1> to vector<4x256xi1>
    %94 = arith.xori %90, %93 : vector<4x256xi1>
    %95 = arith.andi %94, %88 : vector<4x256xi1>
    %96 = vector.broadcast %84 : i32 to vector<4x256xi32>
    %97 = arith.addi %86, %96 : vector<4x256xi32>
    %98 = arith.select %95, %97, %86 : vector<4x256xi1>, vector<4x256xi32>
    %c1_i32_40 = arith.constant 1 : i32
    %99 = vector.broadcast %c1_i32_40 : i32 to vector<4x256xi32>
    %100 = arith.cmpi sge, %98, %99 : vector<4x256xi32>
    %cst_41 = arith.constant 0.000000e+00 : f32
    %101 = vector.broadcast %cst_41 : f32 to vector<4x256xf32>
    %102 = arith.select %100, %81, %101 : vector<4x256xi1>, vector<4x256xf32>
    %cst_42 = arith.constant dense<0.000000e+00> : vector<2x256xf32>
    %103 = tpu.matmul %78, %102, %cst_42 {dimension_numbers = #tpu.dot_dimension_numbers<[1], [0], [0], [1], [0, 0, 1, 1], [], []>, precision = #tpu.contract_precision<fp32>} : vector<2x4xf32>, vector<4x256xf32>, vector<2x256xf32> -> vector<2x256xf32>
    %104 = arith.addf %76, %103 : vector<2x256xf32>
    %c4 = arith.constant 4 : index
    %c0_43 = arith.constant 0 : index
    %c0_44 = arith.constant 0 : index
    %105 = vector.load %arg2[%c4, %c0_43, %c0_44] : memref<9x2x4xf32, #tpu.memory_space<vmem>>, vector<1x2x4xf32>
    %106 = vector.shape_cast %105 : vector<1x2x4xf32> to vector<2x4xf32>
    %cst_45 = arith.constant dense<0.000000e+00> : vector<2x256xf32>
    %107 = tpu.matmul %106, %1, %cst_45 {dimension_numbers = #tpu.dot_dimension_numbers<[1], [0], [0], [1], [0, 0, 1, 1], [], []>, precision = #tpu.contract_precision<fp32>} : vector<2x4xf32>, vector<4x256xf32>, vector<2x256xf32> -> vector<2x256xf32>
    %108 = arith.addf %104, %107 : vector<2x256xf32>
    %c5 = arith.constant 5 : index
    %c0_46 = arith.constant 0 : index
    %c0_47 = arith.constant 0 : index
    %109 = vector.load %arg2[%c5, %c0_46, %c0_47] : memref<9x2x4xf32, #tpu.memory_space<vmem>>, vector<1x2x4xf32>
    %110 = vector.shape_cast %109 : vector<1x2x4xf32> to vector<2x4xf32>
    %111 = vector.extract_strided_slice %1 {offsets = [0, 1], sizes = [4, 255], strides = [1, 1]} : vector<4x256xf32> to vector<4x255xf32>
    %cst_48 = arith.constant 0.000000e+00 : f32
    %112 = vector.broadcast %cst_48 : f32 to vector<4x1xf32>
    %113 = tpu.concatenate %111, %112 in 1 : vector<4x255xf32>, vector<4x1xf32> -> vector<4x256xf32>
    %114 = tpu.iota {dimensions = array<i32: 1>} : vector<4x256xi32>
    %c16_i32_49 = arith.constant 16 : i32
    %c0_i32_50 = arith.constant 0 : i32
    %115 = arith.cmpi eq, %c16_i32_49, %c0_i32_50 : i32
    %c1_i32_51 = arith.constant 1 : i32
    %116 = arith.select %115, %c1_i32_51, %c16_i32_49 : i32
    %117 = vector.broadcast %116 : i32 to vector<4x256xi32>
    %118 = arith.remsi %114, %117 : vector<4x256xi32>
    %c0_i32_52 = arith.constant 0 : i32
    %119 = vector.broadcast %c0_i32_52 : i32 to vector<4x256xi32>
    %120 = arith.cmpi ne, %118, %119 : vector<4x256xi32>
    %c0_i32_53 = arith.constant 0 : i32
    %121 = vector.broadcast %c0_i32_53 : i32 to vector<4x256xi32>
    %122 = arith.cmpi slt, %118, %121 : vector<4x256xi32>
    %c0_i32_54 = arith.constant 0 : i32
    %123 = arith.cmpi slt, %116, %c0_i32_54 : i32
    %124 = vector.broadcast %123 : i1 to vector<4x256xi1>
    %125 = vector.broadcast %124 : vector<4x256xi1> to vector<4x256xi1>
    %126 = arith.xori %122, %125 : vector<4x256xi1>
    %127 = arith.andi %126, %120 : vector<4x256xi1>
    %128 = vector.broadcast %116 : i32 to vector<4x256xi32>
    %129 = arith.addi %118, %128 : vector<4x256xi32>
    %130 = arith.select %127, %129, %118 : vector<4x256xi1>, vector<4x256xi32>
    %c15_i32_55 = arith.constant 15 : i32
    %131 = vector.broadcast %c15_i32_55 : i32 to vector<4x256xi32>
    %132 = arith.cmpi slt, %130, %131 : vector<4x256xi32>
    %cst_56 = arith.constant 0.000000e+00 : f32
    %133 = vector.broadcast %cst_56 : f32 to vector<4x256xf32>
    %134 = arith.select %132, %113, %133 : vector<4x256xi1>, vector<4x256xf32>
    %cst_57 = arith.constant dense<0.000000e+00> : vector<2x256xf32>
    %135 = tpu.matmul %110, %134, %cst_57 {dimension_numbers = #tpu.dot_dimension_numbers<[1], [0], [0], [1], [0, 0, 1, 1], [], []>, precision = #tpu.contract_precision<fp32>} : vector<2x4xf32>, vector<4x256xf32>, vector<2x256xf32> -> vector<2x256xf32>
    %136 = arith.addf %108, %135 : vector<2x256xf32>
    %c6 = arith.constant 6 : index
    %c0_58 = arith.constant 0 : index
    %c0_59 = arith.constant 0 : index
    %137 = vector.load %arg2[%c6, %c0_58, %c0_59] : memref<9x2x4xf32, #tpu.memory_space<vmem>>, vector<1x2x4xf32>
    %138 = vector.shape_cast %137 : vector<1x2x4xf32> to vector<2x4xf32>
    %139 = vector.extract_strided_slice %1 {offsets = [0, 15], sizes = [4, 241], strides = [1, 1]} : vector<4x256xf32> to vector<4x241xf32>
    %cst_60 = arith.constant 0.000000e+00 : f32
    %140 = vector.broadcast %cst_60 : f32 to vector<4x15xf32>
    %141 = tpu.concatenate %139, %140 in 1 : vector<4x241xf32>, vector<4x15xf32> -> vector<4x256xf32>
    %142 = tpu.iota {dimensions = array<i32: 1>} : vector<4x256xi32>
    %c16_i32_61 = arith.constant 16 : i32
    %c0_i32_62 = arith.constant 0 : i32
    %143 = arith.cmpi eq, %c16_i32_61, %c0_i32_62 : i32
    %c1_i32_63 = arith.constant 1 : i32
    %144 = arith.select %143, %c1_i32_63, %c16_i32_61 : i32
    %145 = vector.broadcast %144 : i32 to vector<4x256xi32>
    %146 = arith.remsi %142, %145 : vector<4x256xi32>
    %c0_i32_64 = arith.constant 0 : i32
    %147 = vector.broadcast %c0_i32_64 : i32 to vector<4x256xi32>
    %148 = arith.cmpi ne, %146, %147 : vector<4x256xi32>
    %c0_i32_65 = arith.constant 0 : i32
    %149 = vector.broadcast %c0_i32_65 : i32 to vector<4x256xi32>
    %150 = arith.cmpi slt, %146, %149 : vector<4x256xi32>
    %c0_i32_66 = arith.constant 0 : i32
    %151 = arith.cmpi slt, %144, %c0_i32_66 : i32
    %152 = vector.broadcast %151 : i1 to vector<4x256xi1>
    %153 = vector.broadcast %152 : vector<4x256xi1> to vector<4x256xi1>
    %154 = arith.xori %150, %153 : vector<4x256xi1>
    %155 = arith.andi %154, %148 : vector<4x256xi1>
    %156 = vector.broadcast %144 : i32 to vector<4x256xi32>
    %157 = arith.addi %146, %156 : vector<4x256xi32>
    %158 = arith.select %155, %157, %146 : vector<4x256xi1>, vector<4x256xi32>
    %c1_i32_67 = arith.constant 1 : i32
    %159 = vector.broadcast %c1_i32_67 : i32 to vector<4x256xi32>
    %160 = arith.cmpi sge, %158, %159 : vector<4x256xi32>
    %c240_i32 = arith.constant 240 : i32
    %161 = vector.broadcast %c240_i32 : i32 to vector<4x256xi32>
    %162 = arith.cmpi slt, %142, %161 : vector<4x256xi32>
    %163 = arith.andi %160, %162 : vector<4x256xi1>
    %cst_68 = arith.constant 0.000000e+00 : f32
    %164 = vector.broadcast %cst_68 : f32 to vector<4x256xf32>
    %165 = arith.select %163, %141, %164 : vector<4x256xi1>, vector<4x256xf32>
    %cst_69 = arith.constant dense<0.000000e+00> : vector<2x256xf32>
    %166 = tpu.matmul %138, %165, %cst_69 {dimension_numbers = #tpu.dot_dimension_numbers<[1], [0], [0], [1], [0, 0, 1, 1], [], []>, precision = #tpu.contract_precision<fp32>} : vector<2x4xf32>, vector<4x256xf32>, vector<2x256xf32> -> vector<2x256xf32>
    %167 = arith.addf %136, %166 : vector<2x256xf32>
    %c7 = arith.constant 7 : index
    %c0_70 = arith.constant 0 : index
    %c0_71 = arith.constant 0 : index
    %168 = vector.load %arg2[%c7, %c0_70, %c0_71] : memref<9x2x4xf32, #tpu.memory_space<vmem>>, vector<1x2x4xf32>
    %169 = vector.shape_cast %168 : vector<1x2x4xf32> to vector<2x4xf32>
    %170 = vector.extract_strided_slice %1 {offsets = [0, 16], sizes = [4, 240], strides = [1, 1]} : vector<4x256xf32> to vector<4x240xf32>
    %cst_72 = arith.constant 0.000000e+00 : f32
    %171 = vector.broadcast %cst_72 : f32 to vector<4x16xf32>
    %172 = tpu.concatenate %170, %171 in 1 : vector<4x240xf32>, vector<4x16xf32> -> vector<4x256xf32>
    %173 = tpu.iota {dimensions = array<i32: 1>} : vector<4x256xi32>
    %c240_i32_73 = arith.constant 240 : i32
    %174 = vector.broadcast %c240_i32_73 : i32 to vector<4x256xi32>
    %175 = arith.cmpi slt, %173, %174 : vector<4x256xi32>
    %cst_74 = arith.constant 0.000000e+00 : f32
    %176 = vector.broadcast %cst_74 : f32 to vector<4x256xf32>
    %177 = arith.select %175, %172, %176 : vector<4x256xi1>, vector<4x256xf32>
    %cst_75 = arith.constant dense<0.000000e+00> : vector<2x256xf32>
    %178 = tpu.matmul %169, %177, %cst_75 {dimension_numbers = #tpu.dot_dimension_numbers<[1], [0], [0], [1], [0, 0, 1, 1], [], []>, precision = #tpu.contract_precision<fp32>} : vector<2x4xf32>, vector<4x256xf32>, vector<2x256xf32> -> vector<2x256xf32>
    %179 = arith.addf %167, %178 : vector<2x256xf32>
    %c8 = arith.constant 8 : index
    %c0_76 = arith.constant 0 : index
    %c0_77 = arith.constant 0 : index
    %180 = vector.load %arg2[%c8, %c0_76, %c0_77] : memref<9x2x4xf32, #tpu.memory_space<vmem>>, vector<1x2x4xf32>
    %181 = vector.shape_cast %180 : vector<1x2x4xf32> to vector<2x4xf32>
    %182 = vector.extract_strided_slice %1 {offsets = [0, 17], sizes = [4, 239], strides = [1, 1]} : vector<4x256xf32> to vector<4x239xf32>
    %cst_78 = arith.constant 0.000000e+00 : f32
    %183 = vector.broadcast %cst_78 : f32 to vector<4x17xf32>
    %184 = tpu.concatenate %182, %183 in 1 : vector<4x239xf32>, vector<4x17xf32> -> vector<4x256xf32>
    %185 = tpu.iota {dimensions = array<i32: 1>} : vector<4x256xi32>
    %c16_i32_79 = arith.constant 16 : i32
    %c0_i32_80 = arith.constant 0 : i32
    %186 = arith.cmpi eq, %c16_i32_79, %c0_i32_80 : i32
    %c1_i32_81 = arith.constant 1 : i32
    %187 = arith.select %186, %c1_i32_81, %c16_i32_79 : i32
    %188 = vector.broadcast %187 : i32 to vector<4x256xi32>
    %189 = arith.remsi %185, %188 : vector<4x256xi32>
    %c0_i32_82 = arith.constant 0 : i32
    %190 = vector.broadcast %c0_i32_82 : i32 to vector<4x256xi32>
    %191 = arith.cmpi ne, %189, %190 : vector<4x256xi32>
    %c0_i32_83 = arith.constant 0 : i32
    %192 = vector.broadcast %c0_i32_83 : i32 to vector<4x256xi32>
    %193 = arith.cmpi slt, %189, %192 : vector<4x256xi32>
    %c0_i32_84 = arith.constant 0 : i32
    %194 = arith.cmpi slt, %187, %c0_i32_84 : i32
    %195 = vector.broadcast %194 : i1 to vector<4x256xi1>
    %196 = vector.broadcast %195 : vector<4x256xi1> to vector<4x256xi1>
    %197 = arith.xori %193, %196 : vector<4x256xi1>
    %198 = arith.andi %197, %191 : vector<4x256xi1>
    %199 = vector.broadcast %187 : i32 to vector<4x256xi32>
    %200 = arith.addi %189, %199 : vector<4x256xi32>
    %201 = arith.select %198, %200, %189 : vector<4x256xi1>, vector<4x256xi32>
    %c15_i32_85 = arith.constant 15 : i32
    %202 = vector.broadcast %c15_i32_85 : i32 to vector<4x256xi32>
    %203 = arith.cmpi slt, %201, %202 : vector<4x256xi32>
    %c240_i32_86 = arith.constant 240 : i32
    %204 = vector.broadcast %c240_i32_86 : i32 to vector<4x256xi32>
    %205 = arith.cmpi slt, %185, %204 : vector<4x256xi32>
    %206 = arith.andi %203, %205 : vector<4x256xi1>
    %cst_87 = arith.constant 0.000000e+00 : f32
    %207 = vector.broadcast %cst_87 : f32 to vector<4x256xf32>
    %208 = arith.select %206, %184, %207 : vector<4x256xi1>, vector<4x256xf32>
    %cst_88 = arith.constant dense<0.000000e+00> : vector<2x256xf32>
    %209 = tpu.matmul %181, %208, %cst_88 {dimension_numbers = #tpu.dot_dimension_numbers<[1], [0], [0], [1], [0, 0, 1, 1], [], []>, precision = #tpu.contract_precision<fp32>} : vector<2x4xf32>, vector<4x256xf32>, vector<2x256xf32> -> vector<2x256xf32>
    %210 = arith.addf %179, %209 : vector<2x256xf32>
    %c0_89 = arith.constant 0 : index
    %c0_90 = arith.constant 0 : index
    %211 = vector.load %arg3[%c0_89, %c0_90] : memref<2x1xf32, #tpu.memory_space<vmem>>, vector<2x1xf32>
    %212 = vector.broadcast %211 : vector<2x1xf32> to vector<2x256xf32>
    %213 = arith.mulf %210, %212 : vector<2x256xf32>
    %c0_91 = arith.constant 0 : index
    %c0_92 = arith.constant 0 : index
    %214 = vector.load %arg4[%c0_91, %c0_92] : memref<2x1xf32, #tpu.memory_space<vmem>>, vector<2x1xf32>
    %215 = vector.broadcast %214 : vector<2x1xf32> to vector<2x256xf32>
    %216 = arith.addf %213, %215 : vector<2x256xf32>
    %217 = arith.negf %216 : vector<2x256xf32>
    %218 = math.exp %217 : vector<2x256xf32>
    %cst_93 = arith.constant 1.000000e+00 : f32
    %219 = vector.broadcast %cst_93 : f32 to vector<2x256xf32>
    %220 = arith.addf %219, %218 : vector<2x256xf32>
    %221 = arith.divf %219, %220 : vector<2x256xf32>
    %222 = arith.mulf %216, %221 : vector<2x256xf32>
    %cst_94 = arith.constant 0.000000e+00 : f32
    %223 = vector.broadcast %cst_94 : f32 to vector<4x256xf32>
    %c0_95 = arith.constant 0 : index
    %c0_96 = arith.constant 0 : index
    %c0_97 = arith.constant 0 : index
    %224 = vector.load %arg5[%c0_95, %c0_96, %c0_97] : memref<9x4x2xf32, #tpu.memory_space<vmem>>, vector<1x4x2xf32>
    %225 = vector.shape_cast %224 : vector<1x4x2xf32> to vector<4x2xf32>
    %cst_98 = arith.constant 0.000000e+00 : f32
    %226 = vector.broadcast %cst_98 : f32 to vector<2x17xf32>
    %227 = vector.extract_strided_slice %222 {offsets = [0, 0], sizes = [2, 239], strides = [1, 1]} : vector<2x256xf32> to vector<2x239xf32>
    %228 = tpu.concatenate %226, %227 in 1 : vector<2x17xf32>, vector<2x239xf32> -> vector<2x256xf32>
    %229 = tpu.iota {dimensions = array<i32: 1>} : vector<2x256xi32>
    %c16_i32_99 = arith.constant 16 : i32
    %c0_i32_100 = arith.constant 0 : i32
    %230 = arith.cmpi eq, %c16_i32_99, %c0_i32_100 : i32
    %c1_i32_101 = arith.constant 1 : i32
    %231 = arith.select %230, %c1_i32_101, %c16_i32_99 : i32
    %232 = vector.broadcast %231 : i32 to vector<2x256xi32>
    %233 = arith.remsi %229, %232 : vector<2x256xi32>
    %c0_i32_102 = arith.constant 0 : i32
    %234 = vector.broadcast %c0_i32_102 : i32 to vector<2x256xi32>
    %235 = arith.cmpi ne, %233, %234 : vector<2x256xi32>
    %c0_i32_103 = arith.constant 0 : i32
    %236 = vector.broadcast %c0_i32_103 : i32 to vector<2x256xi32>
    %237 = arith.cmpi slt, %233, %236 : vector<2x256xi32>
    %c0_i32_104 = arith.constant 0 : i32
    %238 = arith.cmpi slt, %231, %c0_i32_104 : i32
    %239 = vector.broadcast %238 : i1 to vector<2x256xi1>
    %240 = vector.broadcast %239 : vector<2x256xi1> to vector<2x256xi1>
    %241 = arith.xori %237, %240 : vector<2x256xi1>
    %242 = arith.andi %241, %235 : vector<2x256xi1>
    %243 = vector.broadcast %231 : i32 to vector<2x256xi32>
    %244 = arith.addi %233, %243 : vector<2x256xi32>
    %245 = arith.select %242, %244, %233 : vector<2x256xi1>, vector<2x256xi32>
    %c1_i32_105 = arith.constant 1 : i32
    %246 = vector.broadcast %c1_i32_105 : i32 to vector<2x256xi32>
    %247 = arith.cmpi sge, %245, %246 : vector<2x256xi32>
    %c16_i32_106 = arith.constant 16 : i32
    %248 = vector.broadcast %c16_i32_106 : i32 to vector<2x256xi32>
    %249 = arith.cmpi sge, %229, %248 : vector<2x256xi32>
    %250 = arith.andi %247, %249 : vector<2x256xi1>
    %cst_107 = arith.constant 0.000000e+00 : f32
    %251 = vector.broadcast %cst_107 : f32 to vector<2x256xf32>
    %252 = arith.select %250, %228, %251 : vector<2x256xi1>, vector<2x256xf32>
    %cst_108 = arith.constant dense<0.000000e+00> : vector<4x256xf32>
    %253 = tpu.matmul %225, %252, %cst_108 {dimension_numbers = #tpu.dot_dimension_numbers<[1], [0], [0], [1], [0, 0, 1, 1], [], []>, precision = #tpu.contract_precision<fp32>} : vector<4x2xf32>, vector<2x256xf32>, vector<4x256xf32> -> vector<4x256xf32>
    %254 = arith.addf %223, %253 : vector<4x256xf32>
    %c1_109 = arith.constant 1 : index
    %c0_110 = arith.constant 0 : index
    %c0_111 = arith.constant 0 : index
    %255 = vector.load %arg5[%c1_109, %c0_110, %c0_111] : memref<9x4x2xf32, #tpu.memory_space<vmem>>, vector<1x4x2xf32>
    %256 = vector.shape_cast %255 : vector<1x4x2xf32> to vector<4x2xf32>
    %cst_112 = arith.constant 0.000000e+00 : f32
    %257 = vector.broadcast %cst_112 : f32 to vector<2x16xf32>
    %258 = vector.extract_strided_slice %222 {offsets = [0, 0], sizes = [2, 240], strides = [1, 1]} : vector<2x256xf32> to vector<2x240xf32>
    %259 = tpu.concatenate %257, %258 in 1 : vector<2x16xf32>, vector<2x240xf32> -> vector<2x256xf32>
    %260 = tpu.iota {dimensions = array<i32: 1>} : vector<2x256xi32>
    %c16_i32_113 = arith.constant 16 : i32
    %261 = vector.broadcast %c16_i32_113 : i32 to vector<2x256xi32>
    %262 = arith.cmpi sge, %260, %261 : vector<2x256xi32>
    %cst_114 = arith.constant 0.000000e+00 : f32
    %263 = vector.broadcast %cst_114 : f32 to vector<2x256xf32>
    %264 = arith.select %262, %259, %263 : vector<2x256xi1>, vector<2x256xf32>
    %cst_115 = arith.constant dense<0.000000e+00> : vector<4x256xf32>
    %265 = tpu.matmul %256, %264, %cst_115 {dimension_numbers = #tpu.dot_dimension_numbers<[1], [0], [0], [1], [0, 0, 1, 1], [], []>, precision = #tpu.contract_precision<fp32>} : vector<4x2xf32>, vector<2x256xf32>, vector<4x256xf32> -> vector<4x256xf32>
    %266 = arith.addf %254, %265 : vector<4x256xf32>
    %c2_116 = arith.constant 2 : index
    %c0_117 = arith.constant 0 : index
    %c0_118 = arith.constant 0 : index
    %267 = vector.load %arg5[%c2_116, %c0_117, %c0_118] : memref<9x4x2xf32, #tpu.memory_space<vmem>>, vector<1x4x2xf32>
    %268 = vector.shape_cast %267 : vector<1x4x2xf32> to vector<4x2xf32>
    %cst_119 = arith.constant 0.000000e+00 : f32
    %269 = vector.broadcast %cst_119 : f32 to vector<2x15xf32>
    %270 = vector.extract_strided_slice %222 {offsets = [0, 0], sizes = [2, 241], strides = [1, 1]} : vector<2x256xf32> to vector<2x241xf32>
    %271 = tpu.concatenate %269, %270 in 1 : vector<2x15xf32>, vector<2x241xf32> -> vector<2x256xf32>
    %272 = tpu.iota {dimensions = array<i32: 1>} : vector<2x256xi32>
    %c16_i32_120 = arith.constant 16 : i32
    %c0_i32_121 = arith.constant 0 : i32
    %273 = arith.cmpi eq, %c16_i32_120, %c0_i32_121 : i32
    %c1_i32_122 = arith.constant 1 : i32
    %274 = arith.select %273, %c1_i32_122, %c16_i32_120 : i32
    %275 = vector.broadcast %274 : i32 to vector<2x256xi32>
    %276 = arith.remsi %272, %275 : vector<2x256xi32>
    %c0_i32_123 = arith.constant 0 : i32
    %277 = vector.broadcast %c0_i32_123 : i32 to vector<2x256xi32>
    %278 = arith.cmpi ne, %276, %277 : vector<2x256xi32>
    %c0_i32_124 = arith.constant 0 : i32
    %279 = vector.broadcast %c0_i32_124 : i32 to vector<2x256xi32>
    %280 = arith.cmpi slt, %276, %279 : vector<2x256xi32>
    %c0_i32_125 = arith.constant 0 : i32
    %281 = arith.cmpi slt, %274, %c0_i32_125 : i32
    %282 = vector.broadcast %281 : i1 to vector<2x256xi1>
    %283 = vector.broadcast %282 : vector<2x256xi1> to vector<2x256xi1>
    %284 = arith.xori %280, %283 : vector<2x256xi1>
    %285 = arith.andi %284, %278 : vector<2x256xi1>
    %286 = vector.broadcast %274 : i32 to vector<2x256xi32>
    %287 = arith.addi %276, %286 : vector<2x256xi32>
    %288 = arith.select %285, %287, %276 : vector<2x256xi1>, vector<2x256xi32>
    %c15_i32_126 = arith.constant 15 : i32
    %289 = vector.broadcast %c15_i32_126 : i32 to vector<2x256xi32>
    %290 = arith.cmpi slt, %288, %289 : vector<2x256xi32>
    %c16_i32_127 = arith.constant 16 : i32
    %291 = vector.broadcast %c16_i32_127 : i32 to vector<2x256xi32>
    %292 = arith.cmpi sge, %272, %291 : vector<2x256xi32>
    %293 = arith.andi %290, %292 : vector<2x256xi1>
    %cst_128 = arith.constant 0.000000e+00 : f32
    %294 = vector.broadcast %cst_128 : f32 to vector<2x256xf32>
    %295 = arith.select %293, %271, %294 : vector<2x256xi1>, vector<2x256xf32>
    %cst_129 = arith.constant dense<0.000000e+00> : vector<4x256xf32>
    %296 = tpu.matmul %268, %295, %cst_129 {dimension_numbers = #tpu.dot_dimension_numbers<[1], [0], [0], [1], [0, 0, 1, 1], [], []>, precision = #tpu.contract_precision<fp32>} : vector<4x2xf32>, vector<2x256xf32>, vector<4x256xf32> -> vector<4x256xf32>
    %297 = arith.addf %266, %296 : vector<4x256xf32>
    %c3_130 = arith.constant 3 : index
    %c0_131 = arith.constant 0 : index
    %c0_132 = arith.constant 0 : index
    %298 = vector.load %arg5[%c3_130, %c0_131, %c0_132] : memref<9x4x2xf32, #tpu.memory_space<vmem>>, vector<1x4x2xf32>
    %299 = vector.shape_cast %298 : vector<1x4x2xf32> to vector<4x2xf32>
    %cst_133 = arith.constant 0.000000e+00 : f32
    %300 = vector.broadcast %cst_133 : f32 to vector<2x1xf32>
    %301 = vector.extract_strided_slice %222 {offsets = [0, 0], sizes = [2, 255], strides = [1, 1]} : vector<2x256xf32> to vector<2x255xf32>
    %302 = tpu.concatenate %300, %301 in 1 : vector<2x1xf32>, vector<2x255xf32> -> vector<2x256xf32>
    %303 = tpu.iota {dimensions = array<i32: 1>} : vector<2x256xi32>
    %c16_i32_134 = arith.constant 16 : i32
    %c0_i32_135 = arith.constant 0 : i32
    %304 = arith.cmpi eq, %c16_i32_134, %c0_i32_135 : i32
    %c1_i32_136 = arith.constant 1 : i32
    %305 = arith.select %304, %c1_i32_136, %c16_i32_134 : i32
    %306 = vector.broadcast %305 : i32 to vector<2x256xi32>
    %307 = arith.remsi %303, %306 : vector<2x256xi32>
    %c0_i32_137 = arith.constant 0 : i32
    %308 = vector.broadcast %c0_i32_137 : i32 to vector<2x256xi32>
    %309 = arith.cmpi ne, %307, %308 : vector<2x256xi32>
    %c0_i32_138 = arith.constant 0 : i32
    %310 = vector.broadcast %c0_i32_138 : i32 to vector<2x256xi32>
    %311 = arith.cmpi slt, %307, %310 : vector<2x256xi32>
    %c0_i32_139 = arith.constant 0 : i32
    %312 = arith.cmpi slt, %305, %c0_i32_139 : i32
    %313 = vector.broadcast %312 : i1 to vector<2x256xi1>
    %314 = vector.broadcast %313 : vector<2x256xi1> to vector<2x256xi1>
    %315 = arith.xori %311, %314 : vector<2x256xi1>
    %316 = arith.andi %315, %309 : vector<2x256xi1>
    %317 = vector.broadcast %305 : i32 to vector<2x256xi32>
    %318 = arith.addi %307, %317 : vector<2x256xi32>
    %319 = arith.select %316, %318, %307 : vector<2x256xi1>, vector<2x256xi32>
    %c1_i32_140 = arith.constant 1 : i32
    %320 = vector.broadcast %c1_i32_140 : i32 to vector<2x256xi32>
    %321 = arith.cmpi sge, %319, %320 : vector<2x256xi32>
    %cst_141 = arith.constant 0.000000e+00 : f32
    %322 = vector.broadcast %cst_141 : f32 to vector<2x256xf32>
    %323 = arith.select %321, %302, %322 : vector<2x256xi1>, vector<2x256xf32>
    %cst_142 = arith.constant dense<0.000000e+00> : vector<4x256xf32>
    %324 = tpu.matmul %299, %323, %cst_142 {dimension_numbers = #tpu.dot_dimension_numbers<[1], [0], [0], [1], [0, 0, 1, 1], [], []>, precision = #tpu.contract_precision<fp32>} : vector<4x2xf32>, vector<2x256xf32>, vector<4x256xf32> -> vector<4x256xf32>
    %325 = arith.addf %297, %324 : vector<4x256xf32>
    %c4_143 = arith.constant 4 : index
    %c0_144 = arith.constant 0 : index
    %c0_145 = arith.constant 0 : index
    %326 = vector.load %arg5[%c4_143, %c0_144, %c0_145] : memref<9x4x2xf32, #tpu.memory_space<vmem>>, vector<1x4x2xf32>
    %327 = vector.shape_cast %326 : vector<1x4x2xf32> to vector<4x2xf32>
    %cst_146 = arith.constant dense<0.000000e+00> : vector<4x256xf32>
    %328 = tpu.matmul %327, %222, %cst_146 {dimension_numbers = #tpu.dot_dimension_numbers<[1], [0], [0], [1], [0, 0, 1, 1], [], []>, precision = #tpu.contract_precision<fp32>} : vector<4x2xf32>, vector<2x256xf32>, vector<4x256xf32> -> vector<4x256xf32>
    %329 = arith.addf %325, %328 : vector<4x256xf32>
    %c5_147 = arith.constant 5 : index
    %c0_148 = arith.constant 0 : index
    %c0_149 = arith.constant 0 : index
    %330 = vector.load %arg5[%c5_147, %c0_148, %c0_149] : memref<9x4x2xf32, #tpu.memory_space<vmem>>, vector<1x4x2xf32>
    %331 = vector.shape_cast %330 : vector<1x4x2xf32> to vector<4x2xf32>
    %332 = vector.extract_strided_slice %222 {offsets = [0, 1], sizes = [2, 255], strides = [1, 1]} : vector<2x256xf32> to vector<2x255xf32>
    %cst_150 = arith.constant 0.000000e+00 : f32
    %333 = vector.broadcast %cst_150 : f32 to vector<2x1xf32>
    %334 = tpu.concatenate %332, %333 in 1 : vector<2x255xf32>, vector<2x1xf32> -> vector<2x256xf32>
    %335 = tpu.iota {dimensions = array<i32: 1>} : vector<2x256xi32>
    %c16_i32_151 = arith.constant 16 : i32
    %c0_i32_152 = arith.constant 0 : i32
    %336 = arith.cmpi eq, %c16_i32_151, %c0_i32_152 : i32
    %c1_i32_153 = arith.constant 1 : i32
    %337 = arith.select %336, %c1_i32_153, %c16_i32_151 : i32
    %338 = vector.broadcast %337 : i32 to vector<2x256xi32>
    %339 = arith.remsi %335, %338 : vector<2x256xi32>
    %c0_i32_154 = arith.constant 0 : i32
    %340 = vector.broadcast %c0_i32_154 : i32 to vector<2x256xi32>
    %341 = arith.cmpi ne, %339, %340 : vector<2x256xi32>
    %c0_i32_155 = arith.constant 0 : i32
    %342 = vector.broadcast %c0_i32_155 : i32 to vector<2x256xi32>
    %343 = arith.cmpi slt, %339, %342 : vector<2x256xi32>
    %c0_i32_156 = arith.constant 0 : i32
    %344 = arith.cmpi slt, %337, %c0_i32_156 : i32
    %345 = vector.broadcast %344 : i1 to vector<2x256xi1>
    %346 = vector.broadcast %345 : vector<2x256xi1> to vector<2x256xi1>
    %347 = arith.xori %343, %346 : vector<2x256xi1>
    %348 = arith.andi %347, %341 : vector<2x256xi1>
    %349 = vector.broadcast %337 : i32 to vector<2x256xi32>
    %350 = arith.addi %339, %349 : vector<2x256xi32>
    %351 = arith.select %348, %350, %339 : vector<2x256xi1>, vector<2x256xi32>
    %c15_i32_157 = arith.constant 15 : i32
    %352 = vector.broadcast %c15_i32_157 : i32 to vector<2x256xi32>
    %353 = arith.cmpi slt, %351, %352 : vector<2x256xi32>
    %cst_158 = arith.constant 0.000000e+00 : f32
    %354 = vector.broadcast %cst_158 : f32 to vector<2x256xf32>
    %355 = arith.select %353, %334, %354 : vector<2x256xi1>, vector<2x256xf32>
    %cst_159 = arith.constant dense<0.000000e+00> : vector<4x256xf32>
    %356 = tpu.matmul %331, %355, %cst_159 {dimension_numbers = #tpu.dot_dimension_numbers<[1], [0], [0], [1], [0, 0, 1, 1], [], []>, precision = #tpu.contract_precision<fp32>} : vector<4x2xf32>, vector<2x256xf32>, vector<4x256xf32> -> vector<4x256xf32>
    %357 = arith.addf %329, %356 : vector<4x256xf32>
    %c6_160 = arith.constant 6 : index
    %c0_161 = arith.constant 0 : index
    %c0_162 = arith.constant 0 : index
    %358 = vector.load %arg5[%c6_160, %c0_161, %c0_162] : memref<9x4x2xf32, #tpu.memory_space<vmem>>, vector<1x4x2xf32>
    %359 = vector.shape_cast %358 : vector<1x4x2xf32> to vector<4x2xf32>
    %360 = vector.extract_strided_slice %222 {offsets = [0, 15], sizes = [2, 241], strides = [1, 1]} : vector<2x256xf32> to vector<2x241xf32>
    %cst_163 = arith.constant 0.000000e+00 : f32
    %361 = vector.broadcast %cst_163 : f32 to vector<2x15xf32>
    %362 = tpu.concatenate %360, %361 in 1 : vector<2x241xf32>, vector<2x15xf32> -> vector<2x256xf32>
    %363 = tpu.iota {dimensions = array<i32: 1>} : vector<2x256xi32>
    %c16_i32_164 = arith.constant 16 : i32
    %c0_i32_165 = arith.constant 0 : i32
    %364 = arith.cmpi eq, %c16_i32_164, %c0_i32_165 : i32
    %c1_i32_166 = arith.constant 1 : i32
    %365 = arith.select %364, %c1_i32_166, %c16_i32_164 : i32
    %366 = vector.broadcast %365 : i32 to vector<2x256xi32>
    %367 = arith.remsi %363, %366 : vector<2x256xi32>
    %c0_i32_167 = arith.constant 0 : i32
    %368 = vector.broadcast %c0_i32_167 : i32 to vector<2x256xi32>
    %369 = arith.cmpi ne, %367, %368 : vector<2x256xi32>
    %c0_i32_168 = arith.constant 0 : i32
    %370 = vector.broadcast %c0_i32_168 : i32 to vector<2x256xi32>
    %371 = arith.cmpi slt, %367, %370 : vector<2x256xi32>
    %c0_i32_169 = arith.constant 0 : i32
    %372 = arith.cmpi slt, %365, %c0_i32_169 : i32
    %373 = vector.broadcast %372 : i1 to vector<2x256xi1>
    %374 = vector.broadcast %373 : vector<2x256xi1> to vector<2x256xi1>
    %375 = arith.xori %371, %374 : vector<2x256xi1>
    %376 = arith.andi %375, %369 : vector<2x256xi1>
    %377 = vector.broadcast %365 : i32 to vector<2x256xi32>
    %378 = arith.addi %367, %377 : vector<2x256xi32>
    %379 = arith.select %376, %378, %367 : vector<2x256xi1>, vector<2x256xi32>
    %c1_i32_170 = arith.constant 1 : i32
    %380 = vector.broadcast %c1_i32_170 : i32 to vector<2x256xi32>
    %381 = arith.cmpi sge, %379, %380 : vector<2x256xi32>
    %c240_i32_171 = arith.constant 240 : i32
    %382 = vector.broadcast %c240_i32_171 : i32 to vector<2x256xi32>
    %383 = arith.cmpi slt, %363, %382 : vector<2x256xi32>
    %384 = arith.andi %381, %383 : vector<2x256xi1>
    %cst_172 = arith.constant 0.000000e+00 : f32
    %385 = vector.broadcast %cst_172 : f32 to vector<2x256xf32>
    %386 = arith.select %384, %362, %385 : vector<2x256xi1>, vector<2x256xf32>
    %cst_173 = arith.constant dense<0.000000e+00> : vector<4x256xf32>
    %387 = tpu.matmul %359, %386, %cst_173 {dimension_numbers = #tpu.dot_dimension_numbers<[1], [0], [0], [1], [0, 0, 1, 1], [], []>, precision = #tpu.contract_precision<fp32>} : vector<4x2xf32>, vector<2x256xf32>, vector<4x256xf32> -> vector<4x256xf32>
    %388 = arith.addf %357, %387 : vector<4x256xf32>
    %c7_174 = arith.constant 7 : index
    %c0_175 = arith.constant 0 : index
    %c0_176 = arith.constant 0 : index
    %389 = vector.load %arg5[%c7_174, %c0_175, %c0_176] : memref<9x4x2xf32, #tpu.memory_space<vmem>>, vector<1x4x2xf32>
    %390 = vector.shape_cast %389 : vector<1x4x2xf32> to vector<4x2xf32>
    %391 = vector.extract_strided_slice %222 {offsets = [0, 16], sizes = [2, 240], strides = [1, 1]} : vector<2x256xf32> to vector<2x240xf32>
    %cst_177 = arith.constant 0.000000e+00 : f32
    %392 = vector.broadcast %cst_177 : f32 to vector<2x16xf32>
    %393 = tpu.concatenate %391, %392 in 1 : vector<2x240xf32>, vector<2x16xf32> -> vector<2x256xf32>
    %394 = tpu.iota {dimensions = array<i32: 1>} : vector<2x256xi32>
    %c240_i32_178 = arith.constant 240 : i32
    %395 = vector.broadcast %c240_i32_178 : i32 to vector<2x256xi32>
    %396 = arith.cmpi slt, %394, %395 : vector<2x256xi32>
    %cst_179 = arith.constant 0.000000e+00 : f32
    %397 = vector.broadcast %cst_179 : f32 to vector<2x256xf32>
    %398 = arith.select %396, %393, %397 : vector<2x256xi1>, vector<2x256xf32>
    %cst_180 = arith.constant dense<0.000000e+00> : vector<4x256xf32>
    %399 = tpu.matmul %390, %398, %cst_180 {dimension_numbers = #tpu.dot_dimension_numbers<[1], [0], [0], [1], [0, 0, 1, 1], [], []>, precision = #tpu.contract_precision<fp32>} : vector<4x2xf32>, vector<2x256xf32>, vector<4x256xf32> -> vector<4x256xf32>
    %400 = arith.addf %388, %399 : vector<4x256xf32>
    %c8_181 = arith.constant 8 : index
    %c0_182 = arith.constant 0 : index
    %c0_183 = arith.constant 0 : index
    %401 = vector.load %arg5[%c8_181, %c0_182, %c0_183] : memref<9x4x2xf32, #tpu.memory_space<vmem>>, vector<1x4x2xf32>
    %402 = vector.shape_cast %401 : vector<1x4x2xf32> to vector<4x2xf32>
    %403 = vector.extract_strided_slice %222 {offsets = [0, 17], sizes = [2, 239], strides = [1, 1]} : vector<2x256xf32> to vector<2x239xf32>
    %cst_184 = arith.constant 0.000000e+00 : f32
    %404 = vector.broadcast %cst_184 : f32 to vector<2x17xf32>
    %405 = tpu.concatenate %403, %404 in 1 : vector<2x239xf32>, vector<2x17xf32> -> vector<2x256xf32>
    %406 = tpu.iota {dimensions = array<i32: 1>} : vector<2x256xi32>
    %c16_i32_185 = arith.constant 16 : i32
    %c0_i32_186 = arith.constant 0 : i32
    %407 = arith.cmpi eq, %c16_i32_185, %c0_i32_186 : i32
    %c1_i32_187 = arith.constant 1 : i32
    %408 = arith.select %407, %c1_i32_187, %c16_i32_185 : i32
    %409 = vector.broadcast %408 : i32 to vector<2x256xi32>
    %410 = arith.remsi %406, %409 : vector<2x256xi32>
    %c0_i32_188 = arith.constant 0 : i32
    %411 = vector.broadcast %c0_i32_188 : i32 to vector<2x256xi32>
    %412 = arith.cmpi ne, %410, %411 : vector<2x256xi32>
    %c0_i32_189 = arith.constant 0 : i32
    %413 = vector.broadcast %c0_i32_189 : i32 to vector<2x256xi32>
    %414 = arith.cmpi slt, %410, %413 : vector<2x256xi32>
    %c0_i32_190 = arith.constant 0 : i32
    %415 = arith.cmpi slt, %408, %c0_i32_190 : i32
    %416 = vector.broadcast %415 : i1 to vector<2x256xi1>
    %417 = vector.broadcast %416 : vector<2x256xi1> to vector<2x256xi1>
    %418 = arith.xori %414, %417 : vector<2x256xi1>
    %419 = arith.andi %418, %412 : vector<2x256xi1>
    %420 = vector.broadcast %408 : i32 to vector<2x256xi32>
    %421 = arith.addi %410, %420 : vector<2x256xi32>
    %422 = arith.select %419, %421, %410 : vector<2x256xi1>, vector<2x256xi32>
    %c15_i32_191 = arith.constant 15 : i32
    %423 = vector.broadcast %c15_i32_191 : i32 to vector<2x256xi32>
    %424 = arith.cmpi slt, %422, %423 : vector<2x256xi32>
    %c240_i32_192 = arith.constant 240 : i32
    %425 = vector.broadcast %c240_i32_192 : i32 to vector<2x256xi32>
    %426 = arith.cmpi slt, %406, %425 : vector<2x256xi32>
    %427 = arith.andi %424, %426 : vector<2x256xi1>
    %cst_193 = arith.constant 0.000000e+00 : f32
    %428 = vector.broadcast %cst_193 : f32 to vector<2x256xf32>
    %429 = arith.select %427, %405, %428 : vector<2x256xi1>, vector<2x256xf32>
    %cst_194 = arith.constant dense<0.000000e+00> : vector<4x256xf32>
    %430 = tpu.matmul %402, %429, %cst_194 {dimension_numbers = #tpu.dot_dimension_numbers<[1], [0], [0], [1], [0, 0, 1, 1], [], []>, precision = #tpu.contract_precision<fp32>} : vector<4x2xf32>, vector<2x256xf32>, vector<4x256xf32> -> vector<4x256xf32>
    %431 = arith.addf %400, %430 : vector<4x256xf32>
    %c0_195 = arith.constant 0 : index
    %c0_196 = arith.constant 0 : index
    %432 = vector.load %arg6[%c0_195, %c0_196] : memref<4x1xf32, #tpu.memory_space<vmem>>, vector<4x1xf32>
    %433 = vector.broadcast %432 : vector<4x1xf32> to vector<4x256xf32>
    %434 = arith.mulf %431, %433 : vector<4x256xf32>
    %c0_197 = arith.constant 0 : index
    %c0_198 = arith.constant 0 : index
    %435 = vector.load %arg7[%c0_197, %c0_198] : memref<4x1xf32, #tpu.memory_space<vmem>>, vector<4x1xf32>
    %436 = vector.broadcast %435 : vector<4x1xf32> to vector<4x256xf32>
    %437 = arith.addf %434, %436 : vector<4x256xf32>
    %438 = arith.negf %437 : vector<4x256xf32>
    %439 = math.exp %438 : vector<4x256xf32>
    %cst_199 = arith.constant 1.000000e+00 : f32
    %440 = vector.broadcast %cst_199 : f32 to vector<4x256xf32>
    %441 = arith.addf %440, %439 : vector<4x256xf32>
    %442 = arith.divf %440, %441 : vector<4x256xf32>
    %443 = arith.mulf %437, %442 : vector<4x256xf32>
    %c0_200 = arith.constant 0 : index
    %c0_201 = arith.constant 0 : index
    %444 = vector.load %arg11[%c0_200, %c0_201] : memref<256x16xf32, #tpu.memory_space<vmem>>, vector<256x16xf32>
    %cst_202 = arith.constant dense<0.000000e+00> : vector<4x16xf32>
    %445 = tpu.matmul %443, %444, %cst_202 {dimension_numbers = #tpu.dot_dimension_numbers<[1], [0], [0], [1], [0, 0, 1, 1], [], []>, precision = #tpu.contract_precision<fp32>} : vector<4x256xf32>, vector<256x16xf32>, vector<4x16xf32> -> vector<4x16xf32>
    %c0_203 = arith.constant 0 : index
    %c0_204 = arith.constant 0 : index
    %446 = vector.load %arg12[%c0_203, %c0_204] : memref<256x16xf32, #tpu.memory_space<vmem>>, vector<256x16xf32>
    %cst_205 = arith.constant dense<0.000000e+00> : vector<4x16xf32>
    %447 = tpu.matmul %443, %446, %cst_205 {dimension_numbers = #tpu.dot_dimension_numbers<[1], [0], [0], [1], [0, 0, 1, 1], [], []>, precision = #tpu.contract_precision<fp32>} : vector<4x256xf32>, vector<256x16xf32>, vector<4x16xf32> -> vector<4x16xf32>
    %cst_206 = arith.constant dense<0.000000e+00> : vector<4xf32>
    %448 = vector.multi_reduction <add>, %443, %cst_206 [1] : vector<4x256xf32> to vector<4xf32>
    %449 = vector.shape_cast %448 : vector<4xf32> to vector<4x1xf32>
    %cst_207 = arith.constant 2.560000e+02 : f32
    %450 = vector.broadcast %cst_207 : f32 to vector<4x1xf32>
    %451 = arith.divf %449, %450 : vector<4x1xf32>
    %452 = arith.negf %445 : vector<4x16xf32>
    %453 = math.exp %452 : vector<4x16xf32>
    %cst_208 = arith.constant 1.000000e+00 : f32
    %454 = vector.broadcast %cst_208 : f32 to vector<4x16xf32>
    %455 = arith.addf %454, %453 : vector<4x16xf32>
    %456 = arith.divf %454, %455 : vector<4x16xf32>
    %457 = arith.negf %447 : vector<4x16xf32>
    %458 = math.exp %457 : vector<4x16xf32>
    %cst_209 = arith.constant 1.000000e+00 : f32
    %459 = vector.broadcast %cst_209 : f32 to vector<4x16xf32>
    %460 = arith.addf %459, %458 : vector<4x16xf32>
    %461 = arith.divf %459, %460 : vector<4x16xf32>
    %462 = arith.mulf %445, %456 : vector<4x16xf32>
    %463 = arith.mulf %447, %461 : vector<4x16xf32>
    %cst_210 = arith.constant dense<0.000000e+00> : vector<4xf32>
    %464 = vector.multi_reduction <add>, %456, %cst_210 [1] : vector<4x16xf32> to vector<4xf32>
    %465 = vector.shape_cast %464 : vector<4xf32> to vector<4x1xf32>
    %cst_211 = arith.constant dense<0.000000e+00> : vector<4xf32>
    %466 = vector.multi_reduction <add>, %461, %cst_211 [1] : vector<4x16xf32> to vector<4xf32>
    %467 = vector.shape_cast %466 : vector<4xf32> to vector<4x1xf32>
    %468 = arith.addf %465, %467 : vector<4x1xf32>
    %cst_212 = arith.constant 3.200000e+01 : f32
    %469 = vector.broadcast %cst_212 : f32 to vector<4x1xf32>
    %470 = arith.divf %468, %469 : vector<4x1xf32>
    %c0_213 = arith.constant 0 : index
    %c0_214 = arith.constant 0 : index
    %471 = vector.load %arg8[%c0_213, %c0_214] : memref<4x4xf32, #tpu.memory_space<vmem>>, vector<4x4xf32>
    %cst_215 = arith.constant dense<0.000000e+00> : vector<4x1xf32>
    %472 = tpu.matmul %471, %451, %cst_215 {dimension_numbers = #tpu.dot_dimension_numbers<[1], [0], [0], [1], [0, 0, 1, 1], [], []>, precision = #tpu.contract_precision<fp32>} : vector<4x4xf32>, vector<4x1xf32>, vector<4x1xf32> -> vector<4x1xf32>
    %c0_216 = arith.constant 0 : index
    %c0_217 = arith.constant 0 : index
    %473 = vector.load %arg9[%c0_216, %c0_217] : memref<4x1xf32, #tpu.memory_space<vmem>>, vector<4x1xf32>
    %474 = arith.mulf %472, %473 : vector<4x1xf32>
    %c0_218 = arith.constant 0 : index
    %c0_219 = arith.constant 0 : index
    %475 = vector.load %arg10[%c0_218, %c0_219] : memref<4x1xf32, #tpu.memory_space<vmem>>, vector<4x1xf32>
    %476 = arith.addf %474, %475 : vector<4x1xf32>
    %477 = arith.negf %476 : vector<4x1xf32>
    %478 = math.exp %477 : vector<4x1xf32>
    %cst_220 = arith.constant 1.000000e+00 : f32
    %479 = vector.broadcast %cst_220 : f32 to vector<4x1xf32>
    %480 = arith.addf %479, %478 : vector<4x1xf32>
    %481 = arith.divf %479, %480 : vector<4x1xf32>
    %482 = arith.mulf %476, %481 : vector<4x1xf32>
    %483 = arith.mulf %482, %470 : vector<4x1xf32>
    %484 = arith.negf %462 : vector<4x16xf32>
    %485 = math.exp %484 : vector<4x16xf32>
    %cst_221 = arith.constant 1.000000e+00 : f32
    %486 = vector.broadcast %cst_221 : f32 to vector<4x16xf32>
    %487 = arith.addf %486, %485 : vector<4x16xf32>
    %488 = arith.divf %486, %487 : vector<4x16xf32>
    %c0_222 = arith.constant 0 : index
    %c0_223 = arith.constant 0 : index
    %489 = vector.load %arg13[%c0_222, %c0_223] : memref<16x256xf32, #tpu.memory_space<vmem>>, vector<16x256xf32>
    %cst_224 = arith.constant dense<0.000000e+00> : vector<4x256xf32>
    %490 = tpu.matmul %488, %489, %cst_224 {dimension_numbers = #tpu.dot_dimension_numbers<[1], [0], [0], [1], [0, 0, 1, 1], [], []>, precision = #tpu.contract_precision<fp32>} : vector<4x16xf32>, vector<16x256xf32>, vector<4x256xf32> -> vector<4x256xf32>
    %491 = arith.negf %463 : vector<4x16xf32>
    %492 = math.exp %491 : vector<4x16xf32>
    %cst_225 = arith.constant 1.000000e+00 : f32
    %493 = vector.broadcast %cst_225 : f32 to vector<4x16xf32>
    %494 = arith.addf %493, %492 : vector<4x16xf32>
    %495 = arith.divf %493, %494 : vector<4x16xf32>
    %c0_226 = arith.constant 0 : index
    %c0_227 = arith.constant 0 : index
    %496 = vector.load %arg14[%c0_226, %c0_227] : memref<16x256xf32, #tpu.memory_space<vmem>>, vector<16x256xf32>
    %cst_228 = arith.constant dense<0.000000e+00> : vector<4x256xf32>
    %497 = tpu.matmul %495, %496, %cst_228 {dimension_numbers = #tpu.dot_dimension_numbers<[1], [0], [0], [1], [0, 0, 1, 1], [], []>, precision = #tpu.contract_precision<fp32>} : vector<4x16xf32>, vector<16x256xf32>, vector<4x256xf32> -> vector<4x256xf32>
    %498 = arith.mulf %443, %490 : vector<4x256xf32>
    %499 = arith.mulf %498, %497 : vector<4x256xf32>
    %500 = arith.negf %483 : vector<4x1xf32>
    %501 = math.exp %500 : vector<4x1xf32>
    %cst_229 = arith.constant 1.000000e+00 : f32
    %502 = vector.broadcast %cst_229 : f32 to vector<4x1xf32>
    %503 = arith.addf %502, %501 : vector<4x1xf32>
    %504 = arith.divf %502, %503 : vector<4x1xf32>
    %505 = vector.broadcast %504 : vector<4x1xf32> to vector<4x256xf32>
    %506 = arith.mulf %499, %505 : vector<4x256xf32>
    %507 = arith.addf %506, %1 : vector<4x256xf32>
    %c0_230 = arith.constant 0 : index
    %c0_231 = arith.constant 0 : index
    %c0_232 = arith.constant 0 : index
    %508 = vector.load %arg15[%c0_230, %c0_231, %c0_232] : memref<1x4x256xf32, #tpu.memory_space<vmem>>, vector<1x4x256xf32>
    %509 = vector.shape_cast %508 : vector<1x4x256xf32> to vector<4x256xf32>
    %510 = vector.shape_cast %507 : vector<4x256xf32> to vector<1x4x256xf32>
    tpu.vector_store %arg15[%c0_230, %c0_231, %c0_232], %510 {strides = array<i32>} : memref<1x4x256xf32, #tpu.memory_space<vmem>>, vector<1x4x256xf32>,
    return
  }
  func.func @transform_0(%arg0: i32) -> (i32, i32, i32) {
    %c0_i32 = arith.constant 0 : i32
    %c0_i32_0 = arith.constant 0 : i32
    %c0_i32_1 = arith.constant 0 : i32
    return %arg0, %c0_i32, %c0_i32_0 : i32, i32, i32
  }
  func.func @transform_1(%arg0: i32) -> (i32, i32, i32) {
    %c0_i32 = arith.constant 0 : i32
    %c0_i32_0 = arith.constant 0 : i32
    %c0_i32_1 = arith.constant 0 : i32
    %c0_i32_2 = arith.constant 0 : i32
    return %c0_i32, %c0_i32_0, %c0_i32_1 : i32, i32, i32
  }
  func.func @transform_2(%arg0: i32) -> (i32, i32) {
    %c0_i32 = arith.constant 0 : i32
    %c0_i32_0 = arith.constant 0 : i32
    %c0_i32_1 = arith.constant 0 : i32
    return %c0_i32, %c0_i32_0 : i32, i32
  }
  func.func @transform_3(%arg0: i32) -> (i32, i32) {
    %c0_i32 = arith.constant 0 : i32
    %c0_i32_0 = arith.constant 0 : i32
    %c0_i32_1 = arith.constant 0 : i32
    return %c0_i32, %c0_i32_0 : i32, i32
  }
  func.func @transform_4(%arg0: i32) -> (i32, i32, i32) {
    %c0_i32 = arith.constant 0 : i32
    %c0_i32_0 = arith.constant 0 : i32
    %c0_i32_1 = arith.constant 0 : i32
    %c0_i32_2 = arith.constant 0 : i32
    return %c0_i32, %c0_i32_0, %c0_i32_1 : i32, i32, i32
  }
  func.func @transform_5(%arg0: i32) -> (i32, i32) {
    %c0_i32 = arith.constant 0 : i32
    %c0_i32_0 = arith.constant 0 : i32
    %c0_i32_1 = arith.constant 0 : i32
    return %c0_i32, %c0_i32_0 : i32, i32
  }
  func.func @transform_6(%arg0: i32) -> (i32, i32) {
    %c0_i32 = arith.constant 0 : i32
    %c0_i32_0 = arith.constant 0 : i32
    %c0_i32_1 = arith.constant 0 : i32
    return %c0_i32, %c0_i32_0 : i32, i32
  }
  func.func @transform_7(%arg0: i32) -> (i32, i32) {
    %c0_i32 = arith.constant 0 : i32
    %c0_i32_0 = arith.constant 0 : i32
    %c0_i32_1 = arith.constant 0 : i32
    return %c0_i32, %c0_i32_0 : i32, i32
  }
  func.func @transform_8(%arg0: i32) -> (i32, i32) {
    %c0_i32 = arith.constant 0 : i32
    %c0_i32_0 = arith.constant 0 : i32
    %c0_i32_1 = arith.constant 0 : i32
    return %c0_i32, %c0_i32_0 : i32, i32
  }
  func.func @transform_9(%arg0: i32) -> (i32, i32) {
    %c0_i32 = arith.constant 0 : i32
    %c0_i32_0 = arith.constant 0 : i32
    %c0_i32_1 = arith.constant 0 : i32
    return %c0_i32, %c0_i32_0 : i32, i32
  }
  func.func @transform_10(%arg0: i32) -> (i32, i32) {
    %c0_i32 = arith.constant 0 : i32
    %c0_i32_0 = arith.constant 0 : i32
    %c0_i32_1 = arith.constant 0 : i32
    return %c0_i32, %c0_i32_0 : i32, i32
  }
  func.func @transform_11(%arg0: i32) -> (i32, i32) {
    %c0_i32 = arith.constant 0 : i32
    %c0_i32_0 = arith.constant 0 : i32
    %c0_i32_1 = arith.constant 0 : i32
    return %c0_i32, %c0_i32_0 : i32, i32
  }
  func.func @transform_12(%arg0: i32) -> (i32, i32) {
    %c0_i32 = arith.constant 0 : i32
    %c0_i32_0 = arith.constant 0 : i32
    %c0_i32_1 = arith.constant 0 : i32
    return %c0_i32, %c0_i32_0 : i32, i32
  }
  func.func @transform_13(%arg0: i32) -> (i32, i32) {
    %c0_i32 = arith.constant 0 : i32
    %c0_i32_0 = arith.constant 0 : i32
    %c0_i32_1 = arith.constant 0 : i32
    return %c0_i32, %c0_i32_0 : i32, i32
  }
  func.func @transform_14(%arg0: i32) -> (i32, i32, i32) {
    %c0_i32 = arith.constant 0 : i32
    %c0_i32_0 = arith.constant 0 : i32
    %c0_i32_1 = arith.constant 0 : i32
    return %arg0, %c0_i32, %c0_i32_0 : i32, i32, i32
  }
}

</mosaic_0001>

<bundles_post_ra>
// kernel: tpu_custom_call.1
= control target key start
LH: loop header
LB: loop body
LE: loop exit
PB: predicated region body
PF: predicated region fallthrough
CT: control target
= control target key end

     0   :  { %s16443_s0 = inlined_call_operand.vmem [shape: f32[2,4,256], index: 0, kind: input, shape index: {}]   ;;  %s16444_s1 = inlined_call_operand.vmem [shape: f32[9,2,4], index: 1, kind: input, shape index: {}]   ;;  %s16445_s2 = inlined_call_operand.vmem [shape: f32[2,1], index: 2, kind: input, shape index: {}]   ;;  %s16446_s3 = inlined_call_operand.vmem [shape: f32[2,1], index: 3, kind: input, shape index: {}]   ;;  %s16447_s4 = inlined_call_operand.vmem [shape: f32[9,4,2], index: 4, kind: input, shape index: {}]   ;;  %s16448_s5 = inlined_call_operand.vmem [shape: f32[4,1], index: 5, kind: input, shape index: {}]   ;;  %s16449_s6 = inlined_call_operand.vmem [shape: f32[4,1], index: 6, kind: input, shape index: {}]   ;;  %s16450_s7 = inlined_call_operand.vmem [shape: f32[4,4], index: 7, kind: input, shape index: {}]   ;;  %s16451_s8 = inlined_call_operand.vmem [shape: f32[4,1], index: 8, kind: input, shape index: {}]   ;;  %s16452_s9 = inlined_call_operand.vmem [shape: f32[4,1], index: 9, kind: input, shape index: {}]   ;;  %s16453_s10 = inlined_call_operand.vmem [shape: f32[256,16], index: 10, kind: input, shape index: {}]   ;;  %s16454_s11 = inlined_call_operand.vmem [shape: f32[256,16], index: 11, kind: input, shape index: {}]   ;;  %s16455_s12 = inlined_call_operand.vmem [shape: f32[16,256], index: 12, kind: input, shape index: {}]   ;;  %s16456_s13 = inlined_call_operand.vmem [shape: f32[16,256], index: 13, kind: input, shape index: {}]   ;;  %s16457_s14 = inlined_call_operand.hbm [shape: f32[2,4,256], index: 14, kind: output, shape index: {}]  }
   0x1   :  { %16579 = sst [smem:[#allocation57_spill]] %s16443_s0 }
   0x2   :  { %16580 = sst [smem:[#allocation58_spill]] %s16444_s1 }
   0x3   :  { %16581 = sst [smem:[#allocation59_spill]] %s16445_s2 }
   0x4   :  { %16582 = sst [smem:[#allocation60_spill]] %s16446_s3 }
   0x5   :  { %19 = vsyncpa [#allocation3], 0 }
   0x6   :  { %21 = vsyncpa [#allocation3 + $0x1], 0  ;;  %s14148_s29 = smov 0   ;;  %s14150_s30 = smov 0  }
   0x7   :  { %s14152_s15 = smov 0   ;;  %s14154_s16 = smov 0  }
   0x8 LB: > { %s14169_s17 = sadd.s32 4294967295, %s14059_s16   ;;  %s12727_s18 = sadd.s32 4294967294, %s14059_s16   ;;  %s14059_s16 = sphi %s14154_s16, %s16900_s16   ;;  %s14055_s15 = sphi %s14152_s15, %s16899_s15   ;;  %s14051_s30 = sphi %s14150_s30, %s16898_s30   ;;  %s14047_s29 = sphi %s14148_s29, %s16897_s29  }
   0x9   : > { %s14173_s19 = sadd.s32 1, %s14059_s16   ;;  %s333_s20 = sadd.s32 1, %s14055_s15 }
   0xa   : > { %s330_s21 = ssub.s32 %s14059_s16, %s14173_s19  ;;  %p343_p0 = scmp.ne.s32.totalorder %s14055_s15, %s14051_s30 }
   0xb   : > { %p331_p1 = scmp.eq.s32.totalorder %s330_s21, 0  ;;  %p344_p2 = scmp.eq.s32.totalorder %s14169_s17, 1 }
   0xc   : > { %p349_p3 = scmp.ne.s32.totalorder %s14051_s30, %s14047_s29  ;;  %p350_p4 = scmp.eq.s32.totalorder %s12727_s18, 1 }
   0xd   : > { %s14184_s22 = scalar_select %p331_p1, %s14055_s15, %s333_s20  }
   0xe   : > { %p14186_p5 = por %p344_p2, %p343_p0  ;;  %p14190_p6 = por %p350_p4, %p349_p3 }
   0xf   : > { %p12730_p7 = scmp.ge.s32.totalorder %s14059_s16, 1  ;;  %p415_p8 = scmp.lt.s32.totalorder %s14059_s16, 3 }
  0x11   : > { %p416_p9 = pnand %p12730_p7, %p415_p8 }
  0x13   : > { %419 = sbr.rel (%p416_p9) target bundleno = 2336 (0x920), region = 76 }
  0x1a   : > { %p461_p10 = scmp.lt.s32.totalorder %s14169_s17, 1  ;;  %v16476_v0 = vmov 0.0   ;;  %s16585_s0 = sld [smem:[#allocation57_spill]]  ;;  %vm16474_vm0 = vcmask 31744   ;;  %v479_v5 = vlaneseq  ;;  %vm520_vm1 = vcmask 130048  }
  0x1b   : > { %841 = vmatprep.mubr.f32.mxu0 %v16476_v0  ;;  %604 = vmatprep.mubr.f32.mxu1 %v16476_v0  ;;  %s14062_s20 = smov 16   ;;  %s16458_s21 = smov 17   ;;  %vm16475_vm3 = vcmask 1043456   ;;  %vm474_vm4 = vcmask 138240   ;;  %vm1483_vm8 = vcmask 121856   ;;  %vm16473_vm12 = vcmask 7168  }
  0x1c   : > { %s462_s25 = scalar_select %p461_p10, %s14169_s17, 1  ;;  %v14238_v7 = vand.u32 127, %v479_v5  ;;  %vm16466_vm13 = vcmask 1039360   ;;  %vm16471_vm14 = vcmask 924672  }
  0x1d   : > { %s16462_s27 = smov 127   ;;  %s16587_s1 = sld [smem:[#allocation58_spill]] }
  0x1e   : > { %s12765_s26 = sshll.u32 %s462_s25, 3  ;;  %s14064_s25 = smov 15   ;;  %v14244_v9 = vadd.s32 128, %v14238_v7  ;;  %vm508_vm2 = vcmp.ge.s32.totalorder %v14238_v7, 16  ;;  %v486_v16 = vand.u32 15, %v14238_v7 }
  0x1f   : > { %s16602_s2 = sld [smem:[#allocation59_spill]]  ;;  %s16603_s3 = sld [smem:[#allocation60_spill]] }
  0x20   : > { %s14203_s18 = scalar_lea.vmem %s16585_s0, %s12765_s26  ;;  %s16469_s26 = smov 1   ;;  %v493_v11 = vand.u32 15, %v14244_v9  ;;  %vm14266_vm6 = vcmp.ge.s32.totalorder %v486_v16, 1  ;;  %vm14331_vm10 = vcmp.lt.s32.totalorder %v486_v16, 15  ;;  %vm3436_vm15 = vcmp.lt.s32.totalorder %v14244_v9, 240 }
  0x21   : > { %v14206_v1 = vld [vmem:[%s14203_s18] sm:$0xff]  ;;  %vm14277_vm7 = vmand %vm14266_vm6, %vm508_vm2  ;;  %s16610_s28 = smov 112   ;;  %s12766_s0 = sshll.u32 %s14169_s17, 7 }
  0x22   : > { %516 = vrot.lane.b32.xlu0 %v14206_v1, %s14062_s20  ;;  %v14212_v2 = vcombine.high %v14206_v1, %v14206_v1  ;;  %470 = vrot.lane.b32.xlu1 %v14206_v1, %s16458_s21  ;;  %vm14257_vm5 = vcmp.ge.s32.totalorder %v493_v11, 1  ;;  %vm14320_vm9 = vcmp.lt.s32.totalorder %v493_v11, 15  ;;  %vm14340_vm11 = vmand %vm14331_vm10, %vm508_vm2 }
  0x23   : > { %v12734_v3 = vld [vmem:[%s16587_s1 + $0x2] sm:$0x3]  ;;  %v467_v37 = vld [vmem:[%s16587_s1] sm:$0x3]  ;;  %v12735_v11 = vld [vmem:[%s16587_s1 + $0x4] sm:$0x3] }
  0x24   : > { %16586 = vst [vmem:[#allocation5_spill] sm:$0xff] %v14212_v2  ;;  %v529_v4 = vsel %vm16474_vm0, %v12734_v3, 0  ;;  %v1004_v41 = vsel %vm16474_vm0, %v467_v37, 0 }
  0x25   : > { %v14236_v6 = vand.u32 4294901760, %v529_v4  ;;  %v14296_v46 = vand.u32 4294901760, %v1004_v41 }
  0x26   : > { %518 = vrot.lane.b32.xlu0 %v14212_v2, %s14062_s20  ;;  %472 = vrot.lane.b32.xlu1 %v14212_v2, %s16458_s21  ;;  %s16460_s21 = smov 113  }
  0x27   : > { %v14241_v8 = vsub.f32 %v529_v4, %v14236_v6  ;;  %v1080_v50 = vsub.f32 %v1004_v41, %v14296_v46 }
  0x29   : > { %v607_v10 = vand.u32 4294901760, %v14241_v8  ;;  %v1081_v53 = vand.u32 4294901760, %v1080_v50 }
  0x2a   : > { %1481 = vrot.lane.b32.xlu1 %v14212_v2, %s14064_s25  ;;  %1479 = vrot.lane.b32.xlu0 %v14206_v1, %s14064_s25 }
  0x2b   : > { %v608_v18 = vsub.f32 %v14241_v8, %v607_v10  ;;  %v1082_v56 = vsub.f32 %v1080_v50, %v1081_v53 }
  0x2d   : > { %v609_v30 = vand.u32 4294901760, %v608_v18  ;;  %v1083_v58 = vand.u32 4294901760, %v1082_v56 }
  0x2e   : > { %1974 = vrot.lane.b32.xlu1 %v14212_v2, %s16469_s26  ;;  %1972 = vrot.lane.b32.xlu0 %v14206_v1, %s16469_s26  ;;  %s16606_s26 = smov 17  }
  0x32   : > { %2939 = vrot.lane.b32.xlu0 %v14212_v2, %s16462_s27  ;;  %2937 = vrot.lane.b32.xlu1 %v14206_v1, %s16462_s27  ;;  %s16464_s27 = smov 112  }
  0x36   : > { %3428 = vrot.lane.b32.xlu0 %v14212_v2, %s16460_s21  ;;  %3426 = vrot.lane.b32.xlu1 %v14206_v1, %s16460_s21  ;;  %s16608_s21 = smov 127  }
  0x3a   : > { %3921 = vrot.lane.b32.xlu0 %v14212_v2, %s16464_s27  ;;  %3919 = vrot.lane.b32.xlu1 %v14206_v1, %s16464_s27  ;;  %s16467_s27 = smov 111  }
  0x3e   : > { %4410 = vrot.lane.b32.xlu0 %v14212_v2, %s16467_s27  ;;  %4408 = vrot.lane.b32.xlu1 %v14206_v1, %s16467_s27  ;;  %s16607_s27 = smov 1  }
  0x94   : > { %v517_v12 = vpop.permute.xlu0 %516  ;;  %v471_v13 = vpop.permute.xlu1 %470 }
  0x95   : > { %v524_v14 = vsel %vm520_vm1, 0.0, %v517_v12  ;;  %v478_v35 = vsel %vm474_vm4, 0.0, %v471_v13 }
  0x96   : > { %v525_v15 = vsel %vm508_vm2, %v524_v14, 0.0  ;;  %v512_v39 = vsel %vm14277_vm7, %v478_v35, 0.0 }
  0x97   : > { %v533_v17 = vsel %vm16475_vm3, %v525_v15, 0  ;;  %v1007_v44 = vsel %vm16475_vm3, %v512_v39, 0  ;;  %v12736_v39 = vld [vmem:[%s16587_s1 + $0x6] sm:$0x3] }
  0x98   : > { %v540_v20 = vand.u32 4294901760, %v533_v17  ;;  %v519_v21 = vpop.permute.xlu0 %518  ;;  %v473_v22 = vpop.permute.xlu1 %472  ;;  %v14300_v49 = vand.u32 4294901760, %v1007_v44  ;;  %v1984_v41 = vsel %vm16474_vm0, %v12736_v39, 0 }
  0x99   : > { %v521_v23 = vsel %vm520_vm1, %v517_v12, %v519_v21  ;;  %v475_v24 = vsel %vm474_vm4, %v471_v13, %v473_v22  ;;  %v1495_v13 = vsel %vm16474_vm0, %v12735_v11, 0 }
  0x9a   : > { %v623_v25 = vsub.f32 %v533_v17, %v540_v20  ;;  %v536_v26 = vsel %vm16475_vm3, %v521_v23, 0  ;;  %v513_v28 = vsel %vm14257_vm5, %v475_v24, 0.0  ;;  %v1097_v52 = vsub.f32 %v1007_v44, %v14300_v49 }
  0x9b   : > { %v538_v29 = vand.u32 4294901760, %v536_v26  ;;  %v1010_v31 = vsel %vm16475_vm3, %v513_v28, 0  ;;  %v14358_v16 = vand.u32 4294901760, %v1495_v13  ;;  %v2059_v44 = vand.u32 4294901760, %v1984_v41 }
  0x9c   : > { %v624_v32 = vand.u32 4294901760, %v623_v25  ;;  %v14282_v36 = vand.u32 4294901760, %v1010_v31  ;;  %v1098_v55 = vand.u32 4294901760, %v1097_v52  ;;  %v1482_v60 = vpop.permute.xlu1 %1481  ;;  %v1480_v61 = vpop.permute.xlu0 %1479 }
  0x9d   : > { %v617_v33 = vsub.f32 %v536_v26, %v538_v29  ;;  %539 = vmatprep.subr.mxu1 %v538_v29  ;;  %776 = vmatprep.subr.mxu0 %v538_v29  ;;  %v1484_v63 = vsel %vm1483_vm8, %v1480_v61, %v1482_v60 }
  0x9e   : > { %541 = vmatpush1.msra.mxu1 %v540_v20  ;;  %778 = vmatpush1.msra.mxu0 %v540_v20  ;;  %v625_v40 = vsub.f32 %v623_v25, %v624_v32  ;;  %v1091_v43 = vsub.f32 %v1010_v31, %v14282_v36  ;;  %v1099_v57 = vsub.f32 %v1097_v52, %v1098_v55  ;;  %v1493_v3 = vsel %vm14320_vm9, %v1484_v63, 0.0 }
  0x9f   : > { %845 = vmatmul.mubr.f32.vlgmr.msra.gmra.mrb[0].mxu0 %v607_v10  ;;  %610 = vmatmul.mubr.f32.vlgmr.msra.gmra.mrb[0].mxu1 %v609_v30  ;;  %v618_v38 = vand.u32 4294901760, %v617_v33  ;;  %v1501_v5 = vsel %vm16475_vm3, %v1493_v3, 0 }
  0xa0   : > { %921 = vmatprep.mubr.f32.mxu0 %v16476_v0  ;;  %690 = vmatprep.mubr.f32.mxu1 %v16476_v0  ;;  %v626_v47 = vand.u32 4294901760, %v625_v40  ;;  %v1092_v48 = vand.u32 4294901760, %v1091_v43  ;;  %v1100_v59 = vand.u32 4294901760, %v1099_v57  ;;  %v1503_v10 = vand.u32 4294901760, %v1501_v5  ;;  %v1975_v31 = vpop.permute.xlu1 %1974 }
  0xa1   : > { %854 = vmatprep.subr.mxu0 %v618_v38  ;;  %v619_v42 = vsub.f32 %v617_v33, %v618_v38  ;;  %v2466_v57 = vsel %vm16475_vm3, %v14212_v2, 0 }
  0xa2   : > { %858 = vmatpush1.msra.mxu0 %v624_v32  ;;  %v1093_v51 = vsub.f32 %v1091_v43, %v1092_v48  ;;  %v1582_v15 = vsub.f32 %v1501_v5, %v1503_v10  ;;  %v1973_v32 = vpop.permute.xlu0 %1972 }
  0xa3   : > { %930 = vmatprep.subr.mxu0 %v538_v29  ;;  %v620_v45 = vand.u32 4294901760, %v619_v42  ;;  %v1980_v37 = vsel %vm16473_vm12, 0.0, %v1973_v32 }
  0xa4   : > { %v1094_v54 = vand.u32 4294901760, %v1093_v51  ;;  %v1583_v18 = vand.u32 4294901760, %v1582_v15  ;;  %v1981_v40 = vsel %vm14266_vm6, %v1980_v37, 0.0 }
  0xa5   : > { %621 = vmatprep.subr.mxu1 %v620_v45  ;;  %v1987_v42 = vsel %vm16475_vm3, %v1981_v40, 0 }
  0xa6   : > { %627 = vmatpush1.msra.mxu1 %v626_v47  ;;  %v1584_v22 = vsub.f32 %v1582_v15, %v1583_v18  ;;  %v1994_v45 = vand.u32 4294901760, %v1987_v42  ;;  %v2060_v47 = vsub.f32 %v1984_v41, %v2059_v44 }
  0xa7   : > { %700 = vmatprep.subr.mxu1 %v617_v33  ;;  %923 = vmatmul.mubr.f32.vlgmr.msra.gmra.mrb[0].mxu0 %v14236_v6  ;;  %v1977_v33 = vsel %vm16473_vm12, %v1973_v32, %v1975_v31  ;;  %vm14504_vm12 = vmand %vm14320_vm9, %vm3436_vm15 }
  0xa8   : > { %932 = vmatpush1.msra.mxu0 %v540_v20  ;;  %692 = vmatmul.mubr.f32.vlgmr.msra.gmra.mrb[0].mxu1 %v14236_v6  ;;  %v1571_v20 = vsub.f32 %v1495_v13, %v14358_v16  ;;  %v1982_v35 = vsel %vm14257_vm5, %v1977_v33, 0.0 }
  0xa9   : > { %703 = vmatpush1.msra.mxu1 %v623_v25  ;;  %995 = vmatprep.mubr.f32.mxu0 %v16476_v0  ;;  %v1585_v25 = vand.u32 4294901760, %v1584_v22 }
  0xaa   : > { %1013 = vmatprep.subr.mxu0 %v14282_v36  ;;  %766 = vmatprep.mubr.f32.mxu1 %v16476_v0  ;;  %v1572_v23 = vand.u32 4294901760, %v1571_v20 }
  0xac   : > { %v1573_v26 = vsub.f32 %v1571_v20, %v1572_v23 }
  0xae   : > { %v1574_v29 = vand.u32 4294901760, %v1573_v26 }
  0xaf   : > { %997 = vmatmul.mubr.f32.vlgmr.msra.gmra.mrb[0].mxu0 %v14236_v6 }
  0xb0   : > { %1015 = vmatpush1.msra.mxu0 %v14300_v49  ;;  %1078 = vmatprep.mubr.f32.mxu0 %v16476_v0 }
  0xb1   : > { %1095 = vmatprep.subr.mxu0 %v1094_v54  ;;  %769 = vmatmul.mubr.f32.vlgmr.msra.gmra.mrb[0].mxu1 %v14241_v8  ;;  %v1487_v8 = vsel %vm1483_vm8, 0.0, %v1480_v61  ;;  %v2464_v61 = vsel %vm16475_vm3, %v14206_v1, 0 }
  0xb2   : > { %5029 = vmatprep.mubr.f32.mxu1 %v16476_v0  ;;  %v1492_v12 = vsel %vm14340_vm11, %v1487_v8, 0.0  ;;  %v2470_v5 = vand.u32 4294901760, %v2464_v61 }
  0xb3   : > { %v1498_v14 = vsel %vm16475_vm3, %v1492_v12, 0 }
  0xb4   : > { %v1505_v17 = vand.u32 4294901760, %v1498_v14  ;;  %v2553_v11 = vsub.f32 %v2464_v61, %v2470_v5 }
  0xb6   : > { %v1588_v21 = vsub.f32 %v1498_v14, %v1505_v17  ;;  %v2554_v14 = vand.u32 4294901760, %v2553_v11 }
  0xb7   : > { %1084 = vmatmul.mubr.f32.vlgmr.msra.gmra.mrb[0].mxu0 %v1083_v58  ;;  %v2468_v58 = vand.u32 4294901760, %v2466_v57 }
  0xb8   : > { %1101 = vmatpush1.msra.mxu0 %v1100_v59  ;;  %1164 = vmatprep.mubr.f32.mxu0 %v16476_v0  ;;  %v1589_v24 = vand.u32 4294901760, %v1588_v21  ;;  %v12737_v59 = vld [vmem:[%s16587_s1 + $0x8] sm:$0x3]  ;;  %v2555_v1 = vsub.f32 %v2553_v11, %v2554_v14 }
  0xb9   : > { %1174 = vmatprep.subr.mxu0 %v1091_v43  ;;  %v2462_v60 = vsel %vm16474_vm0, %v12737_v59, 0  ;;  %v2547_v63 = vsub.f32 %v2466_v57, %v2468_v58 }
  0xba   : > { %v1590_v28 = vsub.f32 %v1588_v21, %v1589_v24  ;;  %v2535_v3 = vand.u32 4294901760, %v2462_v60 }
  0xbb   : > { %v2548_v8 = vand.u32 4294901760, %v2547_v63 }
  0xbc   : > { %v1591_v30 = vand.u32 4294901760, %v1590_v28  ;;  %v12738_v28 = vld [vmem:[%s16587_s1 + $0xa] sm:$0x3] }
  0xbd   : > { %v2549_v12 = vsub.f32 %v2547_v63, %v2548_v8 }
  0xbf   : > { %1166 = vmatmul.mubr.f32.vlgmr.msra.gmra.mrb[0].mxu0 %v14296_v46 }
  0xc0   : > { %1177 = vmatpush1.msra.mxu0 %v1097_v52  ;;  %1240 = vmatprep.mubr.f32.mxu0 %v16476_v0 }
  0xc1   : > { %1250 = vmatprep.subr.mxu0 %v14282_v36 }
  0xc7   : > { %1243 = vmatmul.mubr.f32.vlgmr.msra.gmra.mrb[0].mxu0 %v1080_v50  ;;  %v2061_v50 = vand.u32 4294901760, %v2060_v47 }
  0xc8   : > { %1252 = vmatpush1.msra.mxu0 %v14300_v49  ;;  %1315 = vmatprep.mubr.f32.mxu0 %v16476_v0 }
  0xc9   : > { %1328 = vmatprep.subr.mxu0 %v1092_v48  ;;  %v2077_v48 = vsub.f32 %v1987_v42, %v1994_v45 }
  0xcb   : > { %v2078_v51 = vand.u32 4294901760, %v2077_v48 }
  0xcd   : > { %v2079_v54 = vsub.f32 %v2077_v48, %v2078_v51 }
  0xcf   : > { %1319 = vmatmul.mubr.f32.vlgmr.msra.gmra.mrb[0].mxu0 %v1081_v53  ;;  %v2062_v53 = vsub.f32 %v2060_v47, %v2061_v50  ;;  %v2080_v56 = vand.u32 4294901760, %v2079_v54 }
  0xd0   : > { %1332 = vmatpush1.msra.mxu0 %v1098_v55  ;;  %1395 = vmatprep.mubr.f32.mxu0 %v16476_v0 }
  0xd1   : > { %1404 = vmatprep.subr.mxu0 %v14282_v36  ;;  %v1990_v36 = vsel %vm16475_vm3, %v1982_v35, 0  ;;  %v2063_v55 = vand.u32 4294901760, %v2062_v53 }
  0xd2   : > { %v1992_v38 = vand.u32 4294901760, %v1990_v36 }
  0xd4   : > { %v2071_v43 = vsub.f32 %v1990_v36, %v1992_v38 }
  0xd7   : > { %1397 = vmatmul.mubr.f32.vlgmr.msra.gmra.mrb[0].mxu0 %v14296_v46 }
  0xd8   : > { %1406 = vmatpush1.msra.mxu0 %v14300_v49  ;;  %1469 = vmatprep.mubr.f32.mxu0 %v16476_v0 }
  0xd9   : > { %1504 = vmatprep.subr.mxu0 %v1503_v10 }
  0xdf   : > { %1471 = vmatmul.mubr.f32.vlgmr.msra.gmra.mrb[0].mxu0 %v14296_v46  ;;  %v2072_v46 = vand.u32 4294901760, %v2071_v43 }
  0xe0   : > { %1506 = vmatpush1.msra.mxu0 %v1505_v17  ;;  %1569 = vmatprep.mubr.f32.mxu0 %v16476_v0 }
  0xe1   : > { %1586 = vmatprep.subr.mxu0 %v1585_v25  ;;  %v2073_v49 = vsub.f32 %v2071_v43, %v2072_v46 }
  0xe3   : > { %v2074_v52 = vand.u32 4294901760, %v2073_v49 }
  0xe7   : > { %1575 = vmatmul.mubr.f32.vlgmr.msra.gmra.mrb[0].mxu0 %v1574_v29 }
  0xe8   : > { %1592 = vmatpush1.msra.mxu0 %v1591_v30  ;;  %1655 = vmatprep.mubr.f32.mxu0 %v16476_v0  ;;  %v2949_v30 = vsel %vm16474_vm0, %v12738_v28, 0 }
  0xe9   : > { %1665 = vmatprep.subr.mxu0 %v1582_v15  ;;  %v2550_v15 = vand.u32 4294901760, %v2549_v12  ;;  %v14421_v33 = vand.u32 4294901760, %v2949_v30 }
  0xeb   : > { %v3025_v37 = vsub.f32 %v2949_v30, %v14421_v33 }
  0xed   : > { %v3026_v40 = vand.u32 4294901760, %v3025_v37 }
  0xef   : > { %1657 = vmatmul.mubr.f32.vlgmr.msra.gmra.mrb[0].mxu0 %v14358_v16 }
  0xf0   : > { %1668 = vmatpush1.msra.mxu0 %v1588_v21  ;;  %1731 = vmatprep.mubr.f32.mxu0 %v16476_v0 }
  0xf1   : > { %1741 = vmatprep.subr.mxu0 %v1503_v10 }
  0xf7   : > { %1734 = vmatmul.mubr.f32.vlgmr.msra.gmra.mrb[0].mxu0 %v1571_v20  ;;  %v2940_v20 = vpop.permute.xlu0 %2939 }
  0xf8   : > { %1743 = vmatpush1.msra.mxu0 %v1505_v17  ;;  %1806 = vmatprep.mubr.f32.mxu0 %v16476_v0  ;;  %v2945_v21 = vsel %vm16466_vm13, %v2940_v20, 0.0 }
  0xf9   : > { %1819 = vmatprep.subr.mxu0 %v1583_v18  ;;  %v2556_v18 = vand.u32 4294901760, %v2555_v1  ;;  %v2947_v22 = vsel %vm14320_vm9, %v2945_v21, 0.0  ;;  %v4897_v1 = vld [vmem:[%s16602_s2] sm:$0x3] }
  0xff   : > { %1810 = vmatmul.mubr.f32.vlgmr.msra.gmra.mrb[0].mxu0 %v1572_v23  ;;  %v2938_v23 = vpop.permute.xlu1 %2937 }
 0x100   : > { %1823 = vmatpush1.msra.mxu0 %v1589_v24  ;;  %1886 = vmatprep.mubr.f32.mxu0 %v16476_v0  ;;  %v2955_v24 = vsel %vm16475_vm3, %v2947_v22, 0  ;;  %v2942_v25 = vsel %vm16466_vm13, %v2938_v23, %v2940_v20  ;;  %vm14434_vm13 = vmand %vm14257_vm5, %vm3436_vm15  ;;  %v14070_v22 = vmov 0  }
 0x101   : > { %1895 = vmatprep.subr.mxu0 %v1503_v10  ;;  %v2536_v10 = vsub.f32 %v2462_v60, %v2535_v3  ;;  %v2957_v26 = vand.u32 4294901760, %v2955_v24  ;;  %v2946_v29 = vsel %vm14331_vm10, %v2942_v25, 0.0  ;;  %13953 = vset.pattern.permute.xlu0 %v14070_v22 }
 0x102   : > { %v2952_v32 = vsel %vm16475_vm3, %v2946_v29, 0  ;;  %4900 = vperm.xlu0 %13953, %v4897_v1   ;;  %13954 = vset.pattern.permute.xlu1 %v14070_v22  ;;  %v12740_v29 = vld [vmem:[%s16587_s1 + $0xe] sm:$0x3] }
 0x103   : > { %v2537_v13 = vand.u32 4294901760, %v2536_v10  ;;  %v3036_v31 = vsub.f32 %v2955_v24, %v2957_v26  ;;  %v2959_v35 = vand.u32 4294901760, %v2952_v32 }
 0x105   : > { %v3037_v36 = vand.u32 4294901760, %v3036_v31 }
 0x107   : > { %1888 = vmatmul.mubr.f32.vlgmr.msra.gmra.mrb[0].mxu0 %v14358_v16  ;;  %v3038_v39 = vsub.f32 %v3036_v31, %v3037_v36 }
 0x108   : > { %1897 = vmatpush1.msra.mxu0 %v1505_v17  ;;  %1960 = vmatprep.mubr.f32.mxu0 %v16476_v0 }
 0x109   : > { %1993 = vmatprep.subr.mxu0 %v1992_v38  ;;  %v3039_v42 = vand.u32 4294901760, %v3038_v39 }
 0x10f   : > { %1962 = vmatmul.mubr.f32.vlgmr.msra.gmra.mrb[0].mxu0 %v14358_v16  ;;  %v2538_v16 = vsub.f32 %v2536_v10, %v2537_v13 }
 0x110   : > { %1995 = vmatpush1.msra.mxu0 %v1994_v45  ;;  %2058 = vmatprep.mubr.f32.mxu0 %v16476_v0 }
 0x111   : > { %2075 = vmatprep.subr.mxu0 %v2074_v52  ;;  %v2539_v17 = vand.u32 4294901760, %v2538_v16 }
 0x117   : > { %2064 = vmatmul.mubr.f32.vlgmr.msra.gmra.mrb[0].mxu0 %v2063_v55  ;;  %v12739_v55 = vld [vmem:[%s16587_s1 + $0xc] sm:$0x3] }
 0x118   : > { %2081 = vmatpush1.msra.mxu0 %v2080_v56  ;;  %2144 = vmatprep.mubr.f32.mxu0 %v16476_v0  ;;  %v3442_v57 = vsel %vm16474_vm0, %v12739_v55, 0 }
 0x119   : > { %2154 = vmatprep.subr.mxu0 %v2071_v43  ;;  %v3027_v43 = vsub.f32 %v3025_v37, %v3026_v40  ;;  %v14455_v60 = vand.u32 4294901760, %v3442_v57 }
 0x11f   : > { %2146 = vmatmul.mubr.f32.vlgmr.msra.gmra.mrb[0].mxu0 %v2059_v44 }
 0x120   : > { %2157 = vmatpush1.msra.mxu0 %v2077_v48  ;;  %2220 = vmatprep.mubr.f32.mxu0 %v16476_v0 }
 0x121   : > { %2230 = vmatprep.subr.mxu0 %v1992_v38 }
 0x127   : > { %2223 = vmatmul.mubr.f32.vlgmr.msra.gmra.mrb[0].mxu0 %v2060_v47  ;;  %v3429_v47 = vpop.permute.xlu0 %3428 }
 0x128   : > { %2232 = vmatpush1.msra.mxu0 %v1994_v45  ;;  %2295 = vmatprep.mubr.f32.mxu0 %v16476_v0  ;;  %v3434_v49 = vsel %vm16471_vm14, %v3429_v47, 0.0 }
 0x129   : > { %2308 = vmatprep.subr.mxu0 %v2072_v46 }
 0x12b   : > { %v3922_v21 = vpop.permute.xlu0 %3921 }
 0x12f   : > { %2299 = vmatmul.mubr.f32.vlgmr.msra.gmra.mrb[0].mxu0 %v2061_v50  ;;  %v3440_v50 = vsel %vm14434_vm13, %v3434_v49, 0.0  ;;  %v4411_v49 = vpop.permute.xlu0 %4410 }
 0x130   : > { %2312 = vmatpush1.msra.mxu0 %v2078_v51  ;;  %2375 = vmatprep.mubr.f32.mxu0 %v16476_v0  ;;  %v3427_v51 = vpop.permute.xlu1 %3426  ;;  %v3448_v52 = vsel %vm16475_vm3, %v3440_v50, 0 }
 0x131   : > { %2384 = vmatprep.subr.mxu0 %v1992_v38  ;;  %v3042_v38 = vsub.f32 %v2952_v32, %v2959_v35  ;;  %v3431_v53 = vsel %vm16471_vm14, %v3427_v51, %v3429_v47  ;;  %v14444_v54 = vand.u32 4294901760, %v3448_v52  ;;  %vm16472_vm14 = vcmask 916480  }
 0x132   : > { %v3439_v56 = vsel %vm14266_vm6, %v3431_v53, 0.0  ;;  %v3927_v23 = vsel %vm16472_vm14, %v3922_v21, 0.0 }
 0x133   : > { %v3043_v41 = vand.u32 4294901760, %v3042_v38  ;;  %v3445_v59 = vsel %vm16475_vm3, %v3439_v56, 0  ;;  %v3929_v24 = vsel %vm3436_vm15, %v3927_v23, 0.0 }
 0x134   : > { %v3452_v61 = vand.u32 4294901760, %v3445_v59  ;;  %v3937_v25 = vsel %vm16475_vm3, %v3929_v24, 0 }
 0x135   : > { %v3939_v28 = vand.u32 4294901760, %v3937_v25 }
 0x137   : > { %2377 = vmatmul.mubr.f32.vlgmr.msra.gmra.mrb[0].mxu0 %v2059_v44  ;;  %v4018_v32 = vsub.f32 %v3937_v25, %v3939_v28 }
 0x138   : > { %2386 = vmatpush1.msra.mxu0 %v1994_v45  ;;  %2449 = vmatprep.mubr.f32.mxu0 %v16476_v0  ;;  %v3028_v45 = vand.u32 4294901760, %v3027_v43 }
 0x139   : > { %2469 = vmatprep.subr.mxu0 %v2468_v58 }
 0x13f   : > { %2451 = vmatmul.mubr.f32.vlgmr.msra.gmra.mrb[0].mxu0 %v2059_v44  ;;  %v3044_v44 = vsub.f32 %v3042_v38, %v3043_v41 }
 0x140   : > { %2471 = vmatpush1.msra.mxu0 %v2470_v5  ;;  %2534 = vmatprep.mubr.f32.mxu0 %v16476_v0 }
 0x141   : > { %2551 = vmatprep.subr.mxu0 %v2550_v15  ;;  %v3045_v46 = vand.u32 4294901760, %v3044_v44 }
 0x147   : > { %2540 = vmatmul.mubr.f32.vlgmr.msra.gmra.mrb[0].mxu0 %v2539_v17 }
 0x148   : > { %2557 = vmatpush1.msra.mxu0 %v2556_v18  ;;  %2620 = vmatprep.mubr.f32.mxu0 %v16476_v0  ;;  %v4905_v18 = vld [vmem:[%s16603_s3] sm:$0x3] }
 0x149   : > { %2630 = vmatprep.subr.mxu0 %v2547_v63  ;;  %4908 = vperm.xlu1 %13954, %v4905_v18  }
 0x14f   : > { %2622 = vmatmul.mubr.f32.vlgmr.msra.gmra.mrb[0].mxu0 %v2535_v3 }
 0x150   : > { %2633 = vmatpush1.msra.mxu0 %v2553_v11  ;;  %2696 = vmatprep.mubr.f32.mxu0 %v16476_v0 }
 0x151   : > { %2706 = vmatprep.subr.mxu0 %v2468_v58 }
 0x157   : > { %2699 = vmatmul.mubr.f32.vlgmr.msra.gmra.mrb[0].mxu0 %v2536_v10 }
 0x158   : > { %2708 = vmatpush1.msra.mxu0 %v2470_v5  ;;  %2771 = vmatprep.mubr.f32.mxu0 %v16476_v0 }
 0x159   : > { %2784 = vmatprep.subr.mxu0 %v2548_v8 }
 0x15f   : > { %2775 = vmatmul.mubr.f32.vlgmr.msra.gmra.mrb[0].mxu0 %v2537_v13 }
 0x160   : > { %2788 = vmatpush1.msra.mxu0 %v2554_v14  ;;  %2851 = vmatprep.mubr.f32.mxu0 %v16476_v0 }
 0x161   : > { %2860 = vmatprep.subr.mxu0 %v2468_v58  ;;  %v3529_v58 = vsub.f32 %v3448_v52, %v14444_v54 }
 0x163   : > { %v3530_v63 = vand.u32 4294901760, %v3529_v58 }
 0x165   : > { %v3531_v8 = vsub.f32 %v3529_v58, %v3530_v63 }
 0x167   : > { %2853 = vmatmul.mubr.f32.vlgmr.msra.gmra.mrb[0].mxu0 %v2535_v3  ;;  %v3532_v12 = vand.u32 4294901760, %v3531_v8 }
 0x168   : > { %2862 = vmatpush1.msra.mxu0 %v2470_v5  ;;  %2925 = vmatprep.mubr.f32.mxu0 %v16476_v0  ;;  %v3535_v5 = vsub.f32 %v3445_v59, %v3452_v61 }
 0x169   : > { %2958 = vmatprep.subr.mxu0 %v2957_v26 }
 0x16a   : > { %v3536_v11 = vand.u32 4294901760, %v3535_v5 }
 0x16c   : > { %v3537_v14 = vsub.f32 %v3535_v5, %v3536_v11 }
 0x16e   : > { %v3538_v16 = vand.u32 4294901760, %v3537_v14 }
 0x16f   : > { %2927 = vmatmul.mubr.f32.vlgmr.msra.gmra.mrb[0].mxu0 %v2535_v3  ;;  %v3518_v3 = vsub.f32 %v3442_v57, %v14455_v60  ;;  %v12741_v57 = vld [vmem:[%s16587_s1 + $0x10] sm:$0x3] }
 0x170   : > { %2960 = vmatpush1.msra.mxu0 %v2959_v35  ;;  %3023 = vmatprep.mubr.f32.mxu0 %v16476_v0  ;;  %v4422_v59 = vsel %vm16474_vm0, %v12741_v57, 0 }
 0x171   : > { %3040 = vmatprep.subr.mxu0 %v3039_v42  ;;  %v3519_v10 = vand.u32 4294901760, %v3518_v3 }
 0x173   : > { %v3520_v13 = vsub.f32 %v3518_v3, %v3519_v10 }
 0x175   : > { %v3521_v15 = vand.u32 4294901760, %v3520_v13 }
 0x177   : > { %3029 = vmatmul.mubr.f32.vlgmr.msra.gmra.mrb[0].mxu0 %v3028_v45 }
 0x178   : > { %3046 = vmatpush1.msra.mxu0 %v3045_v46  ;;  %3109 = vmatprep.mubr.f32.mxu0 %v16476_v0 }
 0x179   : > { %3119 = vmatprep.subr.mxu0 %v3036_v31  ;;  %v3931_v31 = vsel %vm16474_vm0, %v12740_v29, 0  ;;  %vm4952_vm0 = vcmask 15360  }
 0x17f   : > { %3111 = vmatmul.mubr.f32.vlgmr.msra.gmra.mrb[0].mxu0 %v14421_v33 }
 0x180   : > { %3122 = vmatpush1.msra.mxu0 %v3042_v38  ;;  %3185 = vmatprep.mubr.f32.mxu0 %v16476_v0 }
 0x181   : > { %3195 = vmatprep.subr.mxu0 %v2957_v26  ;;  %v4901_v22 = vpop.permute.xlu0 %4900 }
 0x184   : > { %v14468_v17 = vpop.f32.mrb[0].mxu1 }
 0x185   : > { %v14474_v20 = vpop.f32.mrb[1].mxu1 }
 0x187   : > { %3188 = vmatmul.mubr.f32.vlgmr.msra.gmra.mrb[0].mxu0 %v3025_v37  ;;  %v4019_v37 = vand.u32 4294901760, %v4018_v32 }
 0x188   : > { %3197 = vmatpush1.msra.mxu0 %v2959_v35  ;;  %3260 = vmatprep.mubr.f32.mxu0 %v16476_v0 }
 0x189   : > { %3273 = vmatprep.subr.mxu0 %v3037_v36 }
 0x18f   : > { %3264 = vmatmul.mubr.f32.vlgmr.msra.gmra.mrb[0].mxu0 %v3026_v40  ;;  %v4020_v40 = vsub.f32 %v4018_v32, %v4019_v37 }
 0x190   : > { %3277 = vmatpush1.msra.mxu0 %v3043_v41  ;;  %3340 = vmatprep.mubr.f32.mxu0 %v16476_v0 }
 0x191   : > { %3349 = vmatprep.subr.mxu0 %v2957_v26  ;;  %v3920_v26 = vpop.permute.xlu1 %3919  ;;  %v4021_v43 = vand.u32 4294901760, %v4020_v40 }
 0x192   : > { %v3924_v30 = vsel %vm16472_vm14, %v3920_v26, %v3922_v21  ;;  %vm4412_vm14 = vcmask 908288  }
 0x193   : > { %v4416_v51 = vsel %vm4412_vm14, %v4411_v49, 0.0 }
 0x194   : > { %v4420_v52 = vsel %vm14504_vm12, %v4416_v51, 0.0 }
 0x195   : > { %v4409_v53 = vpop.permute.xlu1 %4408 }
 0x196   : > { %v4413_v55 = vsel %vm4412_vm14, %v4409_v53, %v4411_v49 }
 0x197   : > { %3342 = vmatmul.mubr.f32.vlgmr.msra.gmra.mrb[0].mxu0 %v14421_v33 }
 0x198   : > { %3351 = vmatpush1.msra.mxu0 %v2959_v35  ;;  %3414 = vmatprep.mubr.f32.mxu0 %v16476_v0  ;;  %v14490_v35 = vand.u32 4294901760, %v3931_v31 }
 0x199   : > { %3451 = vmatprep.subr.mxu0 %v14444_v54 }
 0x19a   : > { %v4007_v38 = vsub.f32 %v3931_v31, %v14490_v35 }
 0x19c   : > { %v4008_v41 = vand.u32 4294901760, %v4007_v38 }
 0x19e   : > { %v4009_v44 = vsub.f32 %v4007_v38, %v4008_v41 }
 0x19f   : > { %3416 = vmatmul.mubr.f32.vlgmr.msra.gmra.mrb[0].mxu0 %v14421_v33  ;;  %v3934_v33 = vsel %vm16475_vm3, %v3924_v30, 0 }
 0x1a0   : > { %3453 = vmatpush1.msra.mxu0 %v3452_v61  ;;  %3516 = vmatprep.mubr.f32.mxu0 %v16476_v0  ;;  %v3941_v36 = vand.u32 4294901760, %v3934_v33  ;;  %v4010_v46 = vand.u32 4294901760, %v4009_v44 }
 0x1a1   : > { %3533 = vmatprep.subr.mxu0 %v3532_v12 }
 0x1a2   : > { %v4024_v39 = vsub.f32 %v3934_v33, %v3941_v36 }
 0x1a4   : > { %v4025_v42 = vand.u32 4294901760, %v4024_v39 }
 0x1a6   : > { %v4026_v45 = vsub.f32 %v4024_v39, %v4025_v42 }
 0x1a7   : > { %3522 = vmatmul.mubr.f32.vlgmr.msra.gmra.mrb[0].mxu0 %v3521_v15 }
 0x1a8   : > { %3539 = vmatpush1.msra.mxu0 %v3538_v16  ;;  %3602 = vmatprep.mubr.f32.mxu0 %v16476_v0  ;;  %v4027_v47 = vand.u32 4294901760, %v4026_v45 }
 0x1a9   : > { %3612 = vmatprep.subr.mxu0 %v3529_v58  ;;  %v4419_v58 = vsel %vm14331_vm10, %v4413_v55, 0.0 }
 0x1af   : > { %3604 = vmatmul.mubr.f32.vlgmr.msra.gmra.mrb[0].mxu0 %v14455_v60 }
 0x1b0   : > { %3615 = vmatpush1.msra.mxu0 %v3535_v5  ;;  %3678 = vmatprep.mubr.f32.mxu0 %v16476_v0 }
 0x1b1   : > { %3688 = vmatprep.subr.mxu0 %v14444_v54 }
 0x1b7   : > { %3681 = vmatmul.mubr.f32.vlgmr.msra.gmra.mrb[0].mxu0 %v3518_v3 }
 0x1b8   : > { %3690 = vmatpush1.msra.mxu0 %v3452_v61  ;;  %3753 = vmatprep.mubr.f32.mxu0 %v16476_v0 }
 0x1b9   : > { %3766 = vmatprep.subr.mxu0 %v3530_v63  ;;  %v4497_v63 = vand.u32 4294901760, %v4422_v59 }
 0x1bb   : > { %v4498_v8 = vsub.f32 %v4422_v59, %v4497_v63 }
 0x1bd   : > { %v4499_v12 = vand.u32 4294901760, %v4498_v8 }
 0x1bf   : > { %3757 = vmatmul.mubr.f32.vlgmr.msra.gmra.mrb[0].mxu0 %v3519_v10  ;;  %v4500_v15 = vsub.f32 %v4498_v8, %v4499_v12 }
 0x1c0   : > { %3770 = vmatpush1.msra.mxu0 %v3536_v11  ;;  %3833 = vmatprep.mubr.f32.mxu0 %v16476_v0 }
 0x1c1   : > { %3842 = vmatprep.subr.mxu0 %v14444_v54  ;;  %v4428_v54 = vsel %vm16475_vm3, %v4420_v52, 0  ;;  %v4501_v1 = vand.u32 4294901760, %v4500_v15 }
 0x1c2   : > { %v4430_v56 = vand.u32 4294901760, %v4428_v54 }
 0x1c7   : > { %3835 = vmatmul.mubr.f32.vlgmr.msra.gmra.mrb[0].mxu0 %v14455_v60 }
 0x1c8   : > { %3844 = vmatpush1.msra.mxu0 %v3452_v61  ;;  %3907 = vmatprep.mubr.f32.mxu0 %v16476_v0  ;;  %v4425_v61 = vsel %vm16475_vm3, %v4419_v58, 0  ;;  %v4909_v26 = vpop.permute.xlu1 %4908  ;;  %vm4956_vm3 = vcmask 1041408  }
 0x1c9   : > { %3940 = vmatprep.subr.mxu0 %v3939_v28  ;;  %v4432_v3 = vand.u32 4294901760, %v4425_v61 }
 0x1cb   : > { %v4515_v10 = vsub.f32 %v4425_v61, %v4432_v3 }
 0x1cd   : > { %v4516_v13 = vand.u32 4294901760, %v4515_v10 }
 0x1cf   : > { %3909 = vmatmul.mubr.f32.vlgmr.msra.gmra.mrb[0].mxu0 %v14455_v60  ;;  %v4509_v60 = vsub.f32 %v4428_v54, %v4430_v56  ;;  %v4517_v16 = vsub.f32 %v4515_v10, %v4516_v13 }
 0x1d0   : > { %3942 = vmatpush1.msra.mxu0 %v3941_v36  ;;  %4005 = vmatprep.mubr.f32.mxu0 %v16476_v0 }
 0x1d1   : > { %4022 = vmatprep.subr.mxu0 %v4021_v43  ;;  %v4510_v5 = vand.u32 4294901760, %v4509_v60  ;;  %v4518_v18 = vand.u32 4294901760, %v4517_v16  ;;  %v12744_v43 = vld [vmem:[%s16447_s4 + $0x4] sm:$0xf] }
 0x1d2   : > { %v4954_v44 = vsel %vm4952_vm0, %v12744_v43, 0 }
 0x1d3   : > { %v4511_v11 = vsub.f32 %v4509_v60, %v4510_v5  ;;  %v14579_v45 = vand.u32 4294901760, %v4954_v44 }
 0x1d5   : > { %v4512_v14 = vand.u32 4294901760, %v4511_v11 }
 0x1d7   : > { %4011 = vmatmul.mubr.f32.vlgmr.msra.gmra.mrb[0].mxu0 %v4010_v46  ;;  %v5031_v46 = vsub.f32 %v4954_v44, %v14579_v45 }
 0x1d8   : > { %4028 = vmatpush1.msra.mxu0 %v4027_v47  ;;  %4091 = vmatprep.mubr.f32.mxu0 %v16476_v0 }
 0x1d9   : > { %4101 = vmatprep.subr.mxu0 %v4018_v32  ;;  %v5032_v47 = vand.u32 4294901760, %v5031_v46 }
 0x1db   : > { %v5033_v51 = vsub.f32 %v5031_v46, %v5032_v47 }
 0x1df   : > { %4093 = vmatmul.mubr.f32.vlgmr.msra.gmra.mrb[0].mxu0 %v14490_v35 }
 0x1e0   : > { %4104 = vmatpush1.msra.mxu0 %v4024_v39  ;;  %4167 = vmatprep.mubr.f32.mxu0 %v16476_v0 }
 0x1e1   : > { %4177 = vmatprep.subr.mxu0 %v3939_v28 }
 0x1e7   : > { %4170 = vmatmul.mubr.f32.vlgmr.msra.gmra.mrb[0].mxu0 %v4007_v38 }
 0x1e8   : > { %4179 = vmatpush1.msra.mxu0 %v3941_v36  ;;  %4242 = vmatprep.mubr.f32.mxu0 %v16476_v0 }
 0x1e9   : > { %4255 = vmatprep.subr.mxu0 %v4019_v37 }
 0x1ef   : > { %4246 = vmatmul.mubr.f32.vlgmr.msra.gmra.mrb[0].mxu0 %v4008_v41  ;;  %v9306_v41 = vld [vmem:[%s16448_s5] sm:$0xf] }
 0x1f0   : > { %4259 = vmatpush1.msra.mxu0 %v4025_v42  ;;  %4322 = vmatprep.mubr.f32.mxu0 %v16476_v0  ;;  %v9314_v42 = vld [vmem:[%s16449_s6] sm:$0xf] }
 0x1f1   : > { %4331 = vmatprep.subr.mxu0 %v3939_v28 }
 0x1f7   : > { %4324 = vmatmul.mubr.f32.vlgmr.msra.gmra.mrb[0].mxu0 %v14490_v35 }
 0x1f8   : > { %4333 = vmatpush1.msra.mxu0 %v3941_v36  ;;  %4396 = vmatprep.mubr.f32.mxu0 %v16476_v0 }
 0x1f9   : > { %4431 = vmatprep.subr.mxu0 %v4430_v56 }
 0x1ff   : > { %4398 = vmatmul.mubr.f32.vlgmr.msra.gmra.mrb[0].mxu0 %v14490_v35 }
 0x200   : > { %4433 = vmatpush1.msra.mxu0 %v4432_v3  ;;  %4496 = vmatprep.mubr.f32.mxu0 %v16476_v0 }
 0x201   : > { %4513 = vmatprep.subr.mxu0 %v4512_v14 }
 0x207   : > { %4502 = vmatmul.mubr.f32.vlgmr.msra.gmra.mrb[0].mxu0 %v4501_v1 }
 0x208   : > { %4519 = vmatpush1.msra.mxu0 %v4518_v18  ;;  %4582 = vmatprep.mubr.f32.mxu0 %v16476_v0  ;;  %v4927_v18 = vld [vmem:[%s16447_s4] sm:$0xf] }
 0x209   : > { %4592 = vmatprep.subr.mxu0 %v4509_v60  ;;  %v5034_v60 = vand.u32 4294901760, %v5033_v51 }
 0x20f   : > { %4584 = vmatmul.mubr.f32.vlgmr.msra.gmra.mrb[0].mxu0 %v4497_v63 }
 0x210   : > { %4595 = vmatpush1.msra.mxu0 %v4515_v10  ;;  %4658 = vmatprep.mubr.f32.mxu0 %v16476_v0 }
 0x211   : > { %4668 = vmatprep.subr.mxu0 %v4430_v56 }
 0x217   : > { %4661 = vmatmul.mubr.f32.vlgmr.msra.gmra.mrb[0].mxu0 %v4498_v8 }
 0x218   : > { %4670 = vmatpush1.msra.mxu0 %v4432_v3  ;;  %4733 = vmatprep.mubr.f32.mxu0 %v16476_v0 }
 0x219   : > { %4746 = vmatprep.subr.mxu0 %v4510_v5 }
 0x21f   : > { %4737 = vmatmul.mubr.f32.vlgmr.msra.gmra.mrb[0].mxu0 %v4499_v12 }
 0x220   : > { %4750 = vmatpush1.msra.mxu0 %v4516_v13  ;;  %4813 = vmatprep.mubr.f32.mxu0 %v16476_v0 }
 0x221   : > { %4822 = vmatprep.subr.mxu0 %v4430_v56 }
 0x227   : > { %4815 = vmatmul.mubr.f32.vlgmr.msra.gmra.mrb[0].mxu0 %v4497_v63 }
 0x228   : > { %4824 = vmatpush1.msra.mxu0 %v4432_v3  ;;  %4887 = vmatprep.mubr.f32.mxu0 %v16476_v0 }
 0x22f   : > { %4889 = vmatmul.mubr.f32.vlgmr.msra.gmra.mrb[0].mxu0 %v4497_v63 }
 0x302   : > { %v4890_v21 = vpop.f32.mrb[0].mxu0 }
 0x303   : > { %v13661_v23 = vadd.f32 %v4890_v21, %v14468_v17  ;;  %v4892_v24 = vpop.f32.mrb[1].mxu0 }
 0x304   : > { %v13662_v25 = vadd.f32 %v4892_v24, %v14474_v20 }
 0x305   : > { %v4903_v28 = vmul.f32 %v13661_v23, %v4901_v22  ;;  %v5429_v23 = vsel %vm4952_vm0, %v4927_v18, 0 }
 0x306   : > { %v4904_v29 = vmul.f32 %v13662_v25, %v4901_v22 }
 0x307   : > { %v4911_v30 = vadd.f32 %v4909_v26, %v4903_v28 }
 0x308   : > { %v4912_v31 = vadd.f32 %v4909_v26, %v4904_v29  ;;  %v5504_v26 = vand.u32 4294901760, %v5429_v23 }
 0x309   : > { %v12742_v32 = vmul.f32 -1.442695, %v4911_v30 }
 0x30a   : > { %v12743_v33 = vmul.f32 -1.442695, %v4912_v31 }
 0x30b   : > { %13956 = vpow2.f32 %v12742_v32 }
 0x30c   : > { %13958 = vpow2.f32 %v12743_v33 }
 0x315   : > { %v13957_v35 = vpop.eup %13956 }
 0x316   : > { %v13959_v36 = vpop.eup %13958  ;;  %v4919_v37 = vadd.f32 1.0, %v13957_v35 }
 0x317   : > { %v4920_v38 = vadd.f32 1.0, %v13959_v36 }
 0x318   : > { %13960 = vrcp.f32 %v4919_v37 }
 0x319   : > { %13962 = vrcp.f32 %v4920_v38 }
 0x322   : > { %v13961_v39 = vpop.eup %13960 }
 0x323   : > { %v13963_v17 = vpop.eup %13962  ;;  %v14533_v40 = vmul.f32 %v13961_v39, %v4911_v30  ;;  %v5505_v30 = vsub.f32 %v5429_v23, %v5504_v26 }
 0x324   : > { %v14535_v20 = vmul.f32 %v13963_v17, %v4912_v31 }
 0x325   : > { %4942 = vrot.lane.b32.xlu1 %v14533_v40, %s14062_s20  ;;  %v5506_v32 = vand.u32 4294901760, %v5505_v30 }
 0x326   : > { %4944 = vrot.lane.b32.xlu0 %v14535_v20, %s14062_s20  ;;  %s16609_s20 = smov 113  }
 0x327   : > { %v5507_v36 = vsub.f32 %v5505_v30, %v5506_v32 }
 0x329   : > { %4930 = vrot.lane.b32.xlu1 %v14533_v40, %s16606_s26  ;;  %v5508_v38 = vand.u32 4294901760, %v5507_v36  ;;  %v6885_v36 = vsel %vm4956_vm3, %v14535_v20, 0 }
 0x32a   : > { %4932 = vrot.lane.b32.xlu0 %v14535_v20, %s16606_s26 }
 0x32d   : > { %5904 = vrot.lane.b32.xlu1 %v14533_v40, %s14064_s25 }
 0x32e   : > { %5906 = vrot.lane.b32.xlu0 %v14535_v20, %s14064_s25  ;;  %s16611_s25 = smov 111  }
 0x331   : > { %6392 = vrot.lane.b32.xlu1 %v14533_v40, %s16607_s27 }
 0x332   : > { %6394 = vrot.lane.b32.xlu0 %v14535_v20, %s16607_s27  ;;  %s16401_s27 = scalar_lea.hbm %s16457_s14, %s12766_s0 }
 0x335   : > { %7358 = vrot.lane.b32.xlu1 %v14535_v20, %s16608_s21 }
 0x336   : > { %7356 = vrot.lane.b32.xlu0 %v14533_v40, %s16608_s21  ;;  %s458_s21 = sand.u32 1, %s14051_s30  }
 0x337   : > { %s12654_s2 = scalar_lea.sflag [#allocation3], %s458_s21 }
 0x339   : > { %7846 = vrot.lane.b32.xlu1 %v14535_v20, %s16609_s20 }
 0x33a   : > { %7844 = vrot.lane.b32.xlu0 %v14533_v40, %s16609_s20  ;;  %s12731_s20 = sshll.u32 %s458_s21, 3 }
 0x33b   : > { %s460_s1 = scalar_lea.vmem [#allocation2], %s12731_s20 }
 0x33d   : > { %8334 = vrot.lane.b32.xlu1 %v14535_v20, %s16610_s28 }
 0x33e   : > { %8332 = vrot.lane.b32.xlu0 %v14533_v40, %s16610_s28  ;;  %s12668_s28 = sshll.u32 %s460_s1, 4  ;;  %s16403_s28 = int_to_ptr.vmem [resolvable:$true] %s12668_s28 }
 0x33f   : > { %s13997_s17 = scalar_lea.vmem %s16403_s28, 128 }
 0x340   : > { %p13998_p11 = scmp.ne.s32.totalorder %s16403_s28, %s13997_s17 }
 0x341   : > { %8822 = vrot.lane.b32.xlu1 %v14535_v20, %s16611_s25 }
 0x342   : > { %8820 = vrot.lane.b32.xlu0 %v14533_v40, %s16611_s25  ;;  %p13999_p12 = pnand %p13998_p11, %p14186_p5 }
 0x344   : > { %p14000_p13 = pneg %p13999_p12 }
 0x345   : > { %9309 = vperm.xlu1 %13954, %v9306_v41  }
 0x346   : > { %9317 = vperm.xlu0 %13953, %v9314_v42  }
 0x397   : > { %v4943_v49 = vpop.permute.xlu1 %4942 }
 0x398   : > { %v4949_v52 = vsel %vm520_vm1, 0.0, %v4943_v49  ;;  %v4945_v53 = vpop.permute.xlu0 %4944 }
 0x399   : > { %v4950_v54 = vsel %vm508_vm2, %v4949_v52, 0.0  ;;  %v4946_v55 = vsel %vm520_vm1, %v4943_v49, %v4945_v53  ;;  %vm16612_vm2 = vcmask 7168  }
 0x39a   : > { %v4958_v56 = vsel %vm4956_vm3, %v4950_v54, 0  ;;  %v4961_v57 = vsel %vm4956_vm3, %v4946_v55, 0 }
 0x39b   : > { %v4965_v58 = vand.u32 4294901760, %v4958_v56  ;;  %v4963_v59 = vand.u32 4294901760, %v4961_v57  ;;  %v4931_v12 = vpop.permute.xlu1 %4930 }
 0x39c   : > { %v4933_v13 = vpop.permute.xlu0 %4932  ;;  %v4937_v1 = vsel %vm474_vm4, 0.0, %v4931_v12 }
 0x39d   : > { %v5048_v61 = vsub.f32 %v4958_v56, %v4965_v58  ;;  %v5042_v63 = vsub.f32 %v4961_v57, %v4963_v59  ;;  %4964 = vmatprep.subr.mxu1 %v4963_v59  ;;  %v4934_v14 = vsel %vm474_vm4, %v4931_v12, %v4933_v13  ;;  %v4938_v22 = vsel %vm14277_vm7, %v4937_v1, 0.0  ;;  %vm16613_vm4 = vmmov %vm16612_vm2 }
 0x39e   : > { %4966 = vmatpush1.msra.mxu1 %v4965_v58  ;;  %v4939_v15 = vsel %vm14257_vm5, %v4934_v14, 0.0  ;;  %v5432_v24 = vsel %vm4956_vm3, %v4938_v22, 0 }
 0x39f   : > { %v5049_v3 = vand.u32 4294901760, %v5048_v61  ;;  %5035 = vmatmul.mubr.f32.vlgmr.msra.gmra.mrb[2].mxu1 %v5034_v60  ;;  %v5043_v5 = vand.u32 4294901760, %v5042_v63  ;;  %v5435_v16 = vsel %vm4956_vm3, %v4939_v15, 0  ;;  %v5439_v28 = vand.u32 4294901760, %v5432_v24  ;;  %v5905_v17 = vpop.permute.xlu1 %5904  ;;  %v12746_v15 = vld [vmem:[%s16447_s4 + $0xc] sm:$0xf] }
 0x3a0   : > { %5115 = vmatprep.mubr.f32.mxu1 %v16476_v0  ;;  %v5437_v21 = vand.u32 4294901760, %v5435_v16  ;;  %v5907_v41 = vpop.permute.xlu0 %5906  ;;  %v6403_v19 = vsel %vm4952_vm0, %v12746_v15, 0 }
 0x3a1   : > { %v5044_v7 = vsub.f32 %v5042_v63, %v5043_v5  ;;  %v5050_v8 = vsub.f32 %v5048_v61, %v5049_v3  ;;  %v5522_v34 = vsub.f32 %v5432_v24, %v5439_v28  ;;  %v5908_v42 = vsel %vm1483_vm8, %v5905_v17, %v5907_v41 }
 0x3a2   : > { %v5516_v25 = vsub.f32 %v5435_v16, %v5437_v21  ;;  %v5913_v43 = vsel %vm14320_vm9, %v5908_v42, 0.0  ;;  %v6478_v22 = vand.u32 4294901760, %v6403_v19 }
 0x3a3   : > { %v5045_v10 = vand.u32 4294901760, %v5044_v7  ;;  %v5051_v11 = vand.u32 4294901760, %v5050_v8  ;;  %v5523_v33 = vand.u32 4294901760, %v5522_v34  ;;  %v5921_v44 = vsel %vm4956_vm3, %v5913_v43, 0  ;;  %v6393_v8 = vpop.permute.xlu1 %6392 }
 0x3a4   : > { %v5517_v29 = vand.u32 4294901760, %v5516_v25  ;;  %v6399_v14 = vsel %vm16613_vm4, 0.0, %v6393_v8 }
 0x3a5   : > { %5046 = vmatprep.subr.mxu1 %v5045_v10  ;;  %v5524_v37 = vsub.f32 %v5522_v34, %v5523_v33  ;;  %v6395_v10 = vpop.permute.xlu0 %6394  ;;  %v6400_v1 = vsel %vm14266_vm6, %v6399_v14, 0.0 }
 0x3a6   : > { %5052 = vmatpush1.msra.mxu1 %v5051_v11  ;;  %v5518_v31 = vsub.f32 %v5516_v25, %v5517_v29  ;;  %v6396_v11 = vsel %vm16612_vm2, %v6393_v8, %v6395_v10  ;;  %v6406_v18 = vsel %vm4956_vm3, %v6400_v1, 0 }
 0x3a7   : > { %5117 = vmatmul.mubr.f32.vlgmr.msra.gmra.mrb[2].mxu1 %v14579_v45  ;;  %5125 = vmatprep.subr.mxu1 %v5042_v63  ;;  %v5525_v39 = vand.u32 4294901760, %v5524_v37  ;;  %v6401_v12 = vsel %vm14257_vm5, %v6396_v11, 0.0  ;;  %v6413_v23 = vand.u32 4294901760, %v6406_v18  ;;  %v12747_v37 = vld [vmem:[%s16447_s4 + $0x10] sm:$0xf]  ;;  %vm16614_vm5 = vcmask 1039360  }
 0x3a8   : > { %5128 = vmatpush1.msra.mxu1 %v5048_v61  ;;  %5191 = vmatprep.mubr.f32.mxu1 %v16476_v0  ;;  %v5519_v35 = vand.u32 4294901760, %v5518_v31  ;;  %v6409_v13 = vsel %vm4956_vm3, %v6401_v12, 0  ;;  %vm16615_vm7 = vmmov %vm16614_vm5 }
 0x3a9   : > { %5201 = vmatprep.subr.mxu1 %v4963_v59  ;;  %v6411_v16 = vand.u32 4294901760, %v6409_v13 }
 0x3af   : > { %5194 = vmatmul.mubr.f32.vlgmr.msra.gmra.mrb[2].mxu1 %v5031_v46  ;;  %v12745_v46 = vld [vmem:[%s16447_s4 + $0x8] sm:$0xf] }
 0x3b0   : > { %5203 = vmatpush1.msra.mxu1 %v4965_v58  ;;  %5266 = vmatprep.mubr.f32.mxu1 %v16476_v0  ;;  %v5915_v51 = vsel %vm4952_vm0, %v12745_v46, 0 }
 0x3b1   : > { %5279 = vmatprep.subr.mxu1 %v5043_v5  ;;  %v5990_v54 = vand.u32 4294901760, %v5915_v51 }
 0x3b3   : > { %v5991_v57 = vsub.f32 %v5915_v51, %v5990_v54 }
 0x3b7   : > { %5270 = vmatmul.mubr.f32.vlgmr.msra.gmra.mrb[2].mxu1 %v5032_v47  ;;  %v5923_v47 = vand.u32 4294901760, %v5921_v44 }
 0x3b8   : > { %5283 = vmatpush1.msra.mxu1 %v5049_v3  ;;  %5346 = vmatprep.mubr.f32.mxu1 %v16476_v0 }
 0x3b9   : > { %5355 = vmatprep.subr.mxu1 %v4963_v59  ;;  %v6002_v53 = vsub.f32 %v5921_v44, %v5923_v47  ;;  %v5992_v59 = vand.u32 4294901760, %v5991_v57 }
 0x3bb   : > { %v6003_v56 = vand.u32 4294901760, %v6002_v53  ;;  %v5993_v63 = vsub.f32 %v5991_v57, %v5992_v59 }
 0x3bd   : > { %v5994_v5 = vand.u32 4294901760, %v5993_v63 }
 0x3bf   : > { %5348 = vmatmul.mubr.f32.vlgmr.msra.gmra.mrb[2].mxu1 %v14579_v45 }
 0x3c0   : > { %5357 = vmatpush1.msra.mxu1 %v4965_v58  ;;  %5420 = vmatprep.mubr.f32.mxu1 %v16476_v0  ;;  %v6004_v58 = vsub.f32 %v6002_v53, %v6003_v56 }
 0x3c1   : > { %5438 = vmatprep.subr.mxu1 %v5437_v21 }
 0x3c2   : > { %v6005_v61 = vand.u32 4294901760, %v6004_v58 }
 0x3c7   : > { %5422 = vmatmul.mubr.f32.vlgmr.msra.gmra.mrb[2].mxu1 %v14579_v45  ;;  %v5911_v45 = vsel %vm1483_vm8, 0.0, %v5905_v17  ;;  %v6883_v17 = vsel %vm4956_vm3, %v14533_v40, 0  ;;  %vm16616_vm8 = vcmask 924672  }
 0x3c8   : > { %5440 = vmatpush1.msra.mxu1 %v5439_v28  ;;  %5503 = vmatprep.mubr.f32.mxu1 %v16476_v0  ;;  %v5912_v49 = vsel %vm14340_vm11, %v5911_v45, 0.0  ;;  %v6889_v43 = vand.u32 4294901760, %v6883_v17 }
 0x3c9   : > { %5520 = vmatprep.subr.mxu1 %v5519_v35  ;;  %v5918_v52 = vsel %vm4956_vm3, %v5912_v49, 0 }
 0x3ca   : > { %v5925_v55 = vand.u32 4294901760, %v5918_v52  ;;  %v6972_v45 = vsub.f32 %v6883_v17, %v6889_v43 }
 0x3cc   : > { %v6008_v6 = vsub.f32 %v5918_v52, %v5925_v55  ;;  %v6973_v49 = vand.u32 4294901760, %v6972_v45 }
 0x3ce   : > { %v6009_v60 = vand.u32 4294901760, %v6008_v6  ;;  %v6974_v40 = vsub.f32 %v6972_v45, %v6973_v49 }
 0x3cf   : > { %5509 = vmatmul.mubr.f32.vlgmr.msra.gmra.mrb[2].mxu1 %v5508_v38  ;;  %v6887_v38 = vand.u32 4294901760, %v6885_v36 }
 0x3d0   : > { %5526 = vmatpush1.msra.mxu1 %v5525_v39  ;;  %5589 = vmatprep.mubr.f32.mxu1 %v16476_v0  ;;  %v6010_v3 = vsub.f32 %v6008_v6, %v6009_v60  ;;  %v6881_v39 = vsel %vm4952_vm0, %v12747_v37, 0 }
 0x3d1   : > { %5599 = vmatprep.subr.mxu1 %v5516_v25  ;;  %v6479_v25 = vsub.f32 %v6403_v19, %v6478_v22  ;;  %v6966_v41 = vsub.f32 %v6885_v36, %v6887_v38  ;;  %v6954_v42 = vand.u32 4294901760, %v6881_v39 }
 0x3d2   : > { %v6011_v7 = vand.u32 4294901760, %v6010_v3 }
 0x3d3   : > { %v6967_v20 = vand.u32 4294901760, %v6966_v41  ;;  %v6955_v44 = vsub.f32 %v6881_v39, %v6954_v42 }
 0x3d5   : > { %v6968_v46 = vsub.f32 %v6966_v41, %v6967_v20 }
 0x3d7   : > { %5591 = vmatmul.mubr.f32.vlgmr.msra.gmra.mrb[2].mxu1 %v5504_v26  ;;  %v6969_v51 = vand.u32 4294901760, %v6968_v46 }
 0x3d8   : > { %5602 = vmatpush1.msra.mxu1 %v5522_v34  ;;  %5665 = vmatprep.mubr.f32.mxu1 %v16476_v0 }
 0x3d9   : > { %5675 = vmatprep.subr.mxu1 %v5437_v21 }
 0x3df   : > { %5668 = vmatmul.mubr.f32.vlgmr.msra.gmra.mrb[2].mxu1 %v5505_v30 }
 0x3e0   : > { %5677 = vmatpush1.msra.mxu1 %v5439_v28  ;;  %5740 = vmatprep.mubr.f32.mxu1 %v16476_v0 }
 0x3e1   : > { %5753 = vmatprep.subr.mxu1 %v5517_v29  ;;  %v6480_v29 = vand.u32 4294901760, %v6479_v25 }
 0x3e3   : > { %v6481_v31 = vsub.f32 %v6479_v25, %v6480_v29 }
 0x3e7   : > { %5744 = vmatmul.mubr.f32.vlgmr.msra.gmra.mrb[2].mxu1 %v5506_v32 }
 0x3e8   : > { %5757 = vmatpush1.msra.mxu1 %v5523_v33  ;;  %5820 = vmatprep.mubr.f32.mxu1 %v16476_v0  ;;  %v6482_v33 = vand.u32 4294901760, %v6481_v31 }
 0x3e9   : > { %5829 = vmatprep.subr.mxu1 %v5437_v21  ;;  %v6490_v21 = vsub.f32 %v6409_v13, %v6411_v16 }
 0x3eb   : > { %v6491_v24 = vand.u32 4294901760, %v6490_v21 }
 0x3ef   : > { %5822 = vmatmul.mubr.f32.vlgmr.msra.gmra.mrb[2].mxu1 %v5504_v26 }
 0x3f0   : > { %5831 = vmatpush1.msra.mxu1 %v5439_v28  ;;  %5894 = vmatprep.mubr.f32.mxu1 %v16476_v0  ;;  %v6492_v28 = vsub.f32 %v6490_v21, %v6491_v24 }
 0x3f1   : > { %5924 = vmatprep.subr.mxu1 %v5923_v47 }
 0x3f2   : > { %v6493_v34 = vand.u32 4294901760, %v6492_v28 }
 0x3f7   : > { %5896 = vmatmul.mubr.f32.vlgmr.msra.gmra.mrb[2].mxu1 %v5504_v26  ;;  %v6496_v26 = vsub.f32 %v6406_v18, %v6413_v23 }
 0x3f8   : > { %5926 = vmatpush1.msra.mxu1 %v5925_v55  ;;  %5989 = vmatprep.mubr.f32.mxu1 %v16476_v0 }
 0x3f9   : > { %6006 = vmatprep.subr.mxu1 %v6005_v61  ;;  %v6497_v30 = vand.u32 4294901760, %v6496_v26 }
 0x3fb   : > { %v6498_v32 = vsub.f32 %v6496_v26, %v6497_v30 }
 0x3fd   : > { %v6499_v35 = vand.u32 4294901760, %v6498_v32 }
 0x3ff   : > { %5995 = vmatmul.mubr.f32.vlgmr.msra.gmra.mrb[2].mxu1 %v5994_v5 }
 0x400   : > { %6012 = vmatpush1.msra.mxu1 %v6011_v7  ;;  %6075 = vmatprep.mubr.f32.mxu1 %v16476_v0 }
 0x401   : > { %6085 = vmatprep.subr.mxu1 %v6002_v53 }
 0x407   : > { %6077 = vmatmul.mubr.f32.vlgmr.msra.gmra.mrb[2].mxu1 %v5990_v54 }
 0x408   : > { %6088 = vmatpush1.msra.mxu1 %v6008_v6  ;;  %6151 = vmatprep.mubr.f32.mxu1 %v16476_v0  ;;  %v7357_v6 = vpop.permute.xlu0 %7356 }
 0x409   : > { %6161 = vmatprep.subr.mxu1 %v5923_v47 }
 0x40f   : > { %6154 = vmatmul.mubr.f32.vlgmr.msra.gmra.mrb[2].mxu1 %v5991_v57 }
 0x410   : > { %6163 = vmatpush1.msra.mxu1 %v5925_v55  ;;  %6226 = vmatprep.mubr.f32.mxu1 %v16476_v0 }
 0x411   : > { %6239 = vmatprep.subr.mxu1 %v6003_v56 }
 0x417   : > { %6230 = vmatmul.mubr.f32.vlgmr.msra.gmra.mrb[2].mxu1 %v5992_v59 }
 0x418   : > { %6243 = vmatpush1.msra.mxu1 %v6009_v60  ;;  %6306 = vmatprep.mubr.f32.mxu1 %v16476_v0  ;;  %v12748_v60 = vld [vmem:[%s16447_s4 + $0x14] sm:$0xf] }
 0x419   : > { %6315 = vmatprep.subr.mxu1 %v5923_v47  ;;  %v6956_v47 = vand.u32 4294901760, %v6955_v44  ;;  %v7367_v62 = vsel %vm4952_vm0, %v12748_v60, 0 }
 0x41a   : > { %v7442_v7 = vand.u32 4294901760, %v7367_v62 }
 0x41b   : > { %v6957_v52 = vsub.f32 %v6955_v44, %v6956_v47 }
 0x41c   : > { %v7443_v11 = vsub.f32 %v7367_v62, %v7442_v7 }
 0x41d   : > { %v6958_v53 = vand.u32 4294901760, %v6957_v52  ;;  %v12750_v52 = vld [vmem:[%s16447_s4 + $0x1c] sm:$0xf] }
 0x41e   : > { %v7444_v14 = vand.u32 4294901760, %v7443_v11 }
 0x41f   : > { %6308 = vmatmul.mubr.f32.vlgmr.msra.gmra.mrb[2].mxu1 %v5990_v54 }
 0x420   : > { %6317 = vmatpush1.msra.mxu1 %v5925_v55  ;;  %6380 = vmatprep.mubr.f32.mxu1 %v16476_v0  ;;  %v7359_v55 = vpop.permute.xlu1 %7358  ;;  %v7445_v1 = vsub.f32 %v7443_v11, %v7444_v14 }
 0x421   : > { %6412 = vmatprep.subr.mxu1 %v6411_v16  ;;  %v7363_v56 = vsel %vm16614_vm5, %v7359_v55, 0.0  ;;  %v7360_v59 = vsel %vm16615_vm7, %v7357_v6, %v7359_v55 }
 0x422   : > { %v7365_v57 = vsel %vm14320_vm9, %v7363_v56, 0.0  ;;  %v7364_v63 = vsel %vm14331_vm10, %v7360_v59, 0.0  ;;  %v7446_v18 = vand.u32 4294901760, %v7445_v1  ;;  %vm16617_vm9 = vmmov %vm16616_vm8 }
 0x423   : > { %v7373_v58 = vsel %vm4956_vm3, %v7365_v57, 0  ;;  %v7370_v5 = vsel %vm4956_vm3, %v7364_v63, 0 }
 0x424   : > { %v7375_v61 = vand.u32 4294901760, %v7373_v58  ;;  %v7377_v8 = vand.u32 4294901760, %v7370_v5 }
 0x426   : > { %v7454_v3 = vsub.f32 %v7373_v58, %v7375_v61  ;;  %v7460_v12 = vsub.f32 %v7370_v5, %v7377_v8 }
 0x427   : > { %6382 = vmatmul.mubr.f32.vlgmr.msra.gmra.mrb[2].mxu1 %v5990_v54  ;;  %v6975_v54 = vand.u32 4294901760, %v6974_v40 }
 0x428   : > { %6414 = vmatpush1.msra.mxu1 %v6413_v23  ;;  %6477 = vmatprep.mubr.f32.mxu1 %v16476_v0  ;;  %v7455_v10 = vand.u32 4294901760, %v7454_v3  ;;  %v7461_v15 = vand.u32 4294901760, %v7460_v12 }
 0x429   : > { %6494 = vmatprep.subr.mxu1 %v6493_v34 }
 0x42a   : > { %v7456_v13 = vsub.f32 %v7454_v3, %v7455_v10  ;;  %v7462_v19 = vsub.f32 %v7460_v12, %v7461_v15 }
 0x42f   : > { %6483 = vmatmul.mubr.f32.vlgmr.msra.gmra.mrb[2].mxu1 %v6482_v33 }
 0x430   : > { %6500 = vmatpush1.msra.mxu1 %v6499_v35  ;;  %6563 = vmatprep.mubr.f32.mxu1 %v16476_v0 }
 0x431   : > { %6573 = vmatprep.subr.mxu1 %v6490_v21  ;;  %v7463_v21 = vand.u32 4294901760, %v7462_v19 }
 0x437   : > { %6565 = vmatmul.mubr.f32.vlgmr.msra.gmra.mrb[2].mxu1 %v6478_v22 }
 0x438   : > { %6576 = vmatpush1.msra.mxu1 %v6496_v26  ;;  %6639 = vmatprep.mubr.f32.mxu1 %v16476_v0 }
 0x439   : > { %6649 = vmatprep.subr.mxu1 %v6411_v16 }
 0x43f   : > { %6642 = vmatmul.mubr.f32.vlgmr.msra.gmra.mrb[2].mxu1 %v6479_v25  ;;  %v7845_v25 = vpop.permute.xlu0 %7844 }
 0x440   : > { %6651 = vmatpush1.msra.mxu1 %v6413_v23  ;;  %6714 = vmatprep.mubr.f32.mxu1 %v16476_v0 }
 0x441   : > { %6727 = vmatprep.subr.mxu1 %v6491_v24 }
 0x447   : > { %6718 = vmatmul.mubr.f32.vlgmr.msra.gmra.mrb[2].mxu1 %v6480_v29  ;;  %v12749_v29 = vld [vmem:[%s16447_s4 + $0x18] sm:$0xf] }
 0x448   : > { %6731 = vmatpush1.msra.mxu1 %v6497_v30  ;;  %6794 = vmatprep.mubr.f32.mxu1 %v16476_v0  ;;  %v7855_v48 = vsel %vm4952_vm0, %v12749_v29, 0 }
 0x449   : > { %6803 = vmatprep.subr.mxu1 %v6411_v16  ;;  %v7457_v16 = vand.u32 4294901760, %v7456_v13  ;;  %v7930_v33 = vand.u32 4294901760, %v7855_v48 }
 0x44b   : > { %v7931_v37 = vsub.f32 %v7855_v48, %v7930_v33 }
 0x44d   : > { %v7932_v39 = vand.u32 4294901760, %v7931_v37 }
 0x44f   : > { %6796 = vmatmul.mubr.f32.vlgmr.msra.gmra.mrb[2].mxu1 %v6478_v22 }
 0x450   : > { %6805 = vmatpush1.msra.mxu1 %v6413_v23  ;;  %6868 = vmatprep.mubr.f32.mxu1 %v16476_v0 }
 0x451   : > { %6888 = vmatprep.subr.mxu1 %v6887_v38 }
 0x457   : > { %6870 = vmatmul.mubr.f32.vlgmr.msra.gmra.mrb[2].mxu1 %v6478_v22  ;;  %v7847_v22 = vpop.permute.xlu1 %7846 }
 0x458   : > { %6890 = vmatpush1.msra.mxu1 %v6889_v43  ;;  %6953 = vmatprep.mubr.f32.mxu1 %v16476_v0  ;;  %v7851_v23 = vsel %vm16616_vm8, %v7847_v22, 0.0  ;;  %v7848_v28 = vsel %vm16617_vm9, %v7845_v25, %v7847_v22 }
 0x459   : > { %6970 = vmatprep.subr.mxu1 %v6969_v51  ;;  %v7853_v24 = vsel %vm14434_vm13, %v7851_v23, 0.0  ;;  %v7852_v34 = vsel %vm14266_vm6, %v7848_v28, 0.0  ;;  %vm16618_vm6 = vcmask 916480   ;;  %v8333_v51 = vpop.permute.xlu0 %8332  ;;  %vm14071_vm13 = vmmov 0  }
 0x45a   : > { %v7861_v26 = vsel %vm4956_vm3, %v7853_v24, 0  ;;  %v7858_v32 = vsel %vm4956_vm3, %v7852_v34, 0  ;;  %vm16619_vm11 = vmmov %vm16618_vm6 }
 0x45b   : > { %v7863_v30 = vand.u32 4294901760, %v7861_v26  ;;  %v7865_v35 = vand.u32 4294901760, %v7858_v32 }
 0x45d   : > { %v7942_v31 = vsub.f32 %v7861_v26, %v7863_v30  ;;  %v7948_v27 = vsub.f32 %v7858_v32, %v7865_v35  ;;  %v8821_v13 = vpop.permute.xlu0 %8820 }
 0x45f   : > { %6959 = vmatmul.mubr.f32.vlgmr.msra.gmra.mrb[2].mxu1 %v6958_v53  ;;  %v7943_v36 = vand.u32 4294901760, %v7942_v31  ;;  %v7949_v17 = vand.u32 4294901760, %v7948_v27 }
 0x460   : > { %6976 = vmatpush1.msra.mxu1 %v6975_v54  ;;  %7039 = vmatprep.mubr.f32.mxu1 %v16476_v0  ;;  %v8343_v54 = vsel %vm4952_vm0, %v12750_v52, 0  ;;  %v14795_v52 = vld [vmem:[%s16453_s10 + $0x10] sm:$0xff] }
 0x461   : > { %7049 = vmatprep.subr.mxu1 %v6966_v41  ;;  %v8418_v56 = vand.u32 4294901760, %v8343_v54 }
 0x463   : > { %v8419_v58 = vsub.f32 %v8343_v54, %v8418_v56 }
 0x467   : > { %7041 = vmatmul.mubr.f32.vlgmr.msra.gmra.mrb[2].mxu1 %v6954_v42 }
 0x468   : > { %7052 = vmatpush1.msra.mxu1 %v6972_v45  ;;  %7115 = vmatprep.mubr.f32.mxu1 %v16476_v0  ;;  %v8335_v45 = vpop.permute.xlu1 %8334 }
 0x469   : > { %7125 = vmatprep.subr.mxu1 %v6887_v38  ;;  %v8339_v46 = vsel %vm16618_vm6, %v8335_v45, 0.0  ;;  %v8336_v53 = vsel %vm16619_vm11, %v8333_v51, %v8335_v45  ;;  %v14786_v45 = vld [vmem:[%s16453_s10 + $0x98] sm:$0xff] }
 0x46a   : > { %v8346_v55 = vsel %vm4956_vm3, %v8336_v53, 0  ;;  %v9426_v51 = vand.u32 4294901760, %v14786_v45 }
 0x46b   : > { %v8353_v57 = vand.u32 4294901760, %v8346_v55 }
 0x46d   : > { %v8436_v59 = vsub.f32 %v8346_v55, %v8353_v57 }
 0x46f   : > { %7118 = vmatmul.mubr.f32.vlgmr.msra.gmra.mrb[2].mxu1 %v6955_v44  ;;  %v8437_v63 = vand.u32 4294901760, %v8436_v59 }
 0x470   : > { %7127 = vmatpush1.msra.mxu1 %v6889_v43  ;;  %7190 = vmatprep.mubr.f32.mxu1 %v16476_v0 }
 0x471   : > { %7203 = vmatprep.subr.mxu1 %v6967_v20  ;;  %v8438_v5 = vsub.f32 %v8436_v59, %v8437_v63 }
 0x477   : > { %7194 = vmatmul.mubr.f32.vlgmr.msra.gmra.mrb[2].mxu1 %v6956_v47  ;;  %v8341_v47 = vsel %vm3436_vm15, %v8339_v46, 0.0 }
 0x478   : > { %7207 = vmatpush1.msra.mxu1 %v6973_v49  ;;  %7270 = vmatprep.mubr.f32.mxu1 %v16476_v0  ;;  %v8349_v49 = vsel %vm4956_vm3, %v8341_v47, 0 }
 0x479   : > { %7279 = vmatprep.subr.mxu1 %v6887_v38  ;;  %v7944_v38 = vsub.f32 %v7942_v31, %v7943_v36  ;;  %v8351_v40 = vand.u32 4294901760, %v8349_v49 }
 0x47b   : > { %v7945_v41 = vand.u32 4294901760, %v7944_v38  ;;  %v8430_v9 = vsub.f32 %v8349_v49, %v8351_v40  ;;  %v14754_v38 = vld [vmem:[%s16453_s10 + $0x8] sm:$0xff] }
 0x47d   : > { %v8431_v6 = vand.u32 4294901760, %v8430_v9 }
 0x47f   : > { %7272 = vmatmul.mubr.f32.vlgmr.msra.gmra.mrb[2].mxu1 %v6954_v42  ;;  %v8432_v60 = vsub.f32 %v8430_v9, %v8431_v6 }
 0x480   : > { %7281 = vmatpush1.msra.mxu1 %v6889_v43  ;;  %7344 = vmatprep.mubr.f32.mxu1 %v16476_v0  ;;  %v7950_v43 = vsub.f32 %v7948_v27, %v7949_v17 }
 0x481   : > { %7376 = vmatprep.subr.mxu1 %v7375_v61  ;;  %v8433_v62 = vand.u32 4294901760, %v8432_v60 }
 0x482   : > { %v7951_v44 = vand.u32 4294901760, %v7950_v43 }
 0x487   : > { %7346 = vmatmul.mubr.f32.vlgmr.msra.gmra.mrb[2].mxu1 %v6954_v42  ;;  %v7933_v42 = vsub.f32 %v7931_v37, %v7932_v39 }
 0x488   : > { %7378 = vmatpush1.msra.mxu1 %v7377_v8  ;;  %7441 = vmatprep.mubr.f32.mxu1 %v16476_v0 }
 0x489   : > { %7458 = vmatprep.subr.mxu1 %v7457_v16  ;;  %v7934_v20 = vand.u32 4294901760, %v7933_v42  ;;  %v12751_v16 = vld [vmem:[%s16447_s4 + $0x20] sm:$0xf] }
 0x48a   : > { %v8831_v50 = vsel %vm4952_vm0, %v12751_v16, 0  ;;  %vm16648_vm0 = vcmask 1043456  }
 0x48b   : > { %v8906_v22 = vand.u32 4294901760, %v8831_v50 }
 0x48d   : > { %v8907_v25 = vsub.f32 %v8831_v50, %v8906_v22 }
 0x48f   : > { %7447 = vmatmul.mubr.f32.vlgmr.msra.gmra.mrb[2].mxu1 %v7446_v18  ;;  %v8908_v28 = vand.u32 4294901760, %v8907_v25 }
 0x490   : > { %7464 = vmatpush1.msra.mxu1 %v7463_v21  ;;  %7527 = vmatprep.mubr.f32.mxu1 %v16476_v0 }
 0x491   : > { %7537 = vmatprep.subr.mxu1 %v7454_v3  ;;  %v8909_v34 = vsub.f32 %v8907_v25, %v8908_v28 }
 0x497   : > { %7529 = vmatmul.mubr.f32.vlgmr.msra.gmra.mrb[2].mxu1 %v7442_v7 }
 0x498   : > { %7540 = vmatpush1.msra.mxu1 %v7460_v12  ;;  %7603 = vmatprep.mubr.f32.mxu1 %v16476_v0 }
 0x499   : > { %7613 = vmatprep.subr.mxu1 %v7375_v61 }
 0x49f   : > { %7606 = vmatmul.mubr.f32.vlgmr.msra.gmra.mrb[2].mxu1 %v7443_v11 }
 0x4a0   : > { %7615 = vmatpush1.msra.mxu1 %v7377_v8  ;;  %7678 = vmatprep.mubr.f32.mxu1 %v16476_v0 }
 0x4a1   : > { %7691 = vmatprep.subr.mxu1 %v7455_v10  ;;  %v8823_v10 = vpop.permute.xlu1 %8822 }
 0x4a2   : > { %v8827_v11 = vsel %vm4412_vm14, %v8823_v10, 0.0 }
 0x4a3   : > { %v8829_v12 = vsel %vm14504_vm12, %v8827_v11, 0.0  ;;  %vm16885_vm12 = vmmov %vm16648_vm0 }
 0x4a7   : > { %7682 = vmatmul.mubr.f32.vlgmr.msra.gmra.mrb[2].mxu1 %v7444_v14  ;;  %v8837_v14 = vsel %vm4956_vm3, %v8829_v12, 0 }
 0x4a8   : > { %7695 = vmatpush1.msra.mxu1 %v7461_v15  ;;  %7758 = vmatprep.mubr.f32.mxu1 %v16476_v0  ;;  %v8824_v15 = vsel %vm4412_vm14, %v8821_v13, %v8823_v10  ;;  %v8839_v1 = vand.u32 4294901760, %v8837_v14  ;;  %v14848_v10 = vld [vmem:[%s16453_s10 + $0xa8] sm:$0xff]  ;;  %vm11145_vm14 = vcmask 125952  }
 0x4a9   : > { %7767 = vmatprep.subr.mxu1 %v7375_v61  ;;  %v8420_v61 = vand.u32 4294901760, %v8419_v58  ;;  %v8828_v19 = vsel %vm14331_vm10, %v8824_v15, 0.0  ;;  %v14855_v15 = vld [vmem:[%s16453_s10 + $0x20] sm:$0xff]  ;;  %vm16884_vm10 = vcmask 31744  }
 0x4aa   : > { %v8918_v18 = vsub.f32 %v8837_v14, %v8839_v1  ;;  %v8834_v21 = vsel %vm4956_vm3, %v8828_v19, 0  ;;  %vm16649_vm3 = vmmov %vm16648_vm0 }
 0x4ab   : > { %v8421_v3 = vsub.f32 %v8419_v58, %v8420_v61  ;;  %v8841_v23 = vand.u32 4294901760, %v8834_v21 }
 0x4ac   : > { %v8919_v24 = vand.u32 4294901760, %v8918_v18 }
 0x4ad   : > { %v8924_v4 = vsub.f32 %v8834_v21, %v8841_v23 }
 0x4ae   : > { %v8920_v26 = vsub.f32 %v8918_v18, %v8919_v24 }
 0x4af   : > { %7760 = vmatmul.mubr.f32.vlgmr.msra.gmra.mrb[2].mxu1 %v7442_v7  ;;  %v8925_v29 = vand.u32 4294901760, %v8924_v4 }
 0x4b0   : > { %7769 = vmatpush1.msra.mxu1 %v7377_v8  ;;  %7832 = vmatprep.mubr.f32.mxu1 %v16476_v0  ;;  %v8439_v8 = vand.u32 4294901760, %v8438_v5 }
 0x4b1   : > { %7864 = vmatprep.subr.mxu1 %v7863_v30  ;;  %v8926_v48 = vsub.f32 %v8924_v4, %v8925_v29 }
 0x4b3   : > { %v8927_v32 = vand.u32 4294901760, %v8926_v48 }
 0x4b7   : > { %7834 = vmatmul.mubr.f32.vlgmr.msra.gmra.mrb[2].mxu1 %v7442_v7  ;;  %v8422_v7 = vand.u32 4294901760, %v8421_v3 }
 0x4b8   : > { %7866 = vmatpush1.msra.mxu1 %v7865_v35  ;;  %7929 = vmatprep.mubr.f32.mxu1 %v16476_v0 }
 0x4b9   : > { %7946 = vmatprep.subr.mxu1 %v7945_v41 }
 0x4bf   : > { %7935 = vmatmul.mubr.f32.vlgmr.msra.gmra.mrb[2].mxu1 %v7934_v20 }
 0x4c0   : > { %7952 = vmatpush1.msra.mxu1 %v7951_v44  ;;  %8015 = vmatprep.mubr.f32.mxu1 %v16476_v0  ;;  %v14781_v44 = vld [vmem:[%s16453_s10 + $0x90] sm:$0xff] }
 0x4c1   : > { %8025 = vmatprep.subr.mxu1 %v7942_v31  ;;  %v8910_v31 = vand.u32 4294901760, %v8909_v34  ;;  %v9423_v49 = vand.u32 4294901760, %v14781_v44 }
 0x4c7   : > { %8017 = vmatmul.mubr.f32.vlgmr.msra.gmra.mrb[2].mxu1 %v7930_v33 }
 0x4c8   : > { %8028 = vmatpush1.msra.mxu1 %v7948_v27  ;;  %8091 = vmatprep.mubr.f32.mxu1 %v16476_v0  ;;  %v14749_v27 = vld [vmem:[%s16453_s10] sm:$0xff] }
 0x4c9   : > { %8101 = vmatprep.subr.mxu1 %v7863_v30 }
 0x4cf   : > { %8094 = vmatmul.mubr.f32.vlgmr.msra.gmra.mrb[2].mxu1 %v7931_v37 }
 0x4d0   : > { %8103 = vmatpush1.msra.mxu1 %v7865_v35  ;;  %8166 = vmatprep.mubr.f32.mxu1 %v16476_v0 }
 0x4d1   : > { %8179 = vmatprep.subr.mxu1 %v7943_v36 }
 0x4d7   : > { %8170 = vmatmul.mubr.f32.vlgmr.msra.gmra.mrb[2].mxu1 %v7932_v39  ;;  %v9369_v39 = vand.u32 4294901760, %v14749_v27 }
 0x4d8   : > { %8183 = vmatpush1.msra.mxu1 %v7949_v17  ;;  %8246 = vmatprep.mubr.f32.mxu1 %v16476_v0  ;;  %v9372_v17 = vand.u32 4294901760, %v14754_v38 }
 0x4d9   : > { %8255 = vmatprep.subr.mxu1 %v7863_v30  ;;  %v8921_v30 = vand.u32 4294901760, %v8920_v26  ;;  %v14771_v43 = vsub.f32 %v14749_v27, %v9369_v39 }
 0x4da   : > { %v14776_v20 = vsub.f32 %v14754_v38, %v9372_v17 }
 0x4db   : > { %v16493_v53 = vand.u32 4294901760, %v14771_v43 }
 0x4dc   : > { %v16492_v54 = vand.u32 4294901760, %v14776_v20 }
 0x4de   : > { %v9491_v60 = vsub.f32 %v14776_v20, %v16492_v54 }
 0x4df   : > { %8248 = vmatmul.mubr.f32.vlgmr.msra.gmra.mrb[2].mxu1 %v7930_v33 }
 0x4e0   : > { %8257 = vmatpush1.msra.mxu1 %v7865_v35  ;;  %8320 = vmatprep.mubr.f32.mxu1 %v16476_v0  ;;  %v14742_v35 = vld [vmem:[%s16453_s10 + $0x88] sm:$0xff]  ;;  %v9492_v12 = vand.u32 4294901760, %v9491_v60 }
 0x4e1   : > { %8352 = vmatprep.subr.mxu1 %v8351_v40  ;;  %v9420_v37 = vand.u32 4294901760, %v14742_v35 }
 0x4e3   : > { %v14766_v42 = vsub.f32 %v14742_v35, %v9420_v37 }
 0x4e5   : > { %v16495_v47 = vand.u32 4294901760, %v14766_v42 }
 0x4e7   : > { %8322 = vmatmul.mubr.f32.vlgmr.msra.gmra.mrb[2].mxu1 %v7930_v33  ;;  %v14737_v33 = vld [vmem:[%s16453_s10 + $0x80] sm:$0xff] }
 0x4e8   : > { %8354 = vmatpush1.msra.mxu1 %v8353_v57  ;;  %8417 = vmatprep.mubr.f32.mxu1 %v16476_v0  ;;  %v9417_v36 = vand.u32 4294901760, %v14737_v33 }
 0x4e9   : > { %8434 = vmatprep.subr.mxu1 %v8433_v62  ;;  %v14841_v62 = vld [vmem:[%s16453_s10 + $0xa0] sm:$0xff] }
 0x4ea   : > { %v14761_v41 = vsub.f32 %v14737_v33, %v9417_v36  ;;  %v9429_v50 = vand.u32 4294901760, %v14841_v62  ;;  %v14961_v33 = vpack.c.bf16 %v9372_v17, %v9369_v39  ;;  %v14984_v39 = vld [vmem:[%s16453_s10 + $0xc8] sm:$0xff] }
 0x4ec   : > { %v16496_v46 = vand.u32 4294901760, %v14761_v41 }
 0x4ef   : > { %8423 = vmatmul.mubr.f32.vlgmr.msra.gmra.mrb[2].mxu1 %v8422_v7 }
 0x4f0   : > { %8440 = vmatpush1.msra.mxu1 %v8439_v8  ;;  %8503 = vmatprep.mubr.f32.mxu1 %v16476_v0 }
 0x4f1   : > { %8513 = vmatprep.subr.mxu1 %v8430_v9  ;;  %v9375_v9 = vand.u32 4294901760, %v14795_v52 }
 0x4f7   : > { %8505 = vmatmul.mubr.f32.vlgmr.msra.gmra.mrb[2].mxu1 %v8418_v56 }
 0x4f8   : > { %8516 = vmatpush1.msra.mxu1 %v8436_v59  ;;  %8579 = vmatprep.mubr.f32.mxu1 %v16476_v0  ;;  %v9484_v59 = vsub.f32 %v14771_v43, %v16493_v53 }
 0x4f9   : > { %8589 = vmatprep.subr.mxu1 %v8351_v40 }
 0x4fa   : > { %v9485_v11 = vand.u32 4294901760, %v9484_v59 }
 0x4fc   : > { %v13263_v21 = vpack.c.bf16 %v9492_v12, %v9485_v11 }
 0x4ff   : > { %8582 = vmatmul.mubr.f32.vlgmr.msra.gmra.mrb[2].mxu1 %v8419_v58  ;;  %v14820_v58 = vsub.f32 %v14786_v45, %v9426_v51 }
 0x500   : > { %8591 = vmatpush1.msra.mxu1 %v8353_v57  ;;  %8654 = vmatprep.mubr.f32.mxu1 %v16476_v0 }
 0x501   : > { %8667 = vmatprep.subr.mxu1 %v8431_v6  ;;  %v14815_v6 = vsub.f32 %v14781_v44, %v9423_v49  ;;  %v16488_v8 = vand.u32 4294901760, %v14820_v58 }
 0x503   : > { %v16491_v7 = vand.u32 4294901760, %v14815_v6  ;;  %v9617_v19 = vsub.f32 %v14820_v58, %v16488_v8 }
 0x505   : > { %v9618_v26 = vand.u32 4294901760, %v9617_v19 }
 0x507   : > { %8658 = vmatmul.mubr.f32.vlgmr.msra.gmra.mrb[2].mxu1 %v8420_v61  ;;  %v14831_v61 = vsub.f32 %v14795_v52, %v9375_v9 }
 0x508   : > { %8671 = vmatpush1.msra.mxu1 %v8437_v63  ;;  %8734 = vmatprep.mubr.f32.mxu1 %v16476_v0 }
 0x509   : > { %8743 = vmatprep.subr.mxu1 %v8351_v40  ;;  %v14800_v40 = vld [vmem:[%s16453_s10 + $0x18] sm:$0xff]  ;;  %v16485_v13 = vand.u32 4294901760, %v14831_v61 }
 0x50a   : > { %v9378_v55 = vand.u32 4294901760, %v14800_v40 }
 0x50c   : > { %v14836_v63 = vsub.f32 %v14800_v40, %v9378_v55 }
 0x50e   : > { %v16480_v14 = vand.u32 4294901760, %v14836_v63 }
 0x50f   : > { %8736 = vmatmul.mubr.f32.vlgmr.msra.gmra.mrb[2].mxu1 %v8418_v56 }
 0x510   : > { %8745 = vmatpush1.msra.mxu1 %v8353_v57  ;;  %8808 = vmatprep.mubr.f32.mxu1 %v16476_v0  ;;  %v9603_v57 = vsub.f32 %v14766_v42, %v16495_v47 }
 0x511   : > { %8840 = vmatprep.subr.mxu1 %v8839_v1 }
 0x512   : > { %v9604_v5 = vand.u32 4294901760, %v9603_v57 }
 0x517   : > { %8810 = vmatmul.mubr.f32.vlgmr.msra.gmra.mrb[2].mxu1 %v8418_v56  ;;  %v9596_v56 = vsub.f32 %v14761_v41, %v16496_v46  ;;  %v15145_v46 = vld [vmem:[%s16453_s10 + $0x60] sm:$0xff] }
 0x518   : > { %8842 = vmatpush1.msra.mxu1 %v8841_v23  ;;  %8905 = vmatprep.mubr.f32.mxu1 %v16476_v0 }
 0x519   : > { %8922 = vmatprep.subr.mxu1 %v8921_v30  ;;  %v9597_v3 = vand.u32 4294901760, %v9596_v56  ;;  %v14890_v30 = vld [vmem:[%s16453_s10 + $0xb8] sm:$0xff]  ;;  %v14901_v56 = vld [vmem:[%s16453_s10 + $0x30] sm:$0xff] }
 0x51b   : > { %v13261_v16 = vpack.c.bf16 %v9604_v5, %v9597_v3  ;;  %v14913_v5 = vld [vmem:[%s16453_s10 + $0x38] sm:$0xff] }
 0x51f   : > { %8911 = vmatmul.mubr.f32.vlgmr.msra.gmra.mrb[2].mxu1 %v8910_v31 }
 0x520   : > { %8928 = vmatpush1.msra.mxu1 %v8927_v32  ;;  %8991 = vmatprep.mubr.f32.mxu1 %v16476_v0 }
 0x521   : > { %9001 = vmatprep.subr.mxu1 %v8918_v18  ;;  %v14867_v18 = vld [vmem:[%s16453_s10 + $0x28] sm:$0xff] }
 0x522   : > { %v9384_v32 = vand.u32 4294901760, %v14867_v18 }
 0x527   : > { %8993 = vmatmul.mubr.f32.vlgmr.msra.gmra.mrb[2].mxu1 %v8906_v22 }
 0x528   : > { %9004 = vmatpush1.msra.mxu1 %v8924_v4  ;;  %9067 = vmatprep.mubr.f32.mxu1 %v16476_v0 }
 0x529   : > { %9077 = vmatprep.subr.mxu1 %v8839_v1 }
 0x52f   : > { %9070 = vmatmul.mubr.f32.vlgmr.msra.gmra.mrb[2].mxu1 %v8907_v25  ;;  %v14879_v25 = vld [vmem:[%s16453_s10 + $0xb0] sm:$0xff] }
 0x530   : > { %9079 = vmatpush1.msra.mxu1 %v8841_v23  ;;  %9142 = vmatprep.mubr.f32.mxu1 %v16476_v0  ;;  %v9435_v3 = vand.u32 4294901760, %v14879_v25 }
 0x531   : > { %9155 = vmatprep.subr.mxu1 %v8919_v24  ;;  %v9432_v24 = vand.u32 4294901760, %v14848_v10 }
 0x533   : > { %v14895_v31 = vsub.f32 %v14848_v10, %v9432_v24 }
 0x535   : > { %v16478_v12 = vand.u32 4294901760, %v14895_v31 }
 0x537   : > { %9146 = vmatmul.mubr.f32.vlgmr.msra.gmra.mrb[2].mxu1 %v8908_v28  ;;  %v14884_v28 = vsub.f32 %v14841_v62, %v9429_v50 }
 0x538   : > { %9159 = vmatpush1.msra.mxu1 %v8925_v29  ;;  %9222 = vmatprep.mubr.f32.mxu1 %v16476_v0  ;;  %v9381_v29 = vand.u32 4294901760, %v14855_v15 }
 0x539   : > { %9231 = vmatprep.subr.mxu1 %v8839_v1  ;;  %v9610_v1 = vsub.f32 %v14815_v6, %v16491_v7  ;;  %v16479_v59 = vand.u32 4294901760, %v14884_v28  ;;  %v15107_v7 = vld [vmem:[%s16453_s10 + $0xe0] sm:$0xff] }
 0x53a   : > { %v14907_v60 = vsub.f32 %v14855_v15, %v9381_v29 }
 0x53b   : > { %v9611_v4 = vand.u32 4294901760, %v9610_v1  ;;  %v9438_v1 = vand.u32 4294901760, %v14890_v30  ;;  %v9624_v19 = vsub.f32 %v14884_v28, %v16479_v59  ;;  %v14955_v59 = vld [vmem:[%s16453_s10 + $0xc0] sm:$0xff] }
 0x53d   : > { %v13265_v57 = vpack.c.bf16 %v9618_v26, %v9611_v4  ;;  %v9631_v4 = vsub.f32 %v14895_v31, %v16478_v12 }
 0x53f   : > { %9224 = vmatmul.mubr.f32.vlgmr.msra.gmra.mrb[2].mxu1 %v8906_v22 }
 0x540   : > { %9233 = vmatpush1.msra.mxu1 %v8841_v23  ;;  %9296 = vmatprep.mubr.f32.mxu1 %v16476_v0  ;;  %v9505_v23 = vsub.f32 %v14836_v63, %v16480_v14  ;;  %v9632_v14 = vand.u32 4294901760, %v9631_v4 }
 0x541   : > { %13262 = vmatprep.subr.bf16.mxu1 %v13261_v16  ;;  %v14919_v16 = vsub.f32 %v14867_v18, %v9384_v32 }
 0x542   : > { %v9506_v48 = vand.u32 4294901760, %v9505_v23  ;;  %v9387_v23 = vand.u32 4294901760, %v14901_v56 }
 0x543   : > { %v16482_v26 = vand.u32 4294901760, %v14919_v16 }
 0x544   : > { %v14974_v27 = vsub.f32 %v14901_v56, %v9387_v23  ;;  %v15132_v56 = vld [vmem:[%s16453_s10 + $0xe8] sm:$0xff] }
 0x545   : > { %v9519_v35 = vsub.f32 %v14919_v16, %v16482_v26  ;;  %v14994_v26 = vld [vmem:[%s16453_s10 + $0x40] sm:$0xff] }
 0x546   : > { %16622 = vst [vmem:[#allocation8_spill] sm:$0xff] %v14974_v27  ;;  %v9393_v40 = vand.u32 4294901760, %v14994_v26 }
 0x547   : > { %9298 = vmatmul.mubr.f32.vlgmr.msra.gmra.mrb[2].mxu1 %v8906_v22  ;;  %v9498_v22 = vsub.f32 %v14831_v61, %v16485_v13  ;;  %v9520_v17 = vand.u32 4294901760, %v9519_v35  ;;  %v15012_v13 = vld [vmem:[%s16453_s10 + $0xd0] sm:$0xff] }
 0x548   : > { %13264 = vmatpush3.bf16.msra.mxu1 %v13263_v21  ;;  %v16483_v21 = vand.u32 4294901760, %v14907_v60  ;;  %v15069_v62 = vsub.f32 %v14994_v26, %v9393_v40  ;;  %v9367_v26 = vld [vmem:[%s16453_s10 + $0xf8] sm:$0xff] }
 0x549   : > { %v9499_v34 = vand.u32 4294901760, %v9498_v22  ;;  %13266 = vmatprep.subr.bf16.mxu1 %v13265_v57  ;;  %v14929_v22 = vsub.f32 %v14879_v25, %v9435_v3  ;;  %v14946_v57 = vpack.c.bf16 %v9420_v37, %v9417_v36 }
 0x54a   : > { %v9512_v0 = vsub.f32 %v14907_v60, %v16483_v21  ;;  %v15000_v21 = vpack.c.bf16 %v9426_v51, %v9423_v49  ;;  %v15018_v49 = vpack.c.bf16 %v9378_v55, %v9375_v9  ;;  %v9444_v51 = vand.u32 4294901760, %v14984_v39 }
 0x54b   : > { %v13267_v11 = vpack.c.bf16 %v9506_v48, %v9499_v34  ;;  %16620 = vst [vmem:[#allocation6_spill] sm:$0xff] %v14929_v22  ;;  %v14939_v34 = vsub.f32 %v14890_v30, %v9438_v1  ;;  %v9390_v48 = vand.u32 4294901760, %v14913_v5  ;;  %v16481_v12 = vand.u32 4294901760, %v14929_v22  ;;  %13230 = vmatprep.subr.bf16.mxu0 %v14946_v57 }
 0x54c   : > { %v9513_v37 = vand.u32 4294901760, %v9512_v0  ;;  %13232 = vmatpush3.bf16.msra.mxu0 %v14961_v33  ;;  %v15038_v55 = vsub.f32 %v14984_v39, %v9444_v51  ;;  %v9366_v39 = vld [vmem:[%s16453_s10 + $0xf0] sm:$0xff] }
 0x54d   : > { %13268 = vmatpush3.bf16.msra.mxu1 %v13267_v11  ;;  %16621 = vst [vmem:[#allocation7_spill] sm:$0xff] %v14939_v34  ;;  %v9625_v11 = vand.u32 4294901760, %v9624_v19  ;;  %v16484_v36 = vand.u32 4294901760, %v14939_v34  ;;  %v9638_v19 = vsub.f32 %v14929_v22, %v16481_v12  ;;  %v14979_v38 = vsub.f32 %v14913_v5, %v9390_v48  ;;  %13234 = vmatprep.subr.bf16.mxu0 %v15000_v21 }
 0x54e   : > { %v9441_v12 = vand.u32 4294901760, %v14955_v59  ;;  %v13271_v44 = vpack.c.bf16 %v9520_v17, %v9513_v37  ;;  %16624 = vst [vmem:[#allocation10_spill] sm:$0xff] %v15038_v55  ;;  %v15044_v17 = vld [vmem:[%s16453_s10 + $0xd8] sm:$0xff]  ;;  %v16489_v8 = vand.u32 4294901760, %v15038_v55  ;;  %v15119_v30 = vpack.c.bf16 %v9390_v48, %v9387_v23 }
 0x54f   : > { %16623 = vst [vmem:[#allocation9_spill] sm:$0xff] %v14979_v38  ;;  %v13269_v0 = vpack.c.bf16 %v9632_v14, %v9625_v11  ;;  %v9645_v4 = vsub.f32 %v14939_v34, %v16484_v36  ;;  %v9639_v14 = vand.u32 4294901760, %v9638_v19  ;;  %v16487_v11 = vand.u32 4294901760, %v14974_v27  ;;  %v15007_v36 = vld [vmem:[%s16453_s10 + $0x48] sm:$0xff] }
 0x550   : > { %v16486_v35 = vand.u32 4294901760, %v14979_v38  ;;  %v15031_v52 = vsub.f32 %v14955_v59, %v9441_v12  ;;  %13236 = vmatpush3.bf16.msra.mxu0 %v15018_v49  ;;  %v9396_v37 = vand.u32 4294901760, %v15007_v36  ;;  %v9450_v15 = vand.u32 4294901760, %v15044_v17  ;;  %16625 = vst [vmem:[#allocation11_spill] sm:$0xff] %v15119_v30 }
 0x551   : > { %13270 = vmatprep.subr.bf16.mxu1 %v13269_v0  ;;  %v9646_v45 = vand.u32 4294901760, %v9645_v4  ;;  %v9526_v19 = vsub.f32 %v14974_v27, %v16487_v11  ;;  %v9447_v4 = vand.u32 4294901760, %v15012_v13 }
 0x552   : > { %v9533_v0 = vsub.f32 %v14979_v38, %v16486_v35  ;;  %13272 = vmatpush3.bf16.msra.mxu1 %v13271_v44  ;;  %v16490_v44 = vand.u32 4294901760, %v15031_v52  ;;  %v15072_v10 = vsub.f32 %v15007_v36, %v9396_v37 }
 0x553   : > { %v13273_v9 = vpack.c.bf16 %v9646_v45, %v9639_v14  ;;  %v9527_v35 = vand.u32 4294901760, %v9526_v19  ;;  %v15051_v14 = vpack.c.bf16 %v9432_v24, %v9429_v50  ;;  %v15057_v45 = vld [vmem:[%s16453_s10 + $0x50] sm:$0xff]  ;;  %v15064_v19 = vpack.c.bf16 %v9384_v32, %v9381_v29 }
 0x554   : > { %v9534_v11 = vand.u32 4294901760, %v9533_v0  ;;  %v9652_v24 = vsub.f32 %v15031_v52, %v16490_v44  ;;  %v15082_v18 = vsub.f32 %v15012_v13, %v9447_v4  ;;  %v9659_v29 = vsub.f32 %v15038_v55, %v16489_v8 }
 0x555   : > { %13274 = vmatprep.subr.bf16.mxu1 %v13273_v9  ;;  %13238 = vmatprep.subr.bf16.mxu0 %v15051_v14  ;;  %v16502_v32 = vand.u32 4294901760, %v15069_v62  ;;  %v16498_v36 = vand.u32 4294901760, %v15072_v10  ;;  %v15098_v9 = vpack.c.bf16 %v9438_v1, %v9435_v3  ;;  %v15102_v44 = vsub.f32 %v15044_v17, %v9450_v15 }
 0x556   : > { %v13275_v50 = vpack.c.bf16 %v9534_v11, %v9527_v35  ;;  %13240 = vmatpush3.bf16.msra.mxu0 %v15064_v19  ;;  %v9347_v11 = vld [vmem:[%s16453_s10 + $0x58] sm:$0xff]  ;;  %v9399_v35 = vand.u32 4294901760, %v15057_v45  ;;  %v9653_v0 = vand.u32 4294901760, %v9652_v24  ;;  %v16494_v8 = vand.u32 4294901760, %v15082_v18 }
 0x557   : > { %v9660_v54 = vand.u32 4294901760, %v9659_v29  ;;  %v9547_v25 = vsub.f32 %v15072_v10, %v16498_v36  ;;  %13242 = vmatprep.subr.bf16.mxu0 %v15098_v9  ;;  %v16497_v1 = vand.u32 4294901760, %v15102_v44  ;;  %v9402_v17 = vand.u32 4294901760, %v9347_v11 }
 0x558   : > { %13276 = vmatpush3.bf16.msra.mxu1 %v13275_v50  ;;  %v9540_v50 = vsub.f32 %v15069_v62, %v16502_v32  ;;  %v9666_v3 = vsub.f32 %v15082_v18, %v16494_v8  ;;  %v15127_v24 = vsub.f32 %v15057_v45, %v9399_v35  ;;  %v9453_v29 = vand.u32 4294901760, %v15107_v7 }
 0x559   : > { %v13277_v5 = vpack.c.bf16 %v9660_v54, %v9653_v0  ;;  %v9548_v48 = vand.u32 4294901760, %v9547_v25  ;;  %v9673_v8 = vsub.f32 %v15102_v44, %v16497_v1  ;;  %v15140_v47 = vsub.f32 %v9347_v11, %v9402_v17  ;;  %v9349_v54 = vld [vmem:[%s16453_s10 + $0x68] sm:$0xff] }
 0x55a   : > { %v9541_v23 = vand.u32 4294901760, %v9540_v50  ;;  %13244 = vmatpush3.bf16.msra.mxu0 %v15119_v30  ;;  %v9667_v53 = vand.u32 4294901760, %v9666_v3  ;;  %v16501_v45 = vand.u32 4294901760, %v15127_v24  ;;  %v15154_v50 = vpack.c.bf16 %v9444_v51, %v9441_v12 }
 0x55b   : > { %13278 = vmatprep.subr.bf16.mxu1 %v13277_v5  ;;  %v9456_v11 = vand.u32 4294901760, %v15132_v56  ;;  %v15158_v25 = vsub.f32 %v15107_v7, %v9453_v29  ;;  %v9674_v3 = vand.u32 4294901760, %v9673_v8  ;;  %v16500_v36 = vand.u32 4294901760, %v15140_v47 }
 0x55c   : > { %v13279_v0 = vpack.c.bf16 %v9548_v48, %v9541_v23  ;;  %16626 = vst [vmem:[#allocation12_spill] sm:$0xff] %v15154_v50  ;;  %v9554_v1 = vsub.f32 %v15127_v24, %v16501_v45  ;;  %v15166_v5 = vpack.c.bf16 %v9396_v37, %v9393_v40  ;;  %13246 = vmatprep.subr.bf16.mxu0 %v15154_v50  ;;  %v9405_v7 = vand.u32 4294901760, %v15145_v46 }
 0x55d   : > { %v16499_v59 = vand.u32 4294901760, %v15158_v25  ;;  %v15171_v12 = vsub.f32 %v15132_v56, %v9456_v11  ;;  %v9408_v8 = vand.u32 4294901760, %v9349_v54  ;;  %v13281_v51 = vpack.c.bf16 %v9674_v3, %v9667_v53 }
 0x55e   : > { %16627 = vst [vmem:[#allocation13_spill] sm:$0xff] %v15166_v5  ;;  %13280 = vmatpush3.bf16.msra.mxu1 %v13279_v0  ;;  %v9555_v40 = vand.u32 4294901760, %v9554_v1  ;;  %v9561_v37 = vsub.f32 %v15140_v47, %v16500_v36  ;;  %13248 = vmatpush3.bf16.msra.mxu0 %v15166_v5  ;;  %v15186_v56 = vpack.c.bf16 %v9450_v15, %v9447_v4  ;;  %v9350_v1 = vld [vmem:[%s16453_s10 + $0x70] sm:$0xff]  ;;  %v9459_v13 = vand.u32 4294901760, %v9366_v39 }
 0x55f   : > { %v9680_v23 = vsub.f32 %v15158_v25, %v16499_v59  ;;  %v16503_v48 = vand.u32 4294901760, %v15171_v12  ;;  %v15193_v0 = vsub.f32 %v15145_v46, %v9405_v7  ;;  %v15195_v53 = vsub.f32 %v9349_v54, %v9408_v8  ;;  %13282 = vmatprep.subr.bf16.mxu1 %v13281_v51  ;;  %v9351_v59 = vld [vmem:[%s16453_s10 + $0x78] sm:$0xff] }
 0x560   : > { %16628 = vst [vmem:[#allocation14_spill] sm:$0xff] %v15186_v56  ;;  %v9562_v3 = vand.u32 4294901760, %v9561_v37  ;;  %13250 = vmatprep.subr.bf16.mxu0 %v15186_v56  ;;  %v9462_v4 = vand.u32 4294901760, %v9367_v26  ;;  %v15201_v15 = vpack.c.bf16 %v9402_v17, %v9399_v35  ;;  %v15211_v45 = vsub.f32 %v9366_v39, %v9459_v13 }
 0x561   : > { %v9681_v46 = vand.u32 4294901760, %v9680_v23  ;;  %v9687_v54 = vsub.f32 %v15171_v12, %v16503_v48  ;;  %v16511_v36 = vand.u32 4294901760, %v15193_v0  ;;  %v16514_v51 = vand.u32 4294901760, %v15195_v53 }
 0x562   : > { %16629 = vst [vmem:[#allocation15_spill] sm:$0xff] %v15201_v15  ;;  %v13283_v37 = vpack.c.bf16 %v9562_v3, %v9555_v40  ;;  %v15213_v32 = vsub.f32 %v9367_v26, %v9462_v4  ;;  %13252 = vmatpush3.bf16.msra.mxu0 %v15201_v15  ;;  %v9411_v35 = vand.u32 4294901760, %v9350_v1  ;;  %v9414_v2 = vand.u32 4294901760, %v9351_v59 }
 0x563   : > { %v9688_v17 = vand.u32 4294901760, %v9687_v54  ;;  %v9568_v23 = vsub.f32 %v15193_v0, %v16511_v36  ;;  %v9575_v48 = vsub.f32 %v15195_v53, %v16514_v51  ;;  %v9693_v40 = vand.u32 4294901760, %v15211_v45 }
 0x564   : > { %13284 = vmatpush3.bf16.msra.mxu1 %v13283_v37  ;;  %v9700_v39 = vand.u32 4294901760, %v15213_v32  ;;  %v15224_v26 = vsub.f32 %v9350_v1, %v9411_v35  ;;  %v15226_v3 = vpack.c.bf16 %v9456_v11, %v9453_v29  ;;  %v15228_v5 = vsub.f32 %v9351_v59, %v9414_v2 }
 0x565   : > { %v13285_v15 = vpack.c.bf16 %v9688_v17, %v9681_v46  ;;  %v9569_v54 = vand.u32 4294901760, %v9568_v23  ;;  %v9576_v56 = vand.u32 4294901760, %v9575_v48  ;;  %v9694_v36 = vsub.f32 %v15211_v45, %v9693_v40 }
 0x566   : > { %16630 = vst [vmem:[#allocation16_spill] sm:$0xff] %v15224_v26  ;;  %v9701_v50 = vsub.f32 %v15213_v32, %v9700_v39  ;;  %v9581_v51 = vand.u32 4294901760, %v15224_v26  ;;  %13254 = vmatprep.subr.bf16.mxu0 %v15226_v3  ;;  %v15234_v37 = vpack.c.bf16 %v9408_v8, %v9405_v7  ;;  %v9588_v29 = vand.u32 4294901760, %v15228_v5 }
 0x567   : > { %13286 = vmatprep.subr.bf16.mxu1 %v13285_v15  ;;  %v13287_v1 = vpack.c.bf16 %v9576_v56, %v9569_v54  ;;  %v15237_v11 = vpack.c.bf16 %v9462_v4, %v9459_v13  ;;  %v9695_v46 = vand.u32 4294901760, %v9694_v36  ;;  %v15241_v17 = vpack.c.bf16 %v9414_v2, %v9411_v35  ;;  %v9310_v15 = vpop.permute.xlu1 %9309 }
 0x568   : > { %v9702_v48 = vand.u32 4294901760, %v9701_v50  ;;  %v9582_v59 = vsub.f32 %v15224_v26, %v9581_v51  ;;  %13256 = vmatpush3.bf16.msra.mxu0 %v15234_v37  ;;  %v9589_v23 = vsub.f32 %v15228_v5, %v9588_v29  ;;  %v13293_v7 = vpack.c.bf16 %v14766_v42, %v14761_v41  ;;  %v9318_v50 = vpop.permute.xlu0 %9317 }
 0x569   : > { %13288 = vmatpush3.bf16.msra.mxu1 %v13287_v1  ;;  %13258 = vmatprep.subr.bf16.mxu0 %v15237_v11  ;;  %v16638_v1 = vand.u32 4294901760, %v15171_v12  ;;  %v16641_v54 = vand.u32 4294901760, %v15195_v53 }
 0x56a   : > { %v13289_v56 = vpack.c.bf16 %v9702_v48, %v9695_v46  ;;  %v9583_v36 = vand.u32 4294901760, %v9582_v59  ;;  %v9590_v13 = vand.u32 4294901760, %v9589_v23  ;;  %v16632_v48 = vand.u32 4294901760, %v15072_v10 }
 0x56b   : > { %v16634_v23 = vand.u32 4294901760, %v15127_v24  ;;  %v16635_v46 = vand.u32 4294901760, %v15140_v47 }
 0x56c   : > { %13290 = vmatprep.subr.bf16.mxu1 %v13289_v56  ;;  %13260 = vmatpush3.bf16.msra.mxu0 %v15241_v17  ;;  %v13291_v4 = vpack.c.bf16 %v9590_v13, %v9583_v36  ;;  %v16637_v56 = vand.u32 4294901760, %v15158_v25  ;;  %v16640_v13 = vand.u32 4294901760, %v15193_v0 }
 0x56d   : > { %13294 = vmatprep.subr.bf16.mxu0 %v13293_v7  ;;  %v15289_v7 = vpack.c.bf16 %v16635_v46, %v16634_v23 }
 0x56e   : > { %13292 = vmatpush3.bf16.msra.mxu1 %v13291_v4  ;;  %v16631_v4 = vand.u32 4294901760, %v15069_v62  ;;  %v15295_v36 = vpack.c.bf16 %v16638_v1, %v16637_v56  ;;  %v15301_v35 = vpack.c.bf16 %v16641_v54, %v16640_v13 }
 0x56f   : > { %13326 = vmatprep.subr.bf16.mxu1 %v14946_v57  ;;  %16636 = vst [vmem:[#allocation18_spill] sm:$0xff] %v15289_v7 }
 0x570   : > { %v15283_v59 = vpack.c.bf16 %v16632_v48, %v16631_v4  ;;  %16639 = vst [vmem:[#allocation19_spill] sm:$0xff] %v15295_v36  ;;  %16642 = vst [vmem:[#allocation20_spill] sm:$0xff] %v15301_v35  ;;  %v15303_v48 = vpack.c.bf16 %v9700_v39, %v9693_v40  ;;  %v15305_v4 = vpack.c.bf16 %v9588_v29, %v9581_v51  ;;  %v15446_v35 = vld [vmem:[%s16454_s11 + $0x60] sm:$0xff] }
 0x571   : > { %16676 = vst [vmem:[#allocation39_spill] sm:$0xff] %v15446_v35 }
 0x572   : > { %16633 = vst [vmem:[#allocation17_spill] sm:$0xff] %v15283_v59  ;;  %16643 = vst [vmem:[#allocation21_spill] sm:$0xff] %v15303_v48  ;;  %v15427_v48 = vld [vmem:[%s16454_s11 + $0xe8] sm:$0xff] }
 0x573   : > { %16644 = vst [vmem:[#allocation22_spill] sm:$0xff] %v15305_v4  ;;  %16671 = vst [vmem:[#allocation38_spill] sm:$0xff] %v15427_v48 }
 0x61a   : > { %v9299_v2 = vpop.f32.mrb[2].mxu1 }
 0x61b   : > { %v9312_v46 = vmul.f32 %v9310_v15, %v9299_v2  ;;  %v9301_v23 = vpop.f32.mrb[3].mxu1 }
 0x61c   : > { %v9313_v8 = vmul.f32 %v9310_v15, %v9301_v23 }
 0x61d   : > { %v9320_v7 = vadd.f32 %v9318_v50, %v9312_v46 }
 0x61e   : > { %v9321_v59 = vadd.f32 %v9318_v50, %v9313_v8 }
 0x61f   : > { %v12752_v1 = vmul.f32 -1.442695, %v9320_v7 }
 0x620   : > { %v12753_v56 = vmul.f32 -1.442695, %v9321_v59 }
 0x621   : > { %13964 = vpow2.f32 %v12752_v1 }
 0x622   : > { %13966 = vpow2.f32 %v12753_v56 }
 0x62b   : > { %v13965_v36 = vpop.eup %13964 }
 0x62c   : > { %v13967_v26 = vpop.eup %13966  ;;  %v9328_v54 = vadd.f32 1.0, %v13965_v36 }
 0x62d   : > { %v9329_v13 = vadd.f32 1.0, %v13967_v26 }
 0x62e   : > { %13968 = vrcp.f32 %v9328_v54 }
 0x62f   : > { %13970 = vrcp.f32 %v9329_v13  ;;  %v16656_v13 = vpack.c.bf16 %v14776_v20, %v14771_v43 }
 0x638   : > { %v13969_v51 = vpop.eup %13968 }
 0x639   : > { %v13971_v40 = vpop.eup %13970  ;;  %v15307_v39 = vmul.f32 %v13969_v51, %v9320_v7  ;;  %v16657_v51 = vpack.c.bf16 %v14820_v58, %v14815_v6 }
 0x63a   : > { %v15309_v29 = vmul.f32 %v13971_v40, %v9321_v59  ;;  %v15363_v40 = vld [vmem:[%s16454_s11 + $0x40] sm:$0xff] }
 0x63b   : > { %16645 = vst [vmem:[#allocation23_spill] sm:$0xff] %v15307_v39  ;;  %v15312_v2 = vand.u32 4294901760, %v15307_v39  ;;  %v11124_v8 = vsel %vm16648_vm0, %v15307_v39, 0.0  ;;  %16658 = vst [vmem:[#allocation32_spill] sm:$0xff] %v15363_v40 }
 0x63c   : > { %16646 = vst [vmem:[#allocation24_spill] sm:$0xff] %v15309_v29  ;;  %v15317_v50 = vand.u32 4294901760, %v15309_v29  ;;  %v11125_v26 = vsel %vm16649_vm3, %v15309_v29, 0.0 }
 0x63d   : > { %16647 = vst [vmem:[#allocation25_spill] sm:$0xff] %v15312_v2  ;;  %v15323_v15 = vsub.f32 %v15307_v39, %v15312_v2  ;;  %v11126_v7 = vadd.f32 %v11125_v26, %v11124_v8  ;;  %v15368_v8 = vld [vmem:[%s16454_s11 + $0x48] sm:$0xff]  ;;  %v15374_v26 = vld [vmem:[%s16454_s11 + $0xd0] sm:$0xff]  ;;  %v16669_v39 = vand.u32 4294901760, %v15363_v40 }
 0x63e   : > { %9705 = vmatprep.mubr.f32.mxu1 %v15317_v50  ;;  %v15328_v59 = vsub.f32 %v15309_v29, %v15317_v50  ;;  %16659 = vst [vmem:[#allocation33_spill] sm:$0xff] %v15368_v8  ;;  %16660 = vst [vmem:[#allocation34_spill] sm:$0xff] %v15374_v26  ;;  %v16664_v29 = vld [vmem:[#allocation12_spill] sm:$0xff] }
 0x63f   : > { %16650 = vst [vmem:[#allocation26_spill] sm:$0xff] %v15323_v15  ;;  %11127 = vadd.xlane.f32.xlu1 %v11126_v7  ;;  %9707 = vmatmul.mubr.f32.vlgmr.msra.gmra.mrb[4].mxu1 %v15312_v2  ;;  %v15332_v36 = vand.u32 4294901760, %v15323_v15  ;;  %v15379_v7 = vld [vmem:[%s16454_s11 + $0xd8] sm:$0xff]  ;;  %v16680_v2 = vpack.c.bf16 %v14979_v38, %v14974_v27 }
 0x640   : > { %16651 = vst [vmem:[#allocation27_spill] sm:$0xff] %v15328_v59  ;;  %13328 = vmatpush3.bf16.msra.mxu1 %v14961_v33  ;;  %v15336_v46 = vand.u32 4294901760, %v15328_v59  ;;  %16661 = vst [vmem:[#allocation35_spill] sm:$0xff] %v15379_v7 }
 0x641   : > { %16652 = vst [vmem:[#allocation28_spill] sm:$0xff] %v15332_v36  ;;  %13330 = vmatprep.subr.bf16.mxu1 %v15000_v21  ;;  %v9473_v23 = vsub.f32 %v15323_v15, %v15332_v36 }
 0x642   : > { %16653 = vst [vmem:[#allocation29_spill] sm:$0xff] %v15336_v46  ;;  %9949 = vmatprep.mubr.f32.mxu1 %v15336_v46  ;;  %v9467_v1 = vsub.f32 %v15328_v59, %v15336_v46 }
 0x643   : > { %v15348_v54 = vand.u32 4294901760, %v9473_v23  ;;  %v16662_v23 = vpack.c.bf16 %v14836_v63, %v14831_v61 }
 0x644   : > { %13332 = vmatpush3.bf16.msra.mxu1 %v15018_v49  ;;  %v15345_v56 = vand.u32 4294901760, %v9467_v1  ;;  %v15401_v1 = vld [vmem:[%s16454_s11 + $0x58] sm:$0xff] }
 0x645   : > { %13334 = vmatprep.subr.bf16.mxu1 %v15051_v14  ;;  %16655 = vst [vmem:[#allocation31_spill] sm:$0xff] %v15348_v54  ;;  %16666 = vst [vmem:[#allocation37_spill] sm:$0xff] %v15401_v1 }
 0x646   : > { %16654 = vst [vmem:[#allocation30_spill] sm:$0xff] %v15345_v56  ;;  %9469 = vmatprep.mubr.f32.mxu0 %v15345_v56  ;;  %v16674_v56 = vand.u32 4294901760, %v15374_v26 }
 0x647   : > { %9475 = vmatmul.mubr.f32.vlgmr.msra.gmra.mrb[2].mxu0 %v15348_v54  ;;  %v16670_v54 = vand.u32 4294901760, %v15368_v8 }
 0x648   : > { %13296 = vmatpush3.bf16.msra.mxu0 %v16656_v13  ;;  %13336 = vmatpush3.bf16.msra.mxu1 %v15064_v19  ;;  %v16667_v13 = vpack.c.bf16 %v14919_v16, %v14907_v60  ;;  %v15436_v4 = vsub.f32 %v15374_v26, %v16674_v56  ;;  %v15458_v56 = vld [vmem:[%s16454_s11 + $0xf0] sm:$0xff]  ;;  %v16686_v26 = vpack.c.bf16 %v15038_v55, %v15031_v52 }
 0x649   : > { %9842 = vmatprep.mubr.f32.mxu0 %v15328_v59  ;;  %13298 = vmatprep.subr.bf16.mxu0 %v16657_v51  ;;  %v16663_v51 = vpack.c.bf16 %v14895_v31, %v14884_v28  ;;  %v15410_v59 = vsub.f32 %v15363_v40, %v16669_v39  ;;  %v15415_v46 = vsub.f32 %v15368_v8, %v16670_v54  ;;  %v16673_v54 = vld [vmem:[#allocation14_spill] sm:$0xff]  ;;  %v16675_v8 = vand.u32 4294901760, %v15379_v7 }
 0x64a   : > { %13338 = vmatprep.subr.bf16.mxu1 %v15098_v9  ;;  %v16672_v39 = vpack.c.bf16 %v14939_v34, %v14929_v22  ;;  %16678 = vst [vmem:[#allocation41_spill] sm:$0xff] %v15458_v56  ;;  %v16683_v34 = vand.u32 4294901760, %v15401_v1 }
 0x64b   : > { %v15441_v40 = vsub.f32 %v15379_v7, %v16675_v8  ;;  %v15463_v8 = vld [vmem:[%s16454_s11 + $0xf8] sm:$0xff]  ;;  %v16687_v27 = vand.u32 4294901760, %v15410_v59 }
 0x64c   : > { %13300 = vmatpush3.bf16.msra.mxu0 %v16662_v23  ;;  %13340 = vmatpush3.bf16.msra.mxu1 %v15119_v30  ;;  %v15396_v23 = vld [vmem:[%s16454_s11 + $0x50] sm:$0xff]  ;;  %16679 = vst [vmem:[#allocation42_spill] sm:$0xff] %v15463_v8  ;;  %v15479_v22 = vsub.f32 %v15401_v1, %v16683_v34  ;;  %v15489_v7 = vld [vmem:[%s16454_s11 + $0x78] sm:$0xff]  ;;  %v16688_v30 = vand.u32 4294901760, %v15415_v46  ;;  %v16691_v34 = vand.u32 4294901760, %v15427_v48 }
 0x64d   : > { %13302 = vmatprep.subr.bf16.mxu0 %v16663_v51  ;;  %13342 = vmatprep.subr.bf16.mxu1 %v16664_v29  ;;  %16665 = vst [vmem:[#allocation36_spill] sm:$0xff] %v15396_v23  ;;  %v16668_v51 = vld [vmem:[#allocation13_spill] sm:$0xff]  ;;  %16685 = vst [vmem:[#allocation44_spill] sm:$0xff] %v15489_v7 }
 0x64e   : > { %v15505_v55 = vpack.c.bf16 %v16688_v30, %v16687_v27  ;;  %v15515_v1 = vsub.f32 %v15427_v48, %v16691_v34  ;;  %v16694_v34 = vand.u32 4294901760, %v15446_v35 }
 0x650   : > { %13304 = vmatpush3.bf16.msra.mxu0 %v16667_v13  ;;  %13344 = vmatpush3.bf16.msra.mxu1 %v16668_v51  ;;  %v15422_v13 = vld [vmem:[%s16454_s11 + $0xe0] sm:$0xff]  ;;  %v16682_v51 = vand.u32 4294901760, %v15396_v23  ;;  %16689 = vst [vmem:[#allocation45_spill] sm:$0xff] %v15505_v55  ;;  %v15532_v38 = vsub.f32 %v15446_v35, %v16694_v34  ;;  %v16700_v55 = vand.u32 4294901760, %v15463_v8 }
 0x651   : > { %13306 = vmatprep.subr.bf16.mxu0 %v16672_v39  ;;  %13346 = vmatprep.subr.bf16.mxu1 %v16673_v54  ;;  %v15453_v54 = vld [vmem:[%s16454_s11 + $0x68] sm:$0xff]  ;;  %v16681_v39 = vld [vmem:[#allocation15_spill] sm:$0xff] }
 0x652   : > { %16677 = vst [vmem:[#allocation40_spill] sm:$0xff] %v15453_v54  ;;  %v15474_v29 = vsub.f32 %v15396_v23, %v16682_v51  ;;  %v16692_v23 = vpack.c.bf16 %v15072_v10, %v15069_v62  ;;  %v16695_v62 = vand.u32 4294901760, %v15436_v4  ;;  %v16696_v10 = vand.u32 4294901760, %v15441_v40 }
 0x653   : > { %v15553_v34 = vsub.f32 %v15463_v8, %v16700_v55  ;;  %v16706_v8 = vpack.c.bf16 %v15140_v47, %v15127_v24 }
 0x654   : > { %13308 = vmatpush3.bf16.msra.mxu0 %v16680_v2  ;;  %13348 = vmatpush3.bf16.msra.mxu1 %v16681_v39  ;;  %v15484_v2 = vld [vmem:[%s16454_s11 + $0x70] sm:$0xff]  ;;  %v16698_v39 = vand.u32 4294901760, %v15453_v54  ;;  %v16701_v35 = vand.u32 4294901760, %v15474_v29 }
 0x655   : > { %16684 = vst [vmem:[#allocation43_spill] sm:$0xff] %v15484_v2  ;;  %13310 = vmatprep.subr.bf16.mxu0 %v16686_v26  ;;  %13350 = vmatprep.subr.bf16.mxu1 %v15226_v3  ;;  %v16690_v26 = vand.u32 4294901760, %v15422_v13  ;;  %v16544_v24 = vand.u32 4294901760, %v15553_v34 }
 0x656   : > { %v15543_v30 = vsub.f32 %v15453_v54, %v16698_v39  ;;  %v16540_v39 = vand.u32 4294901760, %v15515_v1  ;;  %v16704_v54 = vand.u32 4294901760, %v15484_v2 }
 0x657   : > { %v15510_v51 = vsub.f32 %v15422_v13, %v16690_v26  ;;  %v16693_v26 = vpack.c.bf16 %v15102_v44, %v15082_v18 }
 0x658   : > { %13312 = vmatpush3.bf16.msra.mxu0 %v16692_v23  ;;  %13352 = vmatpush3.bf16.msra.mxu1 %v15234_v37  ;;  %v15538_v23 = vpack.c.bf16 %v16696_v10, %v16695_v62  ;;  %v16702_v62 = vand.u32 4294901760, %v15479_v22 }
 0x659   : > { %13314 = vmatprep.subr.bf16.mxu0 %v16693_v26  ;;  %13354 = vmatprep.subr.bf16.mxu1 %v15237_v11  ;;  %v16699_v26 = vand.u32 4294901760, %v15458_v56 }
 0x65a   : > { %16697 = vst [vmem:[#allocation46_spill] sm:$0xff] %v15538_v23  ;;  %v15559_v10 = vpack.c.bf16 %v16702_v62, %v16701_v35  ;;  %v16541_v23 = vand.u32 4294901760, %v15510_v51  ;;  %v16707_v35 = vpack.c.bf16 %v15171_v12, %v15158_v25  ;;  %v16542_v62 = vand.u32 4294901760, %v15543_v30  ;;  %v15600_v25 = vld [vmem:[%s16454_s11 + $0x88] sm:$0xff] }
 0x65b   : > { %v15548_v27 = vsub.f32 %v15458_v56, %v16699_v26  ;;  %v15566_v26 = vsub.f32 %v15484_v2, %v16704_v54  ;;  %v16705_v56 = vand.u32 4294901760, %v15489_v7 }
 0x65c   : > { %16703 = vst [vmem:[#allocation47_spill] sm:$0xff] %v15559_v10  ;;  %13316 = vmatpush3.bf16.msra.mxu0 %v16706_v8  ;;  %13356 = vmatpush3.bf16.msra.mxu1 %v15241_v17  ;;  %v15585_v54 = vpack.c.bf16 %v16540_v39, %v16541_v23  ;;  %v15611_v39 = vld [vmem:[%s16454_s11] sm:$0xff] }
 0x65d   : > { %v15571_v55 = vsub.f32 %v15489_v7, %v16705_v56  ;;  %13318 = vmatprep.subr.bf16.mxu0 %v16707_v35  ;;  %13390 = vmatprep.subr.bf16.mxu1 %v14946_v57  ;;  %v16543_v56 = vand.u32 4294901760, %v15532_v38  ;;  %v16545_v47 = vand.u32 4294901760, %v15548_v27  ;;  %v15595_v57 = vld [vmem:[%s16454_s11 + $0x80] sm:$0xff]  ;;  %v16546_v12 = vand.u32 4294901760, %v15566_v26  ;;  %v16772_v7 = vld [vmem:[#allocation17_spill] sm:$0xff] }
 0x65e   : > { %16708 = vst [vmem:[#allocation48_spill] sm:$0xff] %v15585_v54  ;;  %v16709_v35 = vpack.c.bf16 %v15195_v53, %v15193_v0  ;;  %v16713_v0 = vand.u32 4294901760, %v14761_v41  ;;  %v16714_v53 = vand.u32 4294901760, %v14766_v42  ;;  %v16548_v41 = vand.u32 4294901760, %v15611_v39  ;;  %v16717_v42 = vld [vmem:[#allocation16_spill] sm:$0xff] }
 0x65f   : > { %9953 = vmatmul.mubr.f32.vlgmr.msra.gmra.mrb[6].mxu1 %v15332_v36  ;;  %v15617_v23 = vpack.c.bf16 %v16542_v62, %v16543_v56  ;;  %v15623_v8 = vpack.c.bf16 %v16544_v24, %v16545_v47  ;;  %v16715_v62 = vand.u32 4294901760, %v15571_v55  ;;  %v16550_v24 = vand.u32 4294901760, %v15595_v57 }
 0x660   : > { %13320 = vmatpush3.bf16.msra.mxu0 %v16709_v35  ;;  %13392 = vmatpush3.bf16.msra.mxu1 %v14961_v33  ;;  %v16712_v33 = vpack.c.bf16 %v15213_v32, %v15211_v45  ;;  %v13357_v35 = vpack.c.bf16 %v16714_v53, %v16713_v0  ;;  %v16549_v47 = vand.u32 4294901760, %v15600_v25  ;;  %v15645_v32 = vld [vmem:[%s16454_s11 + $0x8] sm:$0xff]  ;;  %v16718_v45 = vpack.c.bf16 %v15228_v5, %v16717_v42  ;;  %v15659_v0 = vld [vmem:[%s16454_s11 + $0x90] sm:$0xff]  ;;  %v15664_v53 = vld [vmem:[%s16454_s11 + $0x98] sm:$0xff] }
 0x661   : > { %16710 = vst [vmem:[#allocation49_spill] sm:$0xff] %v15617_v23  ;;  %16711 = vst [vmem:[#allocation50_spill] sm:$0xff] %v15623_v8  ;;  %10223 = vmatprep.mubr.f32.mxu1 %v15317_v50  ;;  %v15637_v56 = vpack.c.bf16 %v16715_v62, %v16546_v12  ;;  %13394 = vmatprep.subr.bf16.mxu1 %v15000_v21  ;;  %v16719_v62 = vand.u32 4294901760, %v14771_v43  ;;  %v16720_v21 = vand.u32 4294901760, %v14776_v20  ;;  %v16722_v43 = vand.u32 4294901760, %v14820_v58 }
 0x662   : > { %13322 = vmatprep.subr.bf16.mxu0 %v16712_v33  ;;  %v16547_v20 = vand.u32 4294901760, %v15645_v32  ;;  %v15675_v42 = vsub.f32 %v15595_v57, %v16550_v24  ;;  %v16551_v58 = vand.u32 4294901760, %v15659_v0  ;;  %v16729_v12 = vand.u32 4294901760, %v14895_v31 }
 0x663   : > { %16716 = vst [vmem:[#allocation51_spill] sm:$0xff] %v15637_v56  ;;  %v13359_v33 = vpack.c.bf16 %v16720_v21, %v16719_v62  ;;  %v16727_v62 = vand.u32 4294901760, %v14836_v63  ;;  %v15713_v63 = vld [vmem:[%s16454_s11 + $0x18] sm:$0xff]  ;;  %v16758_v54 = vand.u32 4294901760, %v15082_v18  ;;  %v15854_v18 = vld [vmem:[%s16454_s11 + $0xc8] sm:$0xff] }
 0x664   : > { %13324 = vmatpush3.bf16.msra.mxu0 %v16718_v45  ;;  %13396 = vmatpush3.bf16.msra.mxu1 %v15018_v49  ;;  %v16721_v49 = vand.u32 4294901760, %v14815_v6  ;;  %16723 = vst [vmem:[#allocation16_spill] sm:$0xff] %v15675_v42  ;;  %v15680_v45 = vsub.f32 %v15600_v25, %v16549_v47  ;;  %v15686_v6 = vsub.f32 %v15611_v39, %v16548_v41  ;;  %v16748_v24 = vand.u32 4294901760, %v15675_v42 }
 0x665   : > { %13358 = vmatprep.subr.bf16.mxu0 %v13357_v35  ;;  %13398 = vmatprep.subr.bf16.mxu1 %v15051_v14  ;;  %v16552_v14 = vand.u32 4294901760, %v15664_v53  ;;  %v16726_v35 = vand.u32 4294901760, %v14831_v61  ;;  %v15708_v61 = vsub.f32 %v15645_v32, %v16547_v20  ;;  %v16734_v20 = vand.u32 4294901760, %v14919_v16  ;;  %v15761_v16 = vld [vmem:[%s16454_s11 + $0x28] sm:$0xff] }
 0x666   : > { %v13361_v5 = vpack.c.bf16 %v16722_v43, %v16721_v49  ;;  %16724 = vst [vmem:[#allocation52_spill] sm:$0xff] %v15680_v45  ;;  %16725 = vst [vmem:[#allocation53_spill] sm:$0xff] %v15686_v6  ;;  %v15698_v49 = vld [vmem:[%s16454_s11 + $0x10] sm:$0xff]  ;;  %v16728_v43 = vand.u32 4294901760, %v14884_v28  ;;  %v16738_v28 = vld [vmem:[#allocation7_spill] sm:$0xff]  ;;  %v10490_v47 = vsub.f32 %v15675_v42, %v16748_v24  ;;  %v16749_v8 = vand.u32 4294901760, %v15680_v45 }
 0x667   : > { %9845 = vmatmul.mubr.f32.vlgmr.msra.gmra.mrb[4].mxu0 %v15323_v15  ;;  %v13363_v21 = vpack.c.bf16 %v16727_v62, %v16726_v35  ;;  %16730 = vst [vmem:[#allocation54_spill] sm:$0xff] %v15708_v61  ;;  %v15732_v35 = vsub.f32 %v15659_v0, %v16551_v58  ;;  %v16736_v58 = vld [vmem:[#allocation6_spill] sm:$0xff]  ;;  %v15793_v24 = vld [vmem:[%s16454_s11 + $0xb0] sm:$0xff] }
 0x668   : > { %13360 = vmatpush3.bf16.msra.mxu0 %v13359_v33  ;;  %10119 = vmatprep.mubr.f32.mxu0 %v15317_v50  ;;  %v13365_v33 = vpack.c.bf16 %v16729_v12, %v16728_v43  ;;  %v15726_v12 = vld [vmem:[%s16454_s11 + $0xa8] sm:$0xff]  ;;  %v16733_v43 = vand.u32 4294901760, %v14907_v60  ;;  %v16737_v31 = vand.u32 4294901760, %v16736_v58  ;;  %v15756_v60 = vld [vmem:[%s16454_s11 + $0x20] sm:$0xff]  ;;  %v10497_v23 = vsub.f32 %v15680_v45, %v16749_v8  ;;  %v15798_v8 = vld [vmem:[%s16454_s11 + $0xb8] sm:$0xff] }
 0x669   : > { %13400 = vmatpush3.bf16.msra.mxu1 %v15064_v19  ;;  %13362 = vmatprep.subr.bf16.mxu0 %v13361_v5  ;;  %v15718_v19 = vld [vmem:[%s16454_s11 + $0xa0] sm:$0xff]  ;;  %16731 = vst [vmem:[#allocation55_spill] sm:$0xff] %v15732_v35  ;;  %v16741_v58 = vld [vmem:[#allocation8_spill] sm:$0xff]  ;;  %v16761_v36 = vand.u32 4294901760, %v15726_v12 }
 0x66a   : > { %13402 = vmatprep.subr.bf16.mxu1 %v15098_v9  ;;  %v15737_v9 = vsub.f32 %v15664_v53, %v16552_v14  ;;  %v13367_v41 = vpack.c.bf16 %v16734_v20, %v16733_v43  ;;  %v16735_v5 = vld [vmem:[#allocation11_spill] sm:$0xff]  ;;  %v16739_v14 = vand.u32 4294901760, %v16738_v28  ;;  %v16740_v20 = vld [vmem:[#allocation12_spill] sm:$0xff]  ;;  %v16743_v28 = vld [vmem:[#allocation9_spill] sm:$0xff] }
 0x66b   : > { %v16746_v43 = vld [vmem:[#allocation10_spill] sm:$0xff] }
 0x66c   : > { %16732 = vst [vmem:[#allocation56_spill] sm:$0xff] %v15737_v9  ;;  %13364 = vmatpush3.bf16.msra.mxu0 %v13363_v21  ;;  %v13369_v56 = vpack.c.bf16 %v16739_v14, %v16737_v31  ;;  %v16744_v14 = vand.u32 4294901760, %v16743_v28  ;;  %v16747_v21 = vand.u32 4294901760, %v16746_v43  ;;  %v16751_v28 = vand.u32 4294901760, %v15698_v49 }
 0x66d   : > { %13404 = vmatpush3.bf16.msra.mxu1 %v16735_v5  ;;  %13366 = vmatprep.subr.bf16.mxu0 %v13365_v33  ;;  %v16742_v33 = vand.u32 4294901760, %v16741_v58  ;;  %v16745_v5 = vand.u32 4294901760, %v15031_v52  ;;  %v16755_v43 = vand.u32 4294901760, %v15718_v19  ;;  %v10491_v52 = vand.u32 4294901760, %v10490_v47 }
 0x66e   : > { %13406 = vmatprep.subr.bf16.mxu1 %v16740_v20  ;;  %v16750_v20 = vand.u32 4294901760, %v15686_v6  ;;  %v16765_v47 = vand.u32 4294901760, %v15737_v9 }
 0x66f   : > { %v13371_v31 = vpack.c.bf16 %v16744_v14, %v16742_v33  ;;  %v13373_v62 = vpack.c.bf16 %v16747_v21, %v16745_v5  ;;  %v15788_v21 = vsub.f32 %v15698_v49, %v16751_v28  ;;  %v16753_v14 = vand.u32 4294901760, %v15713_v63  ;;  %v16757_v33 = vld [vmem:[#allocation13_spill] sm:$0xff]  ;;  %v16763_v28 = vld [vmem:[#allocation14_spill] sm:$0xff] }
 0x670   : > { %v15781_v58 = vsub.f32 %v15686_v6, %v16750_v20  ;;  %13368 = vmatpush3.bf16.msra.mxu0 %v13367_v41  ;;  %v15808_v20 = vsub.f32 %v15718_v19, %v16755_v43  ;;  %v16759_v41 = vand.u32 4294901760, %v15102_v44  ;;  %v15823_v43 = vsub.f32 %v15726_v12, %v16761_v36  ;;  %v15831_v44 = vld [vmem:[%s16454_s11 + $0x30] sm:$0xff] }
 0x671   : > { %16752 = vst [vmem:[#allocation11_spill] sm:$0xff] %v15788_v21  ;;  %v15803_v5 = vsub.f32 %v15713_v63, %v16753_v14  ;;  %13408 = vmatpush3.bf16.msra.mxu1 %v16757_v33  ;;  %13370 = vmatprep.subr.bf16.mxu0 %v13369_v56  ;;  %v16760_v14 = vand.u32 4294901760, %v15708_v61  ;;  %v10498_v6 = vand.u32 4294901760, %v10497_v23  ;;  %v16764_v33 = vand.u32 4294901760, %v15732_v35 }
 0x672   : > { %16756 = vst [vmem:[#allocation7_spill] sm:$0xff] %v15808_v20  ;;  %v13377_v10 = vpack.c.bf16 %v16759_v41, %v16758_v54  ;;  %16762 = vst [vmem:[#allocation12_spill] sm:$0xff] %v15823_v43  ;;  %13410 = vmatprep.subr.bf16.mxu1 %v16763_v28  ;;  %v15836_v54 = vld [vmem:[%s16454_s11 + $0x38] sm:$0xff]  ;;  %v10379_v36 = vand.u32 4294901760, %v15781_v58  ;;  %v10511_v28 = vsub.f32 %v15737_v9, %v16765_v47  ;;  %v16766_v56 = vand.u32 4294901760, %v15756_v60 }
 0x673   : > { %16754 = vst [vmem:[#allocation6_spill] sm:$0xff] %v15803_v5  ;;  %v10385_v15 = vsub.f32 %v15708_v61, %v16760_v14  ;;  %v10504_v23 = vsub.f32 %v15732_v35, %v16764_v33  ;;  %v15849_v14 = vld [vmem:[%s16454_s11 + $0xc0] sm:$0xff]  ;;  %v16767_v41 = vand.u32 4294901760, %v15761_v16  ;;  %v16771_v33 = vand.u32 4294901760, %v15788_v21 }
 0x674   : > { %13372 = vmatpush3.bf16.msra.mxu0 %v13371_v31  ;;  %v15861_v47 = vsub.f32 %v15756_v60, %v16766_v56  ;;  %v16768_v35 = vld [vmem:[#allocation15_spill] sm:$0xff]  ;;  %v16769_v56 = vand.u32 4294901760, %v15793_v24  ;;  %v10512_v31 = vand.u32 4294901760, %v10511_v28 }
 0x675   : > { %v15866_v9 = vsub.f32 %v15761_v16, %v16767_v41  ;;  %13412 = vmatpush3.bf16.msra.mxu1 %v16768_v35  ;;  %13374 = vmatprep.subr.bf16.mxu0 %v13373_v62  ;;  %v10386_v61 = vand.u32 4294901760, %v10385_v15  ;;  %v16770_v41 = vand.u32 4294901760, %v15798_v8  ;;  %v16576_v35 = vand.u32 4294901760, %v15854_v18 }
 0x676   : > { %13414 = vmatprep.subr.bf16.mxu1 %v15226_v3  ;;  %v15876_v45 = vsub.f32 %v15793_v24, %v16769_v56  ;;  %v13453_v62 = vpack.c.bf16 %v10498_v6, %v10491_v52  ;;  %v10505_v58 = vand.u32 4294901760, %v10504_v23  ;;  %v10392_v3 = vsub.f32 %v15788_v21, %v16771_v33 }
 0x677   : > { %v15881_v42 = vsub.f32 %v15798_v8, %v16770_v41  ;;  %v16773_v56 = vand.u32 4294901760, %v15803_v5  ;;  %v16774_v41 = vand.u32 4294901760, %v15808_v20  ;;  %v16775_v52 = vand.u32 4294901760, %v15823_v43 }
 0x678   : > { %13376 = vmatpush3.bf16.msra.mxu0 %v16772_v7  ;;  %v16776_v7 = vand.u32 4294901760, %v15831_v44  ;;  %v16777_v33 = vand.u32 4294901760, %v15836_v54  ;;  %v13455_v6 = vpack.c.bf16 %v10386_v61, %v10379_v36  ;;  %v10393_v15 = vand.u32 4294901760, %v10392_v3 }
 0x679   : > { %v10399_v2 = vsub.f32 %v15803_v5, %v16773_v56  ;;  %v10518_v48 = vsub.f32 %v15808_v20, %v16774_v41  ;;  %13416 = vmatpush3.bf16.msra.mxu1 %v15234_v37  ;;  %13378 = vmatprep.subr.bf16.mxu0 %v13377_v10  ;;  %v10525_v23 = vsub.f32 %v15823_v43, %v16775_v52  ;;  %v16778_v10 = vand.u32 4294901760, %v15849_v14  ;;  %v16782_v5 = vld [vmem:[#allocation19_spill] sm:$0xff] }
 0x67a   : > { %v15904_v28 = vsub.f32 %v15831_v44, %v16776_v7  ;;  %v15909_v56 = vsub.f32 %v15836_v54, %v16777_v33  ;;  %13418 = vmatprep.subr.bf16.mxu1 %v15237_v11  ;;  %v15922_v7 = vsub.f32 %v15854_v18, %v16576_v35  ;;  %v16779_v33 = vld [vmem:[#allocation18_spill] sm:$0xff]  ;;  %v13457_v43 = vpack.c.bf16 %v10512_v31, %v10505_v58 }
 0x67b   : > { %v15917_v52 = vsub.f32 %v15849_v14, %v16778_v10  ;;  %v10400_v11 = vand.u32 4294901760, %v10399_v2  ;;  %v16780_v41 = vand.u32 4294901760, %v15861_v47  ;;  %v16781_v20 = vand.u32 4294901760, %v15866_v9 }
 0x67c   : > { %13380 = vmatpush3.bf16.msra.mxu0 %v16779_v33  ;;  %v10519_v35 = vand.u32 4294901760, %v10518_v48  ;;  %v10526_v21 = vand.u32 4294901760, %v10525_v23  ;;  %v10419_v61 = vand.u32 4294901760, %v15904_v28  ;;  %v16783_v2 = vand.u32 4294901760, %v15876_v45  ;;  %v16786_v48 = vld [vmem:[#allocation20_spill] sm:$0xff] }
 0x67d   : > { %v10406_v37 = vsub.f32 %v15861_v47, %v16780_v41  ;;  %v10413_v10 = vsub.f32 %v15866_v9, %v16781_v20  ;;  %13420 = vmatpush3.bf16.msra.mxu1 %v15241_v17  ;;  %13382 = vmatprep.subr.bf16.mxu0 %v16782_v5  ;;  %v16784_v31 = vand.u32 4294901760, %v15881_v42  ;;  %v16785_v5 = vld [vmem:[#allocation25_spill] sm:$0xff]  ;;  %v13459_v23 = vpack.c.bf16 %v10400_v11, %v10393_v15 }
 0x67e   : > { %13454 = vmatprep.subr.bf16.mxu1 %v13453_v62  ;;  %v10532_v58 = vsub.f32 %v15876_v45, %v16783_v2  ;;  %v16787_v41 = vand.u32 4294901760, %v15595_v57  ;;  %v16788_v62 = vand.u32 4294901760, %v15600_v25  ;;  %v10420_v17 = vsub.f32 %v15904_v28, %v10419_v61  ;;  %v16790_v11 = vld [vmem:[#allocation21_spill] sm:$0xff] }
 0x67f   : > { %v10539_v3 = vsub.f32 %v15881_v42, %v16784_v31  ;;  %v10407_v2 = vand.u32 4294901760, %v10406_v37  ;;  %v10414_v36 = vand.u32 4294901760, %v10413_v10  ;;  %v13461_v31 = vpack.c.bf16 %v10526_v21, %v10519_v35 }
 0x680   : > { %10225 = vmatmul.mubr.f32.vlgmr.msra.gmra.mrb[8].mxu1 %v16785_v5  ;;  %13384 = vmatpush3.bf16.msra.mxu0 %v16786_v48  ;;  %v15949_v33 = vpack.c.bf16 %v16788_v62, %v16787_v41  ;;  %v16789_v20 = vand.u32 4294901760, %v15909_v56  ;;  %v10533_v57 = vand.u32 4294901760, %v10532_v58  ;;  %v16791_v37 = vand.u32 4294901760, %v15917_v52 }
 0x681   : > { %13456 = vmatpush3.bf16.msra.mxu1 %v13455_v6  ;;  %10599 = vmatprep.mubr.f32.mxu1 %v15317_v50  ;;  %v10540_v25 = vand.u32 4294901760, %v10539_v3  ;;  %v16792_v10 = vand.u32 4294901760, %v15922_v7  ;;  %v16793_v35 = vand.u32 4294901760, %v15611_v39  ;;  %v16794_v48 = vand.u32 4294901760, %v15645_v32 }
 0x682   : > { %v10427_v15 = vsub.f32 %v15909_v56, %v16789_v20  ;;  %13386 = vmatprep.subr.bf16.mxu0 %v16790_v11  ;;  %13458 = vmatprep.subr.bf16.mxu1 %v13457_v43  ;;  %v10546_v6 = vsub.f32 %v15917_v52, %v16791_v37  ;;  %v16795_v20 = vld [vmem:[#allocation22_spill] sm:$0xff]  ;;  %v13463_v62 = vpack.c.bf16 %v10414_v36, %v10407_v2  ;;  %v16796_v43 = vand.u32 4294901760, %v15659_v0 }
 0x683   : > { %v10553_v21 = vsub.f32 %v15922_v7, %v16792_v10  ;;  %v15969_v41 = vpack.c.bf16 %v16794_v48, %v16793_v35  ;;  %v16797_v58 = vand.u32 4294901760, %v15664_v53  ;;  %v16798_v11 = vand.u32 4294901760, %v15410_v59 }
 0x684   : > { %13388 = vmatpush3.bf16.msra.mxu0 %v16795_v20  ;;  %v16799_v10 = vand.u32 4294901760, %v15415_v46  ;;  %v10421_v32 = vand.u32 4294901760, %v10420_v17  ;;  %v10428_v35 = vand.u32 4294901760, %v10427_v15  ;;  %v16800_v36 = vand.u32 4294901760, %v15436_v4  ;;  %v16804_v15 = vld [vmem:[#allocation30_spill] sm:$0xff] }
 0x685   : > { %v15976_v3 = vpack.c.bf16 %v16797_v58, %v16796_v43  ;;  %v10434_v37 = vsub.f32 %v15410_v59, %v16798_v11  ;;  %13460 = vmatpush3.bf16.msra.mxu1 %v13459_v23  ;;  %13422 = vmatprep.subr.bf16.mxu0 %v15949_v33  ;;  %v16801_v53 = vand.u32 4294901760, %v15441_v40  ;;  %v13465_v48 = vpack.c.bf16 %v10540_v25, %v10533_v57 }
 0x686   : > { %v10441_v39 = vsub.f32 %v15415_v46, %v16799_v10  ;;  %v10560_v0 = vsub.f32 %v15436_v4, %v16800_v36  ;;  %13462 = vmatprep.subr.bf16.mxu1 %v13461_v31  ;;  %v10547_v20 = vand.u32 4294901760, %v10546_v6  ;;  %v10554_v43 = vand.u32 4294901760, %v10553_v21 }
 0x687   : > { %v10567_v2 = vsub.f32 %v15441_v40, %v16801_v53  ;;  %10121 = vmatmul.mubr.f32.vlgmr.msra.gmra.mrb[6].mxu0 %v16785_v5  ;;  %v16802_v23 = vand.u32 4294901760, %v15698_v49  ;;  %v16803_v58 = vand.u32 4294901760, %v15713_v63  ;;  %v10435_v11 = vand.u32 4294901760, %v10434_v37 }
 0x688   : > { %13424 = vmatpush3.bf16.msra.mxu0 %v15969_v41  ;;  %10363 = vmatprep.mubr.f32.mxu0 %v16804_v15  ;;  %v10442_v10 = vand.u32 4294901760, %v10441_v39  ;;  %v16805_v36 = vand.u32 4294901760, %v15474_v29  ;;  %v16806_v57 = vand.u32 4294901760, %v15479_v22  ;;  %v13467_v49 = vpack.c.bf16 %v10428_v35, %v10421_v32 }
 0x689   : > { %v15996_v17 = vpack.c.bf16 %v16803_v58, %v16802_v23  ;;  %13464 = vmatpush3.bf16.msra.mxu1 %v13463_v62  ;;  %13426 = vmatprep.subr.bf16.mxu0 %v15976_v3  ;;  %v16807_v63 = vand.u32 4294901760, %v15718_v19  ;;  %v16808_v6 = vand.u32 4294901760, %v15726_v12  ;;  %v10561_v37 = vand.u32 4294901760, %v10560_v0 }
 0x68a   : > { %v10448_v31 = vsub.f32 %v15474_v29, %v16805_v36  ;;  %v10455_v25 = vsub.f32 %v15479_v22, %v16806_v57  ;;  %v10568_v39 = vand.u32 4294901760, %v10567_v2  ;;  %13466 = vmatprep.subr.bf16.mxu1 %v13465_v48  ;;  %v13469_v53 = vpack.c.bf16 %v10554_v43, %v10547_v20 }
 0x68b   : > { %v16011_v21 = vpack.c.bf16 %v16808_v6, %v16807_v63  ;;  %v16809_v23 = vand.u32 4294901760, %v15510_v51  ;;  %v16810_v15 = vand.u32 4294901760, %v15515_v1  ;;  %v16811_v32 = vand.u32 4294901760, %v15756_v60 }
 0x68c   : > { %v16812_v19 = vand.u32 4294901760, %v15761_v16  ;;  %13428 = vmatpush3.bf16.msra.mxu0 %v15996_v17  ;;  %v13471_v12 = vpack.c.bf16 %v10442_v10, %v10435_v11  ;;  %v16813_v0 = vand.u32 4294901760, %v15793_v24  ;;  %v16814_v2 = vand.u32 4294901760, %v15798_v8 }
 0x68d   : > { %v10574_v58 = vsub.f32 %v15510_v51, %v16809_v23  ;;  %v10581_v62 = vsub.f32 %v15515_v1, %v16810_v15  ;;  %v10449_v20 = vand.u32 4294901760, %v10448_v31  ;;  %v10456_v43 = vand.u32 4294901760, %v10455_v25  ;;  %13468 = vmatpush3.bf16.msra.mxu1 %v13467_v49  ;;  %13430 = vmatprep.subr.bf16.mxu0 %v16011_v21 }
 0x68e   : > { %v16023_v35 = vpack.c.bf16 %v16812_v19, %v16811_v32  ;;  %v16030_v48 = vpack.c.bf16 %v16814_v2, %v16813_v0  ;;  %v13473_v36 = vpack.c.bf16 %v10568_v39, %v10561_v37  ;;  %v16815_v60 = vand.u32 4294901760, %v15532_v38  ;;  %13470 = vmatprep.subr.bf16.mxu1 %v13469_v53 }
 0x68f   : > { %v16816_v57 = vand.u32 4294901760, %v15543_v30  ;;  %v10575_v24 = vand.u32 4294901760, %v10574_v58  ;;  %v10582_v10 = vand.u32 4294901760, %v10581_v62  ;;  %v16817_v8 = vand.u32 4294901760, %v15548_v27 }
 0x690   : > { %v10462_v16 = vsub.f32 %v15532_v38, %v16815_v60  ;;  %v16818_v25 = vand.u32 4294901760, %v15553_v34  ;;  %13432 = vmatpush3.bf16.msra.mxu0 %v16023_v35  ;;  %v16819_v63 = vand.u32 4294901760, %v15831_v44  ;;  %v16820_v6 = vand.u32 4294901760, %v15836_v54 }
 0x691   : > { %v10469_v11 = vsub.f32 %v15543_v30, %v16816_v57  ;;  %v10588_v31 = vsub.f32 %v15548_v27, %v16817_v8  ;;  %v13475_v39 = vpack.c.bf16 %v10456_v43, %v10449_v20  ;;  %v16821_v53 = vand.u32 4294901760, %v15849_v14  ;;  %13472 = vmatpush3.bf16.msra.mxu1 %v13471_v12  ;;  %13434 = vmatprep.subr.bf16.mxu0 %v16030_v48  ;;  %v16827_v20 = vld [vmem:[#allocation33_spill] sm:$0xff]  ;;  %v16829_v57 = vld [vmem:[#allocation34_spill] sm:$0xff]  ;;  %v16831_v8 = vld [vmem:[#allocation35_spill] sm:$0xff] }
 0x692   : > { %v10595_v49 = vsub.f32 %v15553_v34, %v16818_v25  ;;  %v16050_v37 = vpack.c.bf16 %v16820_v6, %v16819_v63  ;;  %v16822_v23 = vand.u32 4294901760, %v15854_v18  ;;  %v10463_v15 = vand.u32 4294901760, %v10462_v16  ;;  %13474 = vmatprep.subr.bf16.mxu1 %v13473_v36  ;;  %v16825_v18 = vld [vmem:[#allocation32_spill] sm:$0xff]  ;;  %v16835_v6 = vld [vmem:[#allocation37_spill] sm:$0xff] }
 0x693   : > { %v10470_v62 = vand.u32 4294901760, %v10469_v11  ;;  %v16823_v32 = vand.u32 4294901760, %v15566_v26  ;;  %v16824_v54 = vand.u32 4294901760, %v15571_v55  ;;  %v13477_v0 = vpack.c.bf16 %v10582_v10, %v10575_v24 }
 0x694   : > { %v16056_v58 = vpack.c.bf16 %v16822_v23, %v16821_v53  ;;  %v10589_v14 = vand.u32 4294901760, %v10588_v31  ;;  %v10596_v2 = vand.u32 4294901760, %v10595_v49  ;;  %13436 = vmatpush3.bf16.msra.mxu0 %v16050_v37  ;;  %v16826_v12 = vand.u32 4294901760, %v16825_v18  ;;  %v16833_v49 = vld [vmem:[#allocation36_spill] sm:$0xff]  ;;  %v16844_v18 = vld [vmem:[#allocation41_spill] sm:$0xff] }
 0x695   : > { %v10476_v44 = vsub.f32 %v15566_v26, %v16823_v32  ;;  %v10483_v19 = vsub.f32 %v15571_v55, %v16824_v54  ;;  %v16828_v43 = vand.u32 4294901760, %v16827_v20  ;;  %13476 = vmatpush3.bf16.msra.mxu1 %v13475_v39  ;;  %v13479_v16 = vpack.c.bf16 %v10470_v62, %v10463_v15  ;;  %v16838_v62 = vld [vmem:[#allocation38_spill] sm:$0xff]  ;;  %v16840_v54 = vld [vmem:[#allocation39_spill] sm:$0xff] }
 0x696   : > { %13438 = vmatprep.subr.bf16.mxu0 %v16056_v58  ;;  %v16830_v11 = vand.u32 4294901760, %v16829_v57  ;;  %v16832_v25 = vand.u32 4294901760, %v16831_v8  ;;  %13478 = vmatprep.subr.bf16.mxu1 %v13477_v0  ;;  %v13481_v31 = vpack.c.bf16 %v10596_v2, %v10589_v14  ;;  %v16834_v63 = vand.u32 4294901760, %v16833_v49  ;;  %v16842_v0 = vld [vmem:[#allocation40_spill] sm:$0xff] }
 0x697   : > { %v16070_v60 = vpack.c.bf16 %v16828_v43, %v16826_v12  ;;  %v10477_v24 = vand.u32 4294901760, %v10476_v44  ;;  %v10484_v10 = vand.u32 4294901760, %v10483_v19  ;;  %v16836_v53 = vand.u32 4294901760, %v16835_v6  ;;  %v16846_v12 = vld [vmem:[#allocation42_spill] sm:$0xff] }
 0x698   : > { %v16077_v36 = vpack.c.bf16 %v16832_v25, %v16830_v11  ;;  %v16837_v15 = vand.u32 4294901760, %v15422_v13  ;;  %v16839_v32 = vand.u32 4294901760, %v16838_v62  ;;  %v16841_v19 = vand.u32 4294901760, %v16840_v54  ;;  %v16850_v11 = vld [vmem:[#allocation44_spill] sm:$0xff]  ;;  %v16856_v6 = vld [vmem:[#allocation54_spill] sm:$0xff]  ;;  %v16860_v54 = vld [vmem:[#allocation27_spill] sm:$0xff] }
 0x699   : > { %13440 = vmatpush3.bf16.msra.mxu0 %v16070_v60  ;;  %v16084_v39 = vpack.c.bf16 %v16836_v53, %v16834_v63  ;;  %13480 = vmatpush3.bf16.msra.mxu1 %v13479_v16  ;;  %v13483_v23 = vpack.c.bf16 %v10484_v10, %v10477_v24  ;;  %v16843_v14 = vand.u32 4294901760, %v16842_v0  ;;  %v16845_v13 = vand.u32 4294901760, %v16844_v18  ;;  %v16848_v16 = vld [vmem:[#allocation43_spill] sm:$0xff]  ;;  %v16852_v24 = vld [vmem:[#allocation29_spill] sm:$0xff]  ;;  %v16853_v10 = vld [vmem:[#allocation16_spill] sm:$0xff] }
 0x69a   : > { %13442 = vmatprep.subr.bf16.mxu0 %v16077_v36  ;;  %v16091_v44 = vpack.c.bf16 %v16839_v32, %v16837_v15  ;;  %13482 = vmatprep.subr.bf16.mxu1 %v13481_v31  ;;  %v16847_v20 = vand.u32 4294901760, %v16846_v12  ;;  %v16849_v57 = vand.u32 4294901760, %v16848_v16  ;;  %v16851_v8 = vand.u32 4294901760, %v16850_v11  ;;  %v16854_v31 = vld [vmem:[#allocation52_spill] sm:$0xff]  ;;  %v16855_v63 = vld [vmem:[#allocation53_spill] sm:$0xff]  ;;  %v16859_v32 = vld [vmem:[#allocation31_spill] sm:$0xff] }
 0x69b   : > { %v16098_v2 = vpack.c.bf16 %v16843_v14, %v16841_v19  ;;  %v13485_v49 = vpack.c.bf16 %v16854_v31, %v16853_v10  ;;  %v13487_v53 = vpack.c.bf16 %v16856_v6, %v16855_v63  ;;  %v16858_v15 = vld [vmem:[#allocation56_spill] sm:$0xff]  ;;  %v16861_v19 = vld [vmem:[#allocation11_spill] sm:$0xff]  ;;  %v16862_v0 = vld [vmem:[#allocation6_spill] sm:$0xff]  ;;  %v13497_v16 = vpack.c.bf16 %v15881_v42, %v15876_v45 }
 0x69c   : > { %v16106_v43 = vpack.c.bf16 %v16847_v20, %v16845_v13  ;;  %v16114_v25 = vpack.c.bf16 %v16851_v8, %v16849_v57  ;;  %v13491_v14 = vpack.c.bf16 %v16862_v0, %v16861_v19  ;;  %v16863_v18 = vld [vmem:[#allocation7_spill] sm:$0xff]  ;;  %v16864_v13 = vld [vmem:[#allocation12_spill] sm:$0xff]  ;;  %v13495_v20 = vpack.c.bf16 %v15866_v9, %v15861_v47 }
 0x69d   : > { %13444 = vmatpush3.bf16.msra.mxu0 %v16084_v39  ;;  %13484 = vmatpush3.bf16.msra.mxu1 %v13483_v23  ;;  %v16857_v23 = vld [vmem:[#allocation55_spill] sm:$0xff]  ;;  %v13493_v12 = vpack.c.bf16 %v16864_v13, %v16863_v18  ;;  %v13499_v57 = vpack.c.bf16 %v15909_v56, %v15904_v28  ;;  %v13501_v11 = vpack.c.bf16 %v15922_v7, %v15917_v52 }
 0x69e   : > { %13446 = vmatprep.subr.bf16.mxu0 %v16091_v44  ;;  %13518 = vmatprep.subr.bf16.mxu1 %v15949_v33  ;;  %v13489_v62 = vpack.c.bf16 %v16858_v15, %v16857_v23  ;;  %v13503_v8 = vpack.c.bf16 %v15415_v46, %v15410_v59  ;;  %v13511_v59 = vpack.c.bf16 %v15543_v30, %v15532_v38  ;;  %v16866_v38 = vand.u32 4294901760, %v16853_v10 }
 0x69f   : > { %v16867_v46 = vand.u32 4294901760, %v16854_v31  ;;  %v16870_v30 = vand.u32 4294901760, %v16857_v23  ;;  %v16876_v10 = vand.u32 4294901760, %v16864_v13 }
 0x6a0   : > { %10601 = vmatmul.mubr.f32.vlgmr.msra.gmra.mrb[10].mxu1 %v16785_v5 }
 0x6a1   : > { %13448 = vmatpush3.bf16.msra.mxu0 %v16098_v2  ;;  %13520 = vmatpush3.bf16.msra.mxu1 %v15969_v41 }
 0x6a2   : > { %10843 = vmatprep.mubr.f32.mxu1 %v16852_v24  ;;  %13450 = vmatprep.subr.bf16.mxu0 %v16106_v43  ;;  %v13505_v24 = vpack.c.bf16 %v15441_v40, %v15436_v4  ;;  %v16865_v4 = vld [vmem:[#allocation28_spill] sm:$0xff]  ;;  %v13549_v40 = vpack.c.bf16 %v16867_v46, %v16866_v38 }
 0x6a3   : > { %13522 = vmatprep.subr.bf16.mxu1 %v15976_v3 }
 0x6a5   : > { %13452 = vmatpush3.bf16.msra.mxu0 %v16114_v25  ;;  %13524 = vmatpush3.bf16.msra.mxu1 %v15996_v17 }
 0x6a6   : > { %13486 = vmatprep.subr.bf16.mxu0 %v13485_v49  ;;  %13526 = vmatprep.subr.bf16.mxu1 %v16011_v21  ;;  %v13507_v49 = vpack.c.bf16 %v15479_v22, %v15474_v29  ;;  %v13513_v22 = vpack.c.bf16 %v15553_v34, %v15548_v27  ;;  %v13515_v29 = vpack.c.bf16 %v15571_v55, %v15566_v26  ;;  %v16871_v34 = vand.u32 4294901760, %v16858_v15  ;;  %v16872_v55 = vld [vmem:[#allocation26_spill] sm:$0xff] }
 0x6a8   : > { %10369 = vmatmul.mubr.f32.vlgmr.msra.gmra.mrb[8].mxu0 %v16859_v32  ;;  %v13553_v26 = vpack.c.bf16 %v16871_v34, %v16870_v30 }
 0x6a9   : > { %13488 = vmatpush3.bf16.msra.mxu0 %v13487_v53  ;;  %10736 = vmatprep.mubr.f32.mxu0 %v16860_v54  ;;  %v13509_v53 = vpack.c.bf16 %v15515_v1, %v15510_v51  ;;  %v16868_v1 = vand.u32 4294901760, %v16855_v63  ;;  %v16869_v51 = vand.u32 4294901760, %v16856_v6  ;;  %v16879_v6 = vand.u32 4294901760, %v15876_v45  ;;  %v16890_v54 = vld [vmem:[#allocation49_spill] sm:$0xff] }
 0x6aa   : > { %13528 = vmatpush3.bf16.msra.mxu1 %v16023_v35  ;;  %13490 = vmatprep.subr.bf16.mxu0 %v13489_v62  ;;  %v16888_v62 = vld [vmem:[#allocation47_spill] sm:$0xff] }
 0x6ab   : > { %13530 = vmatprep.subr.bf16.mxu1 %v16030_v48  ;;  %v13551_v27 = vpack.c.bf16 %v16869_v51, %v16868_v1 }
 0x6ad   : > { %13492 = vmatpush3.bf16.msra.mxu0 %v13491_v14 }
 0x6ae   : > { %13532 = vmatpush3.bf16.msra.mxu1 %v16050_v37  ;;  %13494 = vmatprep.subr.bf16.mxu0 %v13493_v12 }
 0x6af   : > { %13534 = vmatprep.subr.bf16.mxu1 %v16056_v58 }
 0x6b1   : > { %13496 = vmatpush3.bf16.msra.mxu0 %v13495_v20 }
 0x6b2   : > { %13536 = vmatpush3.bf16.msra.mxu1 %v16070_v60  ;;  %13498 = vmatprep.subr.bf16.mxu0 %v13497_v16 }
 0x6b3   : > { %13538 = vmatprep.subr.bf16.mxu1 %v16077_v36 }
 0x6b5   : > { %13500 = vmatpush3.bf16.msra.mxu0 %v13499_v57 }
 0x6b6   : > { %13540 = vmatpush3.bf16.msra.mxu1 %v16084_v39  ;;  %13502 = vmatprep.subr.bf16.mxu0 %v13501_v11 }
 0x6b7   : > { %13542 = vmatprep.subr.bf16.mxu1 %v16091_v44 }
 0x6b9   : > { %13504 = vmatpush3.bf16.msra.mxu0 %v13503_v8 }
 0x6ba   : > { %13544 = vmatpush3.bf16.msra.mxu1 %v16098_v2  ;;  %13506 = vmatprep.subr.bf16.mxu0 %v13505_v24  ;;  %v11627_v24 = vld [vmem:[%s16455_s12 + $0x8] sm:$0xff] }
 0x6bb   : > { %13546 = vmatprep.subr.bf16.mxu1 %v16106_v43 }
 0x6bd   : > { %13508 = vmatpush3.bf16.msra.mxu0 %v13507_v49  ;;  %v11629_v49 = vld [vmem:[%s16455_s12 + $0x18] sm:$0xff] }
 0x6be   : > { %13548 = vmatpush3.bf16.msra.mxu1 %v16114_v25  ;;  %13510 = vmatprep.subr.bf16.mxu0 %v13509_v53  ;;  %v11626_v53 = vld [vmem:[%s16455_s12] sm:$0xff] }
 0x6bf   : > { %13582 = vmatprep.subr.bf16.mxu1 %v15949_v33  ;;  %v16873_v33 = vand.u32 4294901760, %v16861_v19  ;;  %v16891_v19 = vld [vmem:[#allocation50_spill] sm:$0xff] }
 0x6c1   : > { %10847 = vmatmul.mubr.f32.vlgmr.msra.gmra.mrb[12].mxu1 %v16865_v4  ;;  %13512 = vmatpush3.bf16.msra.mxu0 %v13511_v59  ;;  %v11633_v59 = vand.u32 4294901760, %v11627_v24  ;;  %v11628_v4 = vld [vmem:[%s16455_s12 + $0x10] sm:$0xff] }
 0x6c2   : > { %13584 = vmatpush3.bf16.msra.mxu1 %v15969_v41  ;;  %11117 = vmatprep.mubr.f32.mxu1 %v15317_v50  ;;  %v16874_v41 = vand.u32 4294901760, %v16862_v0  ;;  %v11639_v38 = vand.u32 4294901760, %v11628_v4 }
 0x6c3   : > { %13514 = vmatprep.subr.bf16.mxu0 %v13513_v22  ;;  %13586 = vmatprep.subr.bf16.mxu1 %v15976_v3  ;;  %v11637_v22 = vand.u32 4294901760, %v11629_v49 }
 0x6c4   : > { %v13555_v3 = vpack.c.bf16 %v16874_v41, %v16873_v33  ;;  %v16280_v30 = vsub.f32 %v11628_v4, %v11639_v38 }
 0x6c5   : > { %13516 = vmatpush3.bf16.msra.mxu0 %v13515_v29  ;;  %v11635_v29 = vand.u32 4294901760, %v11626_v53  ;;  %v16270_v46 = vpack.c.bf16 %v11637_v22, %v11633_v59  ;;  %v16274_v1 = vsub.f32 %v11629_v49, %v11637_v22 }
 0x6c6   : > { %13588 = vmatpush3.bf16.msra.mxu1 %v15996_v17  ;;  %13550 = vmatprep.subr.bf16.mxu0 %v13549_v40  ;;  %v16875_v17 = vand.u32 4294901760, %v16863_v18  ;;  %v16272_v40 = vsub.f32 %v11627_v24, %v11633_v59  ;;  %v11733_v33 = vand.u32 4294901760, %v16280_v30 }
 0x6c7   : > { %13590 = vmatprep.subr.bf16.mxu1 %v16011_v21  ;;  %v16877_v21 = vand.u32 4294901760, %v15861_v47  ;;  %v16276_v51 = vsub.f32 %v11626_v53, %v11635_v29 }
 0x6c8   : > { %10739 = vmatmul.mubr.f32.vlgmr.msra.gmra.mrb[10].mxu0 %v16872_v55  ;;  %v13557_v31 = vpack.c.bf16 %v16876_v10, %v16875_v17  ;;  %v11715_v34 = vand.u32 4294901760, %v16272_v40  ;;  %v11734_v10 = vsub.f32 %v16280_v30, %v11733_v33 }
 0x6c9   : > { %13552 = vmatpush3.bf16.msra.mxu0 %v13551_v27  ;;  %11013 = vmatprep.mubr.f32.mxu0 %v15317_v50  ;;  %v16878_v50 = vand.u32 4294901760, %v15866_v9  ;;  %v16882_v9 = vand.u32 4294901760, %v15917_v52  ;;  %v16278_v27 = vpack.c.bf16 %v11639_v38, %v11635_v29  ;;  %v11721_v55 = vand.u32 4294901760, %v16276_v51 }
 0x6ca   : > { %13592 = vmatpush3.bf16.msra.mxu1 %v16023_v35  ;;  %13554 = vmatprep.subr.bf16.mxu0 %v13553_v26  ;;  %v16880_v35 = vand.u32 4294901760, %v15881_v42  ;;  %v11155_v42 = vld [vmem:[%s16450_s7] sm:$0xf]  ;;  %v11727_v26 = vand.u32 4294901760, %v16274_v1  ;;  %v11716_v41 = vsub.f32 %v16272_v40, %v11715_v34 }
 0x6cb   : > { %13594 = vmatprep.subr.bf16.mxu1 %v16030_v48  ;;  %v13559_v63 = vpack.c.bf16 %v16878_v50, %v16877_v21  ;;  %v16881_v48 = vand.u32 4294901760, %v15909_v56  ;;  %v11157_v28 = vsel %vm16884_vm10, %v11155_v42, 0  ;;  %v11722_v17 = vsub.f32 %v16276_v51, %v11721_v55 }
 0x6cc   : > { %v13561_v23 = vpack.c.bf16 %v16880_v35, %v16879_v6  ;;  %v11128_v15 = vpop.xlane.xlu1 %11127  ;;  %v11228_v52 = vand.u32 4294901760, %v11157_v28 }
 0x6cd   : > { %13556 = vmatpush3.bf16.msra.mxu0 %v13555_v3  ;;  %v13563_v47 = vpack.c.bf16 %v16881_v48, %v10419_v61  ;;  %v16887_v61 = vld [vmem:[#allocation46_spill] sm:$0xff]  ;;  %v11728_v3 = vsub.f32 %v16274_v1, %v11727_v26  ;;  %v11723_v50 = vand.u32 4294901760, %v11722_v17 }
 0x6ce   : > { %13596 = vmatpush3.bf16.msra.mxu1 %v16050_v37  ;;  %13558 = vmatprep.subr.bf16.mxu0 %v13557_v31  ;;  %v16883_v37 = vand.u32 4294901760, %v15922_v7  ;;  %v16886_v7 = vld [vmem:[#allocation45_spill] sm:$0xff]  ;;  %v11717_v31 = vand.u32 4294901760, %v11716_v41 }
 0x6cf   : > { %13598 = vmatprep.subr.bf16.mxu1 %v16056_v58  ;;  %v11130_v58 = vmul.f32 0.00390625, %v11128_v15  ;;  %v11729_v21 = vand.u32 4294901760, %v11728_v3  ;;  %v13623_v15 = vpack.c.bf16 %v16280_v30, %v16276_v51 }
 0x6d0   : > { %v13565_v45 = vpack.c.bf16 %v16883_v37, %v16882_v9 }
 0x6d1   : > { %13560 = vmatpush3.bf16.msra.mxu0 %v13559_v63  ;;  %v11160_v56 = vsel %vm16885_vm12, %v11130_v58, 0  ;;  %v11735_v63 = vand.u32 4294901760, %v11734_v10  ;;  %v13617_v6 = vpack.c.bf16 %v11729_v21, %v11717_v31 }
 0x6d2   : > { %13600 = vmatpush3.bf16.msra.mxu1 %v16070_v60  ;;  %13562 = vmatprep.subr.bf16.mxu0 %v13561_v23  ;;  %v11163_v60 = vand.u32 4294901760, %v11160_v56  ;;  %v13621_v23 = vpack.c.bf16 %v16274_v1, %v16272_v40 }
 0x6d3   : > { %13602 = vmatprep.subr.bf16.mxu1 %v16077_v36  ;;  %v11229_v36 = vsub.f32 %v11157_v28, %v11228_v52  ;;  %v16292_v35 = vpack.c.bf16 %v11735_v63, %v11723_v50 }
 0x6d5   : > { %13564 = vmatpush3.bf16.msra.mxu0 %v13563_v47  ;;  %v11230_v32 = vand.u32 4294901760, %v11229_v36 }
 0x6d6   : > { %13604 = vmatpush3.bf16.msra.mxu1 %v16084_v39  ;;  %13566 = vmatprep.subr.bf16.mxu0 %v13565_v45  ;;  %v16889_v39 = vld [vmem:[#allocation48_spill] sm:$0xff] }
 0x6d7   : > { %13606 = vmatprep.subr.bf16.mxu1 %v16091_v44  ;;  %v11240_v44 = vsub.f32 %v11160_v56, %v11163_v60  ;;  %v11231_v14 = vsub.f32 %v11229_v36, %v11230_v32  ;;  %v16298_v56 = vpack.c.bf16 %v11727_v26, %v11715_v34 }
 0x6d9   : > { %13568 = vmatpush3.bf16.msra.mxu0 %v16886_v7  ;;  %v11241_v0 = vand.u32 4294901760, %v11240_v44 }
 0x6da   : > { %13608 = vmatpush3.bf16.msra.mxu1 %v16098_v2  ;;  %13570 = vmatprep.subr.bf16.mxu0 %v16887_v61  ;;  %v16892_v2 = vmov 0.0  }
 0x6db   : > { %13610 = vmatprep.subr.bf16.mxu1 %v16106_v43  ;;  %v16893_v43 = vld [vmem:[#allocation51_spill] sm:$0xff]  ;;  %v11242_v18 = vsub.f32 %v11240_v44, %v11241_v0 }
 0x6dd   : > { %13572 = vmatpush3.bf16.msra.mxu0 %v16888_v62  ;;  %v11243_v13 = vand.u32 4294901760, %v11242_v18 }
 0x6de   : > { %13612 = vmatpush3.bf16.msra.mxu1 %v16114_v25  ;;  %13574 = vmatprep.subr.bf16.mxu0 %v16889_v39  ;;  %v11232_v25 = vand.u32 4294901760, %v11231_v14  ;;  %v12130_v14 = vld [vmem:[%s16456_s13] sm:$0xff] }
 0x6df   : > { %13614 = vmatprep.subr.bf16.mxu1 %v16270_v46 }
 0x6e1   : > { %11119 = vmatmul.mubr.f32.vlgmr.msra.gmra.mrb[14].mxu1 %v16785_v5  ;;  %13576 = vmatpush3.bf16.msra.mxu0 %v16890_v54 }
 0x6e2   : > { %13578 = vmatprep.subr.bf16.mxu0 %v16891_v19  ;;  %11701 = vmatprep.mubr.f32.mxu1 %v16892_v2  ;;  %v12131_v19 = vld [vmem:[%s16456_s13 + $0x8] sm:$0xff] }
 0x6e3   : > { %13616 = vmatpush1.bf16.msra.mxu1 %v16278_v27  ;;  %v12137_v18 = vand.u32 4294901760, %v12131_v19 }
 0x6e4   : > { %13618 = vmatprep.subr.bf16.mxu1 %v13617_v6 }
 0x6e5   : > { %13580 = vmatpush3.bf16.msra.mxu0 %v16893_v43 }
 0x6e6   : > { %13199 = vmatprep.subr.mxu0 %v16892_v2 }
 0x6e8   : > { %11015 = vmatmul.mubr.f32.vlgmr.msra.gmra.mrb[12].mxu0 %v16785_v5 }
 0x6e9   : > { %13200 = vmatpush3.msra.mxu0 %v11163_v60  ;;  %13201 = vmatprep.mubr.msk.f32.mxu0 %vm14071_vm13, %v16892_v2 }
 0x6ea   : > { %13204 = vmatprep.subr.mxu0 %v16892_v2 }
 0x6ec   : > { %13202 = vmatmul.mubr.f32.vlgmr.msra.gmra.mrb[14].mxu0 %v11232_v25 }
 0x6ed   : > { %13205 = vmatpush3.msra.mxu0 %v11243_v13  ;;  %13206 = vmatprep.mubr.msk.f32.mxu0 %vm14071_vm13, %v16892_v2  ;;  %v12132_v13 = vld [vmem:[%s16456_s13 + $0x10] sm:$0xff] }
 0x6ee   : > { %13209 = vmatprep.subr.mxu0 %v16892_v2 }
 0x6f4   : > { %13207 = vmatmul.mubr.f32.vlgmr.msra.gmra.mrb[14].mxu0 %v11228_v52 }
 0x6f5   : > { %13210 = vmatpush3.msra.mxu0 %v11240_v44  ;;  %13211 = vmatprep.mubr.msk.f32.mxu0 %vm14071_vm13, %v16892_v2 }
 0x6f6   : > { %13214 = vmatprep.subr.mxu0 %v16892_v2 }
 0x6fc   : > { %13212 = vmatmul.mubr.f32.vlgmr.msra.gmra.mrb[14].mxu0 %v11229_v36 }
 0x6fd   : > { %13215 = vmatpush3.msra.mxu0 %v11163_v60  ;;  %13216 = vmatprep.mubr.msk.f32.mxu0 %vm14071_vm13, %v16892_v2 }
 0x6fe   : > { %13219 = vmatprep.subr.mxu0 %v16892_v2 }
 0x704   : > { %13217 = vmatmul.mubr.f32.vlgmr.msra.gmra.mrb[14].mxu0 %v11230_v32 }
 0x705   : > { %13220 = vmatpush3.msra.mxu0 %v11241_v0  ;;  %13221 = vmatprep.mubr.msk.f32.mxu0 %vm14071_vm13, %v16892_v2  ;;  %v12133_v0 = vld [vmem:[%s16456_s13 + $0x18] sm:$0xff] }
 0x706   : > { %13224 = vmatprep.subr.mxu0 %v16892_v2  ;;  %v12141_v25 = vand.u32 4294901760, %v12133_v0 }
 0x708   : > { %v16327_v41 = vsub.f32 %v12133_v0, %v12141_v25 }
 0x70a   : > { %v12231_v17 = vand.u32 4294901760, %v16327_v41 }
 0x70c   : > { %13222 = vmatmul.mubr.f32.vlgmr.msra.gmra.mrb[14].mxu0 %v11228_v52  ;;  %v12232_v50 = vsub.f32 %v16327_v41, %v12231_v17 }
 0x70d   : > { %13225 = vmatpush3.msra.mxu0 %v11163_v60  ;;  %13226 = vmatprep.mubr.msk.f32.mxu0 %vm14071_vm13, %v16892_v2 }
 0x712   : > { %v12834_v5 = vpop.f32.mrb[4].mxu1 }
 0x713   : > { %v12835_v12 = vpop.f32.mrb[5].mxu1 }
 0x714   : > { %13227 = vmatmul.mubr.f32.vlgmr.msra.gmra.mrb[14].mxu0 %v11228_v52  ;;  %v12836_v20 = vadd.f32 %v12835_v12, %v12834_v5  ;;  %v16300_v52 = vpack.c.bf16 %v11733_v33, %v11721_v55  ;;  %v12139_v5 = vand.u32 4294901760, %v12130_v14  ;;  %v16325_v33 = vsub.f32 %v12131_v19, %v12137_v18 }
 0x715   : > { %12205 = vmatprep.mubr.f32.mxu0 %v16892_v2 }
 0x716   : > { %v12219_v3 = vand.u32 4294901760, %v16325_v33 }
 0x718   : > { %v12220_v21 = vsub.f32 %v16325_v33, %v12219_v3 }
 0x71a   : > { %v12799_v16 = vpop.f32.mrb[2].mxu0 }
 0x71b   : > { %v12800_v57 = vpop.f32.mrb[3].mxu0 }
 0x71c   : > { %v12801_v11 = vadd.f32 %v12800_v57, %v12799_v16  ;;  %v16314_v16 = vpack.c.bf16 %v12141_v25, %v12137_v18  ;;  %v16316_v57 = vsub.f32 %v12130_v14, %v12139_v5  ;;  %v16344_v14 = vpack.c.bf16 %v12231_v17, %v12219_v3 }
 0x71e   : > { %v9709_v8 = vadd.f32 %v12836_v20, %v12801_v11  ;;  %v12143_v20 = vand.u32 4294901760, %v12132_v13  ;;  %13638 = vmatprep.subr.bf16.mxu0 %v16314_v16  ;;  %v12225_v10 = vand.u32 4294901760, %v16316_v57 }
 0x720   : > { %v16318_v11 = vpack.c.bf16 %v12143_v20, %v12139_v5  ;;  %v12226_v63 = vsub.f32 %v16316_v57, %v12225_v10 }
 0x722   : > { %13640 = vmatpush1.bf16.msra.mxu0 %v16318_v11 }
 0x732   : > { %v12904_v48 = vpop.f32.mrb[6].mxu1 }
 0x733   : > { %v12905_v47 = vpop.f32.mrb[7].mxu1 }
 0x734   : > { %v12906_v9 = vadd.f32 %v12905_v47, %v12904_v48  ;;  %v12221_v48 = vand.u32 4294901760, %v12220_v21  ;;  %v12233_v47 = vand.u32 4294901760, %v12232_v50 }
 0x73a   : > { %v12869_v37 = vpop.f32.mrb[4].mxu0 }
 0x73b   : > { %v12870_v45 = vpop.f32.mrb[5].mxu0 }
 0x73c   : > { %v12871_v42 = vadd.f32 %v12870_v45, %v12869_v37  ;;  %v13641_v45 = vpack.c.bf16 %v12233_v47, %v12221_v48 }
 0x73e   : > { %v9847_v58 = vadd.f32 %v12871_v42, %v9709_v8  ;;  %v16320_v8 = vsub.f32 %v12132_v13, %v12143_v20  ;;  %13642 = vmatprep.subr.bf16.mxu0 %v13641_v45 }
 0x740   : > { %v9955_v28 = vadd.f32 %v12906_v9, %v9847_v58  ;;  %v12237_v31 = vand.u32 4294901760, %v16320_v8  ;;  %v12227_v9 = vand.u32 4294901760, %v12226_v63 }
 0x742   : > { %v12238_v6 = vsub.f32 %v16320_v8, %v12237_v31 }
 0x744   : > { %v12239_v37 = vand.u32 4294901760, %v12238_v6 }
 0x746   : > { %v16337_v42 = vpack.c.bf16 %v12239_v37, %v12227_v9 }
 0x753   : > { %v12974_v7 = vpop.f32.mrb[8].mxu1 }
 0x754   : > { %v12975_v61 = vpop.f32.mrb[9].mxu1 }
 0x755   : > { %v12976_v60 = vadd.f32 %v12975_v61, %v12974_v7  ;;  %v13645_v7 = vpack.c.bf16 %v16327_v41, %v16325_v33  ;;  %v13647_v61 = vpack.c.bf16 %v16320_v8, %v16316_v57  ;;  %v11608_v57 = vld [vmem:[%s16451_s8] sm:$0xf] }
 0x756   : > { %v11610_v33 = vld [vmem:[%s16452_s9] sm:$0xf] }
 0x75a   : > { %v12939_v36 = vpop.f32.mrb[6].mxu0 }
 0x75b   : > { %v12940_v62 = vpop.f32.mrb[7].mxu0 }
 0x75c   : > { %v12941_v39 = vadd.f32 %v12940_v62, %v12939_v36 }
 0x75e   : > { %v10123_v44 = vadd.f32 %v12941_v39, %v9955_v28 }
 0x760   : > { %v10227_v32 = vadd.f32 %v12976_v60, %v10123_v44 }
 0x762   : > { %v12754_v54 = vmul.f32 -1.442695, %v10227_v32 }
 0x764   : > { %13972 = vpow2.f32 %v12754_v54 }
 0x76e   : > { %v13973_v43 = vpop.eup %13972 }
 0x76f   : > { %v11134_v12 = vadd.f32 1.0, %v13973_v43  ;;  %v16346_v43 = vpack.c.bf16 %v12237_v31, %v12225_v10 }
 0x771   : > { %13974 = vrcp.f32 %v11134_v12 }
 0x773   : > { %v13044_v24 = vpop.f32.mrb[10].mxu1 }
 0x774   : > { %v13045_v49 = vpop.f32.mrb[11].mxu1 }
 0x775   : > { %v13046_v53 = vadd.f32 %v13045_v49, %v13044_v24 }
 0x77b   : > { %v13009_v59 = vpop.f32.mrb[8].mxu0  ;;  %v13975_v22 = vpop.eup %13974 }
 0x77c   : > { %v13010_v4 = vpop.f32.mrb[9].mxu0  ;;  %v11143_v29 = vmul.f32 %v13975_v22, %v10227_v32  ;;  %v11146_v34 = vsel %vm11145_vm14, %v13975_v22, 0.0 }
 0x77d   : > { %v13011_v38 = vadd.f32 %v13010_v4, %v13009_v59  ;;  %11147 = vadd.xlane.f32.xlu0 %v11146_v34 }
 0x77e   : > { %v12757_v26 = vmul.f32 -1.442695, %v11143_v29 }
 0x77f   : > { %v10603_v55 = vadd.f32 %v13046_v53, %v13011_v38 }
 0x780   : > { %13976 = vpow2.f32 %v12757_v26 }
 0x78a   : > { %v13977_v58 = vpop.eup %13976 }
 0x78b   : > { %v11623_v28 = vadd.f32 1.0, %v13977_v58 }
 0x78d   : > { %13978 = vrcp.f32 %v11623_v28 }
 0x794   : > { %v13114_v60 = vpop.f32.mrb[12].mxu1 }
 0x795   : > { %v13115_v36 = vpop.f32.mrb[13].mxu1 }
 0x796   : > { %v13116_v62 = vadd.f32 %v13115_v36, %v13114_v60  ;;  %v16895_v36 = vld [vmem:[#allocation24_spill] sm:$0xff] }
 0x797   : > { %v13979_v39 = vpop.eup %13978 }
 0x798   : > { %v11631_v44 = vsel %vm520_vm1, %v13979_v39, 0 }
 0x799   : > { %v11702_v32 = vand.u32 4294901760, %v11631_v44 }
 0x79b   : > { %v13079_v54 = vpop.f32.mrb[10].mxu0  ;;  %v11703_v0 = vsub.f32 %v11631_v44, %v11702_v32 }
 0x79c   : > { %v13080_v19 = vpop.f32.mrb[11].mxu0 }
 0x79d   : > { %v13081_v18 = vadd.f32 %v13080_v19, %v13079_v54  ;;  %v11704_v25 = vand.u32 4294901760, %v11703_v0 }
 0x79f   : > { %v10741_v13 = vadd.f32 %v13081_v18, %v10603_v55  ;;  %v11705_v5 = vsub.f32 %v11703_v0, %v11704_v25 }
 0x7a1   : > { %v10849_v12 = vadd.f32 %v13116_v62, %v10741_v13  ;;  %v11706_v20 = vand.u32 4294901760, %v11705_v5 }
 0x7a3   : > { %11707 = vmatmul.mubr.f32.vlgmr.msra.gmra.mrb[16].mxu1 %v11706_v20 }
 0x7a4   : > { %13620 = vmatpush1.bf16.msra.mxu1 %v16292_v35  ;;  %11797 = vmatprep.mubr.f32.mxu1 %v16892_v2 }
 0x7a5   : > { %13622 = vmatprep.subr.bf16.mxu1 %v13621_v23 }
 0x7ab   : > { %11799 = vmatmul.mubr.f32.vlgmr.msra.gmra.mrb[16].mxu1 %v11702_v32 }
 0x7ac   : > { %13624 = vmatpush1.bf16.msra.mxu1 %v13623_v15  ;;  %11877 = vmatprep.mubr.f32.mxu1 %v16892_v2 }
 0x7ad   : > { %13626 = vmatprep.subr.bf16.mxu1 %v16270_v46 }
 0x7b3   : > { %11880 = vmatmul.mubr.f32.vlgmr.msra.gmra.mrb[16].mxu1 %v11703_v0 }
 0x7b4   : > { %v13184_v24 = vpop.f32.mrb[14].mxu1  ;;  %13628 = vmatpush1.bf16.msra.mxu1 %v16278_v27  ;;  %11954 = vmatprep.mubr.f32.mxu1 %v16892_v2 }
 0x7b5   : > { %v13185_v49 = vpop.f32.mrb[15].mxu1  ;;  %13630 = vmatprep.subr.bf16.mxu1 %v16298_v56 }
 0x7b6   : > { %v13186_v35 = vadd.f32 %v13185_v49, %v13184_v24 }
 0x7bb   : > { %v13149_v40 = vpop.f32.mrb[12].mxu0  ;;  %11958 = vmatmul.mubr.f32.vlgmr.msra.gmra.mrb[16].mxu1 %v11704_v25  ;;  %v16896_v25 = vld [vmem:[#allocation5_spill] sm:$0xff] }
 0x7bc   : > { %v13150_v1 = vpop.f32.mrb[13].mxu0  ;;  %13632 = vmatpush1.bf16.msra.mxu1 %v16300_v52  ;;  %12040 = vmatprep.mubr.f32.mxu1 %v16892_v2 }
 0x7bd   : > { %v13151_v23 = vadd.f32 %v13150_v1, %v13149_v40  ;;  %13634 = vmatprep.subr.bf16.mxu1 %v16270_v46 }
 0x7bf   : > { %v11017_v51 = vadd.f32 %v13151_v23, %v10849_v12 }
 0x7c1   : > { %v11121_v30 = vadd.f32 %v13186_v35, %v11017_v51 }
 0x7c3   : > { %v12755_v15 = vmul.f32 -1.442695, %v11121_v30  ;;  %12042 = vmatmul.mubr.f32.vlgmr.msra.gmra.mrb[16].mxu1 %v11702_v32 }
 0x7c4   : > { %13636 = vmatpush1.bf16.msra.mxu1 %v16278_v27  ;;  %12116 = vmatprep.mubr.f32.mxu1 %v16892_v2 }
 0x7c5   : > { %13980 = vpow2.f32 %v12755_v15 }
 0x7cb   : > { %12118 = vmatmul.mubr.f32.vlgmr.msra.gmra.mrb[16].mxu1 %v11702_v32 }
 0x7cf   : > { %v13981_v56 = vpop.eup %13980 }
 0x7d0   : > { %v11140_v53 = vadd.f32 1.0, %v13981_v56 }
 0x7d2   : > { %13982 = vrcp.f32 %v11140_v53 }
 0x7dc   : > { %v13983_v59 = vpop.eup %13982 }
 0x7dd   : > { %v11144_v22 = vmul.f32 %v13983_v59, %v11121_v30  ;;  %v11149_v52 = vsel %vm11145_vm14, %v13983_v59, 0.0 }
 0x7de   : > { %11150 = vadd.xlane.f32.xlu0 %v11149_v52 }
 0x7df   : > { %v12758_v4 = vmul.f32 -1.442695, %v11144_v22 }
 0x7e1   : > { %13984 = vpow2.f32 %v12758_v4 }
 0x7e7   : > { %v11604_v46 = vpop.f32.mrb[14].mxu0 }
 0x7e8   : > { %v13228_v29 = vpop.f32.mrb[15].mxu0  ;;  %v11609_v8 = vmul.f32 %v11608_v57, %v11604_v46 }
 0x7ea   : > { %v11611_v41 = vadd.f32 %v11610_v33, %v11609_v8 }
 0x7eb   : > { %v13985_v38 = vpop.eup %13984 }
 0x7ec   : > { %v12127_v34 = vadd.f32 1.0, %v13985_v38  ;;  %v12756_v21 = vmul.f32 -1.442695, %v11611_v41 }
 0x7ee   : > { %13986 = vrcp.f32 %v12127_v34 }
 0x7ef   : > { %13988 = vpow2.f32 %v12756_v21 }
 0x7f8   : > { %v13987_v26 = vpop.eup %13986 }
 0x7f9   : > { %v12135_v27 = vsel %vm520_vm1, %v13987_v26, 0  ;;  %v13989_v50 = vpop.eup %13988 }
 0x7fa   : > { %v12206_v55 = vand.u32 4294901760, %v12135_v27 }
 0x7fc   : > { %v12207_v3 = vsub.f32 %v12135_v27, %v12206_v55 }
 0x7fe   : > { %v12208_v17 = vand.u32 4294901760, %v12207_v3 }
 0x800   : > { %v12209_v10 = vsub.f32 %v12207_v3, %v12208_v17 }
 0x802   : > { %v12210_v31 = vand.u32 4294901760, %v12209_v10 }
 0x804   : > { %12211 = vmatmul.mubr.f32.vlgmr.msra.gmra.mrb[16].mxu0 %v12210_v31 }
 0x805   : > { %13644 = vmatpush1.bf16.msra.mxu0 %v16337_v42  ;;  %12301 = vmatprep.mubr.f32.mxu0 %v16892_v2 }
 0x806   : > { %13646 = vmatprep.subr.bf16.mxu0 %v13645_v7 }
 0x80a   : > { %v11148_v63 = vpop.xlane.xlu0 %11147 }
 0x80c   : > { %12303 = vmatmul.mubr.f32.vlgmr.msra.gmra.mrb[16].mxu0 %v12206_v55 }
 0x80d   : > { %13648 = vmatpush1.bf16.msra.mxu0 %v13647_v61  ;;  %12381 = vmatprep.mubr.f32.mxu0 %v16892_v2  ;;  %v16894_v61 = vld [vmem:[#allocation23_spill] sm:$0xff] }
 0x80e   : > { %13650 = vmatprep.subr.bf16.mxu0 %v16314_v16 }
 0x814   : > { %12384 = vmatmul.mubr.f32.vlgmr.msra.gmra.mrb[16].mxu0 %v12207_v3 }
 0x815   : > { %13652 = vmatpush1.bf16.msra.mxu0 %v16318_v11  ;;  %12458 = vmatprep.mubr.f32.mxu0 %v16892_v2 }
 0x816   : > { %13654 = vmatprep.subr.bf16.mxu0 %v16344_v14 }
 0x81c   : > { %12462 = vmatmul.mubr.f32.vlgmr.msra.gmra.mrb[16].mxu0 %v12208_v17 }
 0x81d   : > { %13656 = vmatpush1.bf16.msra.mxu0 %v16346_v43  ;;  %12544 = vmatprep.mubr.f32.mxu0 %v16892_v2  ;;  %v13996_v43 = vld [vmem:[%s14203_s18] sm:$0xff]  ;;  %s14072_s18 = smov [#allocation2]  }
 0x81e   : > { %13658 = vmatprep.subr.bf16.mxu0 %v16314_v16  ;;  %v11615_v16 = vadd.f32 1.0, %v13989_v50  ;;  %s14001_s20 = sshll.u32 %s14072_s18, 4  ;;  %s14002_s20 = int_to_ptr.vmem [resolvable:$false] %s14001_s20 }
 0x81f   : > { %s14003_s3 = scalar_lea.vmem %s14002_s20, 256  ;;  %p14004_p0 = scmp.lt.s32.totalorder %s16403_s28, %s14002_s20 }
 0x820   : > { %13990 = vrcp.f32 %v11615_v16  ;;  %p14005_p1 = scmp.lt.s32.totalorder %s14003_s3, %s13997_s17 }
 0x822   : > { %p14006_p2 = por %p14005_p1, %p14004_p0 }
 0x824   : > { %12546 = vmatmul.mubr.f32.vlgmr.msra.gmra.mrb[16].mxu0 %v12206_v55  ;;  %p14007_p3 = pnand %p14006_p2, %p14000_p13 }
 0x825   : > { %13660 = vmatpush1.bf16.msra.mxu0 %v16318_v11  ;;  %12620 = vmatprep.mubr.f32.mxu0 %v16892_v2 }
 0x82a   : > { %v13991_v11 = vpop.eup %13990 }
 0x82b   : > { %v11618_v48 = vmul.f32 %v13991_v11, %v11611_v41 }
 0x82c   : > { %12622 = vmatmul.mubr.f32.vlgmr.msra.gmra.mrb[16].mxu0 %v12206_v55 }
 0x86b   : > { %v11151_v6 = vpop.xlane.xlu0 %11150 }
 0x86c   : > { %v11152_v2 = vadd.f32 %v11151_v6, %v11148_v63 }
 0x86e   : > { %v11154_v47 = vmul.f32 0.03125, %v11152_v2 }
 0x870   : > { %v11619_v9 = vmul.f32 %v11618_v48, %v11154_v47 }
 0x872   : > { %v12759_v37 = vmul.f32 -1.442695, %v11619_v9 }
 0x874   : > { %13992 = vpow2.f32 %v12759_v37 }
 0x87e   : > { %v13993_v45 = vpop.eup %13992 }
 0x87f   : > { %v12635_v42 = vadd.f32 1.0, %v13993_v45 }
 0x881   : > { %13994 = vrcp.f32 %v12635_v42 }
 0x88b   : > { %v13995_v58 = vpop.eup %13994 }
 0x88c   : > { %12640 = vperm.xlu1 %13954, %v13995_v58  }
 0x89e   : > { %v12119_v28 = vpop.f32.mrb[16].mxu1 }
 0x89f   : > { %v12121_v7 = vpop.f32.mrb[17].mxu1  ;;  %v12628_v60 = vmul.f32 %v12119_v28, %v16894_v61 }
 0x8a0   : > { %v12629_v62 = vmul.f32 %v12121_v7, %v16895_v36 }
 0x8ff   : > { %v12623_v39 = vpop.f32.mrb[16].mxu0 }
 0x900   : > { %v12630_v44 = vmul.f32 %v12628_v60, %v12623_v39  ;;  %v12625_v32 = vpop.f32.mrb[17].mxu0 }
 0x901   : > { %v12631_v54 = vmul.f32 %v12629_v62, %v12625_v32 }
 0x90b   : > { %v12641_v19 = vpop.permute.xlu1 %12640 }
 0x90c   : > { %v12643_v0 = vmul.f32 %v12641_v19, %v12630_v44  ;;  %v12644_v14 = vmul.f32 %v12641_v19, %v12631_v54 }
 0x90e   : > { %v12646_v18 = vadd.f32 %v13996_v43, %v12643_v0  ;;  %v12647_v13 = vadd.f32 %v12644_v14, %v16896_v25 }
 0x910   : > { %v12650_v5 = vcombine.low %v12646_v18, %v12647_v13 }
 0x912   : > { %12652 = vst [vmem:[%s460_s1] sm:$0xff] %v12650_v5 }
 0x913   : > { %14010 = shalt.err (!%p14007_p3)
}
 0x914   : > { %s14011_s21 = scalar_lea.hbm %s16401_s27, 128  ;;  %s14015_s25 = scalar_lea.hbm %s16457_s14, 256 }
 0x915   : > { %p14012_p4 = scmp.ne.s32.totalorder %s16401_s27, %s14011_s21  ;;  %p14016_p9 = scmp.lt.u32.totalorder %s16401_s27, %s16457_s14 }
 0x916   : > { %p14017_p10 = scmp.lt.u32.totalorder %s14015_s25, %s14011_s21  ;;  %p14019_p12 = scmp.lt.u32.totalorder %s14011_s21, %s16401_s27 }
 0x917   : > { %p14013_p7 = pnand %p14012_p4, %p14186_p5 }
 0x918   : > { %p14018_p11 = por %p14017_p10, %p14016_p9 }
 0x919   : > { %p14014_p8 = pneg %p14013_p7 }
 0x91a   : > { %p14020_p13 = por %p14019_p12, %p14018_p11 }
 0x91c   : > { %p14021_p0 = pnand %p14020_p13, %p14014_p8 }
 0x91e   : > { %14024 = shalt.err (!%p14021_p0)
}
 0x91f   : > { %13903 = dma.vmem_to_hbm [thread:$0]  (%p14186_p5), %s16403_s28, 128, %s16401_s27, %s12654_s2  }
 0x920 PF: > { %p13909_p1 = scmp.ge.s32.totalorder %s14059_s16, 2  ;;  %s12680_s3 = sand.u32 1, %s14047_s29  }
 0x921   : > { %s12681_s17 = scalar_lea.sflag [#allocation3], %s12680_s3 }
 0x922   : > { %p13906_p2 = pnand %p13909_p1, %p14190_p6 }
 0x924   : > { %14042 = dma.done.wait (!%p13906_p2), %s12681_s17, 128  }
 0x925   : > { %14044 = vsyncadd (!%p13906_p2), %s12681_s17, 4294967168  ;;  %p24_p3 = scmp.ge.s32.totalorder %s14173_s19, 4   ;;  %s16897_s29 = smov %s14051_s30 }
 0x926   : > { %s16898_s30 = smov %s14055_s15  ;;  %s16899_s15 = smov %s14184_s22 }
 0x927   : > { %s16900_s16 = smov %s14173_s19  ;;  %26 = sbr.rel (!%p24_p3) target bundleno = 8 (0x8), region = 127 }
 0x92e   :  { %12686 = vsyncpa [#allocation3], 1 }
 0x92f   :  { %12688 = vsyncpa [#allocation3 + $0x1], 1 }

</bundles_post_ra>
